<compile_context>
chip_gen: v7x
topology: tpu7x:2x2x1
jax: 0.10.0
libtpu: 0.0.40
codegen_flags: <defaults>
</compile_context>

<pallas_src>
import jax
import jax.numpy as jnp
from jax.experimental import pallas as pl
from jax.experimental.pallas import tpu as pltpu


# -----------------------------------------------------------------------------
# Fused Conv5x5("same") + BatchNorm(train) + ReLU + MaxPool(k) block
# -----------------------------------------------------------------------------

def _make_block_kernel(*, B, H, Cin, Cout, W, k, n_taps):
    Hk, Wk = H // k, W // k
    K = 5 * Cin                      # contraction: (kh, ci) packed; block 1: (kh, kw)
    inv_n = 1.0 / float(B * H * W)   # BN count per channel
    # Hoist conv taps into registers only when they are small (conv3's 5x(64,160) bf16
    # taps would blow the 64-vreg budget and spill).
    hoist_taps = (n_taps * Cout * K * 2) <= 32 * 1024

    def kernel(x_ref, w_ref, gamma_ref, beta_ref, sel_ref, o_ref, y_ref):
        # x_ref     : (B*(H+4)*Cin, Win) bf16  H-padded merged-(h, ci) input
        #             (Win == W for the kw-prepacked block 1, W+4 for blocks 2/3)
        # w_ref     : (n_taps, Cout, K)  bf16  conv taps, column = kh*Cin + ci
        # gamma/beta: (Cout, 1) f32            BatchNorm affine parameters
        # sel_ref   : (k, W, Wk) bf16          exact 0/1 W-pool lane selectors
        # o_ref     : (B*Hk*Cout, Wk) bf16     pooled output, merged (b, hk, c) rows
        # y_ref     : (B*H, Cout, W) bf16      conv output, VMEM-resident for the batch
        taps = [w_ref[t] for t in range(n_taps)] if hoist_taps else None

        # ---- pass 1: conv rows -> y scratch, accumulate BN batch statistics ----
        def conv_image(b, carry):
            base = b * (H + 4) * Cin

            def conv_row(h, c):
                s_acc, ss_acc = c
                start = pl.multiple_of(base + h * Cin, Cin)
                slab = x_ref[pl.ds(start, K), :]                  # (K, Win) bf16
                acc = jnp.zeros((Cout, W), jnp.float32)
                for t in range(n_taps):
                    wt = taps[t] if hoist_taps else w_ref[t]
                    rhs = slab if n_taps == 1 else slab[:, t:t + W]
                    acc = acc + jnp.dot(wt, rhs,
                                        preferred_element_type=jnp.float32)
                y_ref[b * H + h] = acc.astype(y_ref.dtype)
                return s_acc + acc, ss_acc + acc * acc

            return jax.lax.fori_loop(0, H, conv_row, carry)

        zero = jnp.zeros((Cout, W), jnp.float32)
        s, ss = jax.lax.fori_loop(0, B, conv_image, (zero, zero))

        # ---- training-mode BN (biased variance); conv bias is absorbed exactly ----
        # TODO(synk): E[x^2]-E[x]^2 can cancel for trained weights with |mean| >> std;
        # a centered second pass over y_ref would be more robust.
        mean = jnp.sum(s, axis=1, keepdims=True) * inv_n          # (Cout, 1)
        var = jnp.sum(ss, axis=1, keepdims=True) * inv_n - mean * mean
        scale = gamma_ref[...] * jax.lax.rsqrt(var + 1e-5)
        shift = beta_ref[...] - mean * scale
        scale_b = jnp.broadcast_to(scale, (Cout, W))              # hoisted broadcasts
        shift_b = jnp.broadcast_to(shift, (Cout, W))

        # ---- pass 2: BN affine + ReLU + MaxPool(k x k), straight out of VMEM ----
        def pool_image(b, carry):
            def pool_row(hk, c):
                r0 = pl.multiple_of(b * H + hk * k, k)
                rows = y_ref[pl.ds(r0, k)].astype(jnp.float32)    # (k, Cout, W)
                z = jnp.max(jnp.maximum(rows * scale_b + shift_b, 0.0), axis=0)
                zb = z.astype(jnp.bfloat16)                       # (Cout, W)
                pooled = jnp.dot(zb, sel_ref[0],
                                 preferred_element_type=jnp.float32)
                for dw in range(1, k):                            # pool over W window
                    pooled = jnp.maximum(
                        pooled, jnp.dot(zb, sel_ref[dw],
                                        preferred_element_type=jnp.float32))
                o0 = pl.multiple_of((b * Hk + hk) * Cout, Cout)
                o_ref[pl.ds(o0, Cout), :] = pooled.astype(o_ref.dtype)
                return c

            return jax.lax.fori_loop(0, Hk, pool_row, carry)

        jax.lax.fori_loop(0, B, pool_image, 0)

    return kernel


def fused_conv_bn_relu_pool(xp, w, gamma, beta, *, B, H, Cin, Cout, W, k, n_taps):
    """xp: (B*(H+4)*Cin, Win) bf16 merged layout.  Returns (B*(H//k)*Cout, W//k) bf16."""
    Hk, Wk = H // k, W // k
    # sel[dw, w, wk] = 1 iff w == wk*k + dw  (exact 0/1 selection matrices, bf16)
    sel = (jnp.arange(W)[None, :, None]
           == (k * jnp.arange(Wk)[None, None, :] + jnp.arange(k)[:, None, None])
           ).astype(jnp.bfloat16)
    kernel = _make_block_kernel(B=B, H=H, Cin=Cin, Cout=Cout, W=W, k=k, n_taps=n_taps)
    vmem = lambda: pl.BlockSpec(memory_space=pltpu.MemorySpace.VMEM)
    # TODO(synk): on v7x (2 TensorCores) this fusion serializes the batch; a grid=(B,)
    # "parallel" two-pass variant would trade y HBM round trips for core parallelism.
    # TODO(synk): blocks 2/3 dots have lane widths 72/18 (<128); batching R output rows
    # per dot / emitting a lane-merged (C*Wk) pooled layout would fill MXU/store lanes
    # but changes the layout the next conv consumes.
    return pl.pallas_call(
        kernel,
        out_shape=jax.ShapeDtypeStruct((B * Hk * Cout, Wk), jnp.bfloat16),
        in_specs=[vmem() for _ in range(5)],
        out_specs=vmem(),
        scratch_shapes=[pltpu.VMEM((B * H, Cout, W), jnp.bfloat16)],
        compiler_params=pltpu.CompilerParams(vmem_limit_bytes=32 * 1024 * 1024),
    )(xp, w, gamma, beta, sel)


# --------------------------------- MLP head ----------------------------------

def _mlp_kernel(x_ref, w1_ref, b1_ref, w2_ref, b2_ref, w3_ref, b3_ref, o_ref):
    h = jnp.dot(x_ref[...], w1_ref[...],
                preferred_element_type=jnp.float32) + b1_ref[...]
    h = jnp.dot(h.astype(jnp.bfloat16), w2_ref[...],
                preferred_element_type=jnp.float32) + b2_ref[...]
    o_ref[...] = jnp.dot(h.astype(jnp.bfloat16), w3_ref[...],
                         preferred_element_type=jnp.float32) + b3_ref[...]


def mlp(x, w1, b1, w2, b2, w3, b3):
    B = x.shape[0]
    return pl.pallas_call(
        _mlp_kernel,
        out_shape=jax.ShapeDtypeStruct((B, w3.shape[1]), jnp.float32),
    )(x, w1, b1, w2, b2, w3, b3)


# -------------------------------- full forward -------------------------------

def cnn_bn_vo_forward(x_nchw, p):
    B, _, H, W = x_nchw.shape      # (B, 1, 224, 288); spatial forced by Linear(64*7*9,.)

    # Block 1: pack the 5 kw-shifted copies of the single input channel into the 8-wide
    # channel dim (+3 zero channels), so each conv output row is ONE (16,40)@(40,288) dot.
    x = x_nchw[:, 0]                                            # (B, H, W) f32
    xw = jnp.pad(x, ((0, 0), (0, 0), (2, 2)))                   # W "same" padding
    xs = jnp.stack([xw[:, :, c:c + W] for c in range(5)], axis=2)   # (B, H, 5, W)
    xs = jnp.pad(xs, ((0, 0), (2, 2), (0, 3), (0, 0)))          # H pad + channel 5->8
    xp1 = xs.reshape(B * (H + 4) * 8, W).astype(jnp.bfloat16)
    o1 = fused_conv_bn_relu_pool(xp1, p["w1"], p["g1"], p["bt1"],
                                 B=B, H=H, Cin=8, Cout=16, W=W, k=4, n_taps=1)
    H2, W2 = H // 4, W // 4                                     # 56, 72

    # Block 2
    x2 = o1.reshape(B, H2, 16, W2)
    xp2 = jnp.pad(x2, ((0, 0), (2, 2), (0, 0), (2, 2))).reshape(B * (H2 + 4) * 16, W2 + 4)
    o2 = fused_conv_bn_relu_pool(xp2, p["w2"], p["g2"], p["bt2"],
                                 B=B, H=H2, Cin=16, Cout=32, W=W2, k=4, n_taps=5)
    H3, W3 = H2 // 4, W2 // 4                                   # 14, 18

    # Block 3
    x3 = o2.reshape(B, H3, 32, W3)
    xp3 = jnp.pad(x3, ((0, 0), (2, 2), (0, 0), (2, 2))).reshape(B * (H3 + 4) * 32, W3 + 4)
    o3 = fused_conv_bn_relu_pool(xp3, p["w3"], p["g3"], p["bt3"],
                                 B=B, H=H3, Cin=32, Cout=64, W=W3, k=2, n_taps=5)
    H4, W4 = H3 // 2, W3 // 2                                   # 7, 9

    # o3 rows are (b, h, c)-major; torch's x.view(B,-1) flattens (c, h, w).  fw1's rows
    # were pre-permuted at init, so a straight (bf16) reshape is all that's needed.
    feat = o3.reshape(B, H4 * 64 * W4)
    return mlp(feat, p["fw1"], p["fb1"], p["fw2"], p["fb2"], p["fw3"], p["fb3"])


# ------------------------ deterministic parameter init -----------------------

def init_params(key):
    ks = jax.random.split(key, 15)

    def conv_w_kw_major(k_, cin, cout):
        # torch (Cout, Cin, 5, 5) -> kw-major taps (5, Cout, 5*Cin), column = kh*Cin + ci
        w = 0.05 * jax.random.normal(k_, (cout, cin, 5, 5), jnp.float32)
        return jnp.transpose(w, (3, 0, 2, 1)).reshape(5, cout, 5 * cin).astype(jnp.bfloat16)

    def conv_w_block1(k_):
        # torch (16, 1, 5, 5) -> one packed tap (1, 16, 40); column = kh*8 + kw
        # (the 8-wide channel dim carries the 5 kw-shifted input copies + 3 zero pads).
        w = 0.05 * jax.random.normal(k_, (16, 1, 5, 5), jnp.float32)
        wp = jnp.pad(w[:, 0], ((0, 0), (0, 0), (0, 3))).reshape(16, 40)
        return wp[None].astype(jnp.bfloat16)

    # Conv biases are intentionally absent: training-mode BatchNorm cancels them exactly.
    p = {}
    p["w1"] = conv_w_block1(ks[0])
    p["g1"] = 1.0 + 0.1 * jax.random.normal(ks[1], (16, 1), jnp.float32)
    p["bt1"] = 0.1 * jax.random.normal(ks[2], (16, 1), jnp.float32)
    p["w2"] = conv_w_kw_major(ks[3], 16, 32)
    p["g2"] = 1.0 + 0.1 * jax.random.normal(ks[4], (32, 1), jnp.float32)
    p["bt2"] = 0.1 * jax.random.normal(ks[5], (32, 1), jnp.float32)
    p["w3"] = conv_w_kw_major(ks[6], 32, 64)
    p["g3"] = 1.0 + 0.1 * jax.random.normal(ks[7], (64, 1), jnp.float32)
    p["bt3"] = 0.1 * jax.random.normal(ks[8], (64, 1), jnp.float32)
    # fc1 weight generated in torch's (C,H,W)-flatten row order, then pre-permuted to our
    # (H,C,W) row order and cast to bf16.
    fw1 = 0.02 * jax.random.normal(ks[9], (64 * 7 * 9, 100), jnp.float32)
    p["fw1"] = (fw1.reshape(64, 7, 9, 100).transpose(1, 0, 2, 3)
                .reshape(64 * 7 * 9, 100).astype(jnp.bfloat16))
    p["fb1"] = 0.02 * jax.random.normal(ks[10], (1, 100), jnp.float32)
    p["fw2"] = (0.02 * jax.random.normal(ks[11], (100, 100), jnp.float32)).astype(jnp.bfloat16)
    p["fb2"] = 0.02 * jax.random.normal(ks[12], (1, 100), jnp.float32)
    p["fw3"] = (0.02 * jax.random.normal(ks[13], (100, 6), jnp.float32)).astype(jnp.bfloat16)
    p["fb3"] = 0.02 * jax.random.normal(ks[14], (1, 6), jnp.float32)
    return p


if __name__ == "__main__":
    key = jax.random.PRNGKey(0)
    pkey, xkey = jax.random.split(key)
    params = init_params(pkey)
    # NCHW input like the PyTorch module; 224x288 spatial is forced by Linear(64*7*9, 100).
    x = jax.random.normal(xkey, (2, 1, 224, 288), jnp.float32)
    out = jax.jit(cnn_bn_vo_forward)(x, params)
    out = jax.block_until_ready(out)
    assert out.shape == (2, 6), out.shape
    assert bool(jnp.all(jnp.isfinite(out)))
    print("KERNEL_OK")
</pallas_src>

<mosaic_0001>
module attributes {stable_mosaic.version = 11 : i64} {
  func.func @kernel(%arg0: memref<3648x288xbf16, #tpu.memory_space<vmem>>, %arg1: memref<1x16x40xbf16, #tpu.memory_space<vmem>>, %arg2: memref<16x1xf32, #tpu.memory_space<vmem>>, %arg3: memref<16x1xf32, #tpu.memory_space<vmem>>, %arg4: memref<4x288x72xbf16, #tpu.memory_space<vmem>>, %arg5: memref<1792x72xbf16, #tpu.memory_space<vmem>>, %arg6: memref<448x16x288xbf16, #tpu.memory_space<vmem>>) attributes {dimension_semantics = [], scalar_prefetch = 0 : i64, scratch_operands = 1 : i64, tpu.core_type = #tpu.core_type<tc>} {
    %c0 = arith.constant 0 : index
    %c0_0 = arith.constant 0 : index
    %c0_1 = arith.constant 0 : index
    %0 = vector.load %arg1[%c0, %c0_0, %c0_1] : memref<1x16x40xbf16, #tpu.memory_space<vmem>>, vector<1x16x40xbf16>
    %1 = vector.shape_cast %0 : vector<1x16x40xbf16> to vector<16x40xbf16>
    %cst = arith.constant 0.000000e+00 : f32
    %2 = vector.broadcast %cst : f32 to vector<16x288xf32>
    %c0_i32 = arith.constant 0 : i32
    %c2_i32 = arith.constant 2 : i32
    %3 = arith.addi %c0_i32, %c2_i32 : i32
    %c1_i32 = arith.constant 1 : i32
    %4:2 = scf.for %arg7 = %c0_i32 to %3 step %c1_i32 iter_args(%arg8 = %2, %arg9 = %2) -> (vector<16x288xf32>, vector<16x288xf32>)  : i32 {
      %c228_i32 = arith.constant 228 : i32
      %28 = arith.muli %arg7, %c228_i32 : i32
      %c8_i32 = arith.constant 8 : i32
      %29 = arith.muli %28, %c8_i32 : i32
      %c0_i32_16 = arith.constant 0 : i32
      %c224_i32 = arith.constant 224 : i32
      %30 = arith.addi %c0_i32_16, %c224_i32 : i32
      %c1_i32_17 = arith.constant 1 : i32
      %31:2 = scf.for %arg10 = %c0_i32_16 to %30 step %c1_i32_17 iter_args(%arg11 = %arg8, %arg12 = %arg9) -> (vector<16x288xf32>, vector<16x288xf32>)  : i32 {
        %c8_i32_19 = arith.constant 8 : i32
        %32 = arith.muli %arg10, %c8_i32_19 : i32
        %33 = arith.addi %29, %32 : i32
        %34 = tpu.assume_multiple %33, 8 : i32
        %35 = arith.index_cast %34 : i32 to index
        %c0_20 = arith.constant 0 : index
        %36 = vector.load %arg0[%35, %c0_20] : memref<3648x288xbf16, #tpu.memory_space<vmem>>, vector<40x288xbf16>
        %cst_21 = arith.constant 0.000000e+00 : f32
        %37 = vector.broadcast %cst_21 : f32 to vector<16x288xf32>
        %cst_22 = arith.constant dense<0.000000e+00> : vector<16x288xf32>
        %38 = tpu.matmul %1, %36, %cst_22 {dimension_numbers = #tpu.dot_dimension_numbers<[1], [0], [0], [1], [0, 0, 1, 1], [], []>} : vector<16x40xbf16>, vector<40x288xbf16>, vector<16x288xf32> -> vector<16x288xf32>
        %39 = arith.addf %37, %38 : vector<16x288xf32>
        %40 = arith.truncf %39 : vector<16x288xf32> to vector<16x288xbf16>
        %c224_i32_23 = arith.constant 224 : i32
        %41 = arith.muli %arg7, %c224_i32_23 : i32
        %42 = arith.addi %41, %arg10 : i32
        %43 = arith.index_cast %42 : i32 to index
        %c0_24 = arith.constant 0 : index
        %c0_25 = arith.constant 0 : index
        %44 = vector.load %arg6[%43, %c0_24, %c0_25] : memref<448x16x288xbf16, #tpu.memory_space<vmem>>, vector<1x16x288xbf16>
        %45 = vector.shape_cast %44 : vector<1x16x288xbf16> to vector<16x288xbf16>
        %46 = vector.shape_cast %40 : vector<16x288xbf16> to vector<1x16x288xbf16>
        tpu.vector_store %arg6[%43, %c0_24, %c0_25], %46 {strides = array<i32>} : memref<448x16x288xbf16, #tpu.memory_space<vmem>>, vector<1x16x288xbf16>,
        %47 = arith.addf %arg11, %39 : vector<16x288xf32>
        %48 = arith.mulf %39, %39 : vector<16x288xf32>
        %49 = arith.addf %arg12, %48 : vector<16x288xf32>
        scf.yield %47, %49 : vector<16x288xf32>, vector<16x288xf32>
      }
      %c224_i32_18 = arith.constant 224 : i32
      scf.yield %31#0, %31#1 : vector<16x288xf32>, vector<16x288xf32>
    }
    %c2_i32_2 = arith.constant 2 : i32
    %cst_3 = arith.constant dense<0.000000e+00> : vector<16xf32>
    %5 = vector.multi_reduction <add>, %4#0, %cst_3 [1] : vector<16x288xf32> to vector<16xf32>
    %6 = vector.shape_cast %5 : vector<16xf32> to vector<16x1xf32>
    %cst_4 = arith.constant 7.75049648E-6 : f32
    %7 = vector.broadcast %cst_4 : f32 to vector<16x1xf32>
    %8 = arith.mulf %6, %7 : vector<16x1xf32>
    %cst_5 = arith.constant dense<0.000000e+00> : vector<16xf32>
    %9 = vector.multi_reduction <add>, %4#1, %cst_5 [1] : vector<16x288xf32> to vector<16xf32>
    %10 = vector.shape_cast %9 : vector<16xf32> to vector<16x1xf32>
    %cst_6 = arith.constant 7.75049648E-6 : f32
    %11 = vector.broadcast %cst_6 : f32 to vector<16x1xf32>
    %12 = arith.mulf %10, %11 : vector<16x1xf32>
    %13 = arith.mulf %8, %8 : vector<16x1xf32>
    %14 = arith.subf %12, %13 : vector<16x1xf32>
    %c0_7 = arith.constant 0 : index
    %c0_8 = arith.constant 0 : index
    %15 = vector.load %arg2[%c0_7, %c0_8] : memref<16x1xf32, #tpu.memory_space<vmem>>, vector<16x1xf32>
    %cst_9 = arith.constant 9.99999974E-6 : f32
    %16 = vector.broadcast %cst_9 : f32 to vector<16x1xf32>
    %17 = arith.addf %14, %16 : vector<16x1xf32>
    %18 = math.rsqrt %17 : vector<16x1xf32>
    %19 = arith.mulf %15, %18 : vector<16x1xf32>
    %c0_10 = arith.constant 0 : index
    %c0_11 = arith.constant 0 : index
    %20 = vector.load %arg3[%c0_10, %c0_11] : memref<16x1xf32, #tpu.memory_space<vmem>>, vector<16x1xf32>
    %21 = arith.mulf %8, %19 : vector<16x1xf32>
    %22 = arith.subf %20, %21 : vector<16x1xf32>
    %23 = vector.shape_cast %19 : vector<16x1xf32> to vector<16x1xf32>
    %24 = vector.broadcast %23 : vector<16x1xf32> to vector<16x288xf32>
    %25 = vector.shape_cast %22 : vector<16x1xf32> to vector<16x1xf32>
    %26 = vector.broadcast %25 : vector<16x1xf32> to vector<16x288xf32>
    %c0_i32_12 = arith.constant 0 : i32
    %c2_i32_13 = arith.constant 2 : i32
    %27 = arith.addi %c0_i32_12, %c2_i32_13 : i32
    %c1_i32_14 = arith.constant 1 : i32
    scf.for %arg7 = %c0_i32_12 to %27 step %c1_i32_14  : i32 {
      %c0_i32_16 = arith.constant 0 : i32
      %c56_i32 = arith.constant 56 : i32
      %28 = arith.addi %c0_i32_16, %c56_i32 : i32
      %c1_i32_17 = arith.constant 1 : i32
      scf.for %arg8 = %c0_i32_16 to %28 step %c1_i32_17  : i32 {
        %c224_i32 = arith.constant 224 : i32
        %29 = arith.muli %arg7, %c224_i32 : i32
        %c4_i32 = arith.constant 4 : i32
        %30 = arith.muli %arg8, %c4_i32 : i32
        %31 = arith.addi %29, %30 : i32
        %32 = tpu.assume_multiple %31, 4 : i32
        %33 = arith.index_cast %32 : i32 to index
        %c0_19 = arith.constant 0 : index
        %c0_20 = arith.constant 0 : index
        %34 = vector.load %arg6[%33, %c0_19, %c0_20] : memref<448x16x288xbf16, #tpu.memory_space<vmem>>, vector<4x16x288xbf16>
        %35 = arith.extf %34 : vector<4x16x288xbf16> to vector<4x16x288xf32>
        %36 = vector.shape_cast %24 : vector<16x288xf32> to vector<1x16x288xf32>
        %37 = vector.broadcast %36 : vector<1x16x288xf32> to vector<4x16x288xf32>
        %38 = arith.mulf %35, %37 : vector<4x16x288xf32>
        %39 = vector.shape_cast %26 : vector<16x288xf32> to vector<1x16x288xf32>
        %40 = vector.broadcast %39 : vector<1x16x288xf32> to vector<4x16x288xf32>
        %41 = arith.addf %38, %40 : vector<4x16x288xf32>
        %cst_21 = arith.constant 0.000000e+00 : f32
        %42 = vector.broadcast %cst_21 : f32 to vector<4x16x288xf32>
        %43 = arith.maximumf %41, %42 : vector<4x16x288xf32>
        %cst_22 = arith.constant dense<0xFF800000> : vector<16x288xf32>
        %44 = vector.multi_reduction <maximumf>, %43, %cst_22 [0] : vector<4x16x288xf32> to vector<16x288xf32>
        %45 = arith.truncf %44 : vector<16x288xf32> to vector<16x288xbf16>
        %c0_23 = arith.constant 0 : index
        %c0_24 = arith.constant 0 : index
        %c0_25 = arith.constant 0 : index
        %46 = vector.load %arg4[%c0_23, %c0_24, %c0_25] : memref<4x288x72xbf16, #tpu.memory_space<vmem>>, vector<1x288x72xbf16>
        %47 = vector.shape_cast %46 : vector<1x288x72xbf16> to vector<288x72xbf16>
        %cst_26 = arith.constant dense<0.000000e+00> : vector<16x72xf32>
        %48 = tpu.matmul %45, %47, %cst_26 {dimension_numbers = #tpu.dot_dimension_numbers<[1], [0], [0], [1], [0, 0, 1, 1], [], []>} : vector<16x288xbf16>, vector<288x72xbf16>, vector<16x72xf32> -> vector<16x72xf32>
        %c1 = arith.constant 1 : index
        %c0_27 = arith.constant 0 : index
        %c0_28 = arith.constant 0 : index
        %49 = vector.load %arg4[%c1, %c0_27, %c0_28] : memref<4x288x72xbf16, #tpu.memory_space<vmem>>, vector<1x288x72xbf16>
        %50 = vector.shape_cast %49 : vector<1x288x72xbf16> to vector<288x72xbf16>
        %cst_29 = arith.constant dense<0.000000e+00> : vector<16x72xf32>
        %51 = tpu.matmul %45, %50, %cst_29 {dimension_numbers = #tpu.dot_dimension_numbers<[1], [0], [0], [1], [0, 0, 1, 1], [], []>} : vector<16x288xbf16>, vector<288x72xbf16>, vector<16x72xf32> -> vector<16x72xf32>
        %52 = arith.maximumf %48, %51 : vector<16x72xf32>
        %c2 = arith.constant 2 : index
        %c0_30 = arith.constant 0 : index
        %c0_31 = arith.constant 0 : index
        %53 = vector.load %arg4[%c2, %c0_30, %c0_31] : memref<4x288x72xbf16, #tpu.memory_space<vmem>>, vector<1x288x72xbf16>
        %54 = vector.shape_cast %53 : vector<1x288x72xbf16> to vector<288x72xbf16>
        %cst_32 = arith.constant dense<0.000000e+00> : vector<16x72xf32>
        %55 = tpu.matmul %45, %54, %cst_32 {dimension_numbers = #tpu.dot_dimension_numbers<[1], [0], [0], [1], [0, 0, 1, 1], [], []>} : vector<16x288xbf16>, vector<288x72xbf16>, vector<16x72xf32> -> vector<16x72xf32>
        %56 = arith.maximumf %52, %55 : vector<16x72xf32>
        %c3 = arith.constant 3 : index
        %c0_33 = arith.constant 0 : index
        %c0_34 = arith.constant 0 : index
        %57 = vector.load %arg4[%c3, %c0_33, %c0_34] : memref<4x288x72xbf16, #tpu.memory_space<vmem>>, vector<1x288x72xbf16>
        %58 = vector.shape_cast %57 : vector<1x288x72xbf16> to vector<288x72xbf16>
        %cst_35 = arith.constant dense<0.000000e+00> : vector<16x72xf32>
        %59 = tpu.matmul %45, %58, %cst_35 {dimension_numbers = #tpu.dot_dimension_numbers<[1], [0], [0], [1], [0, 0, 1, 1], [], []>} : vector<16x288xbf16>, vector<288x72xbf16>, vector<16x72xf32> -> vector<16x72xf32>
        %60 = arith.maximumf %56, %59 : vector<16x72xf32>
        %c56_i32_36 = arith.constant 56 : i32
        %61 = arith.muli %arg7, %c56_i32_36 : i32
        %62 = arith.addi %61, %arg8 : i32
        %c16_i32 = arith.constant 16 : i32
        %63 = arith.muli %62, %c16_i32 : i32
        %64 = tpu.assume_multiple %63, 16 : i32
        %65 = arith.truncf %60 : vector<16x72xf32> to vector<16x72xbf16>
        %66 = arith.index_cast %64 : i32 to index
        %c0_37 = arith.constant 0 : index
        %67 = vector.load %arg5[%66, %c0_37] : memref<1792x72xbf16, #tpu.memory_space<vmem>>, vector<16x72xbf16>
        tpu.vector_store %arg5[%66, %c0_37], %65 {strides = array<i32>} : memref<1792x72xbf16, #tpu.memory_space<vmem>>, vector<16x72xbf16>,
      }
      %c56_i32_18 = arith.constant 56 : i32
    }
    %c2_i32_15 = arith.constant 2 : i32
    return
  }
}

module attributes {stable_mosaic.version = 11 : i64} {
  func.func @kernel(%arg0: memref<1920x76xbf16, #tpu.memory_space<vmem>>, %arg1: memref<5x32x80xbf16, #tpu.memory_space<vmem>>, %arg2: memref<32x1xf32, #tpu.memory_space<vmem>>, %arg3: memref<32x1xf32, #tpu.memory_space<vmem>>, %arg4: memref<4x72x18xbf16, #tpu.memory_space<vmem>>, %arg5: memref<896x18xbf16, #tpu.memory_space<vmem>>, %arg6: memref<112x32x72xbf16, #tpu.memory_space<vmem>>) attributes {dimension_semantics = [], scalar_prefetch = 0 : i64, scratch_operands = 1 : i64, tpu.core_type = #tpu.core_type<tc>} {
    %c0 = arith.constant 0 : index
    %c0_0 = arith.constant 0 : index
    %c0_1 = arith.constant 0 : index
    %0 = vector.load %arg1[%c0, %c0_0, %c0_1] : memref<5x32x80xbf16, #tpu.memory_space<vmem>>, vector<1x32x80xbf16>
    %1 = vector.shape_cast %0 : vector<1x32x80xbf16> to vector<32x80xbf16>
    %c1 = arith.constant 1 : index
    %c0_2 = arith.constant 0 : index
    %c0_3 = arith.constant 0 : index
    %2 = vector.load %arg1[%c1, %c0_2, %c0_3] : memref<5x32x80xbf16, #tpu.memory_space<vmem>>, vector<1x32x80xbf16>
    %3 = vector.shape_cast %2 : vector<1x32x80xbf16> to vector<32x80xbf16>
    %c2 = arith.constant 2 : index
    %c0_4 = arith.constant 0 : index
    %c0_5 = arith.constant 0 : index
    %4 = vector.load %arg1[%c2, %c0_4, %c0_5] : memref<5x32x80xbf16, #tpu.memory_space<vmem>>, vector<1x32x80xbf16>
    %5 = vector.shape_cast %4 : vector<1x32x80xbf16> to vector<32x80xbf16>
    %c3 = arith.constant 3 : index
    %c0_6 = arith.constant 0 : index
    %c0_7 = arith.constant 0 : index
    %6 = vector.load %arg1[%c3, %c0_6, %c0_7] : memref<5x32x80xbf16, #tpu.memory_space<vmem>>, vector<1x32x80xbf16>
    %7 = vector.shape_cast %6 : vector<1x32x80xbf16> to vector<32x80xbf16>
    %c4 = arith.constant 4 : index
    %c0_8 = arith.constant 0 : index
    %c0_9 = arith.constant 0 : index
    %8 = vector.load %arg1[%c4, %c0_8, %c0_9] : memref<5x32x80xbf16, #tpu.memory_space<vmem>>, vector<1x32x80xbf16>
    %9 = vector.shape_cast %8 : vector<1x32x80xbf16> to vector<32x80xbf16>
    %cst = arith.constant 0.000000e+00 : f32
    %10 = vector.broadcast %cst : f32 to vector<32x72xf32>
    %c0_i32 = arith.constant 0 : i32
    %c2_i32 = arith.constant 2 : i32
    %11 = arith.addi %c0_i32, %c2_i32 : i32
    %c1_i32 = arith.constant 1 : i32
    %12:2 = scf.for %arg7 = %c0_i32 to %11 step %c1_i32 iter_args(%arg8 = %10, %arg9 = %10) -> (vector<32x72xf32>, vector<32x72xf32>)  : i32 {
      %c60_i32 = arith.constant 60 : i32
      %36 = arith.muli %arg7, %c60_i32 : i32
      %c16_i32 = arith.constant 16 : i32
      %37 = arith.muli %36, %c16_i32 : i32
      %c0_i32_24 = arith.constant 0 : i32
      %c56_i32 = arith.constant 56 : i32
      %38 = arith.addi %c0_i32_24, %c56_i32 : i32
      %c1_i32_25 = arith.constant 1 : i32
      %39:2 = scf.for %arg10 = %c0_i32_24 to %38 step %c1_i32_25 iter_args(%arg11 = %arg8, %arg12 = %arg9) -> (vector<32x72xf32>, vector<32x72xf32>)  : i32 {
        %c16_i32_27 = arith.constant 16 : i32
        %40 = arith.muli %arg10, %c16_i32_27 : i32
        %41 = arith.addi %37, %40 : i32
        %42 = tpu.assume_multiple %41, 16 : i32
        %43 = arith.index_cast %42 : i32 to index
        %c0_28 = arith.constant 0 : index
        %44 = vector.load %arg0[%43, %c0_28] : memref<1920x76xbf16, #tpu.memory_space<vmem>>, vector<80x76xbf16>
        %cst_29 = arith.constant 0.000000e+00 : f32
        %45 = vector.broadcast %cst_29 : f32 to vector<32x72xf32>
        %46 = vector.extract_strided_slice %44 {offsets = [0, 0], sizes = [80, 72], strides = [1, 1]} : vector<80x76xbf16> to vector<80x72xbf16>
        %cst_30 = arith.constant dense<0.000000e+00> : vector<32x72xf32>
        %47 = tpu.matmul %1, %46, %cst_30 {dimension_numbers = #tpu.dot_dimension_numbers<[1], [0], [0], [1], [0, 0, 1, 1], [], []>} : vector<32x80xbf16>, vector<80x72xbf16>, vector<32x72xf32> -> vector<32x72xf32>
        %48 = arith.addf %45, %47 : vector<32x72xf32>
        %49 = vector.extract_strided_slice %44 {offsets = [0, 1], sizes = [80, 72], strides = [1, 1]} : vector<80x76xbf16> to vector<80x72xbf16>
        %cst_31 = arith.constant dense<0.000000e+00> : vector<32x72xf32>
        %50 = tpu.matmul %3, %49, %cst_31 {dimension_numbers = #tpu.dot_dimension_numbers<[1], [0], [0], [1], [0, 0, 1, 1], [], []>} : vector<32x80xbf16>, vector<80x72xbf16>, vector<32x72xf32> -> vector<32x72xf32>
        %51 = arith.addf %48, %50 : vector<32x72xf32>
        %52 = vector.extract_strided_slice %44 {offsets = [0, 2], sizes = [80, 72], strides = [1, 1]} : vector<80x76xbf16> to vector<80x72xbf16>
        %cst_32 = arith.constant dense<0.000000e+00> : vector<32x72xf32>
        %53 = tpu.matmul %5, %52, %cst_32 {dimension_numbers = #tpu.dot_dimension_numbers<[1], [0], [0], [1], [0, 0, 1, 1], [], []>} : vector<32x80xbf16>, vector<80x72xbf16>, vector<32x72xf32> -> vector<32x72xf32>
        %54 = arith.addf %51, %53 : vector<32x72xf32>
        %55 = vector.extract_strided_slice %44 {offsets = [0, 3], sizes = [80, 72], strides = [1, 1]} : vector<80x76xbf16> to vector<80x72xbf16>
        %cst_33 = arith.constant dense<0.000000e+00> : vector<32x72xf32>
        %56 = tpu.matmul %7, %55, %cst_33 {dimension_numbers = #tpu.dot_dimension_numbers<[1], [0], [0], [1], [0, 0, 1, 1], [], []>} : vector<32x80xbf16>, vector<80x72xbf16>, vector<32x72xf32> -> vector<32x72xf32>
        %57 = arith.addf %54, %56 : vector<32x72xf32>
        %58 = vector.extract_strided_slice %44 {offsets = [0, 4], sizes = [80, 72], strides = [1, 1]} : vector<80x76xbf16> to vector<80x72xbf16>
        %cst_34 = arith.constant dense<0.000000e+00> : vector<32x72xf32>
        %59 = tpu.matmul %9, %58, %cst_34 {dimension_numbers = #tpu.dot_dimension_numbers<[1], [0], [0], [1], [0, 0, 1, 1], [], []>} : vector<32x80xbf16>, vector<80x72xbf16>, vector<32x72xf32> -> vector<32x72xf32>
        %60 = arith.addf %57, %59 : vector<32x72xf32>
        %61 = arith.truncf %60 : vector<32x72xf32> to vector<32x72xbf16>
        %c56_i32_35 = arith.constant 56 : i32
        %62 = arith.muli %arg7, %c56_i32_35 : i32
        %63 = arith.addi %62, %arg10 : i32
        %64 = arith.index_cast %63 : i32 to index
        %c0_36 = arith.constant 0 : index
        %c0_37 = arith.constant 0 : index
        %65 = vector.load %arg6[%64, %c0_36, %c0_37] : memref<112x32x72xbf16, #tpu.memory_space<vmem>>, vector<1x32x72xbf16>
        %66 = vector.shape_cast %65 : vector<1x32x72xbf16> to vector<32x72xbf16>
        %67 = vector.shape_cast %61 : vector<32x72xbf16> to vector<1x32x72xbf16>
        tpu.vector_store %arg6[%64, %c0_36, %c0_37], %67 {strides = array<i32>} : memref<112x32x72xbf16, #tpu.memory_space<vmem>>, vector<1x32x72xbf16>,
        %68 = arith.addf %arg11, %60 : vector<32x72xf32>
        %69 = arith.mulf %60, %60 : vector<32x72xf32>
        %70 = arith.addf %arg12, %69 : vector<32x72xf32>
        scf.yield %68, %70 : vector<32x72xf32>, vector<32x72xf32>
      }
      %c56_i32_26 = arith.constant 56 : i32
      scf.yield %39#0, %39#1 : vector<32x72xf32>, vector<32x72xf32>
    }
    %c2_i32_10 = arith.constant 2 : i32
    %cst_11 = arith.constant dense<0.000000e+00> : vector<32xf32>
    %13 = vector.multi_reduction <add>, %12#0, %cst_11 [1] : vector<32x72xf32> to vector<32xf32>
    %14 = vector.shape_cast %13 : vector<32xf32> to vector<32x1xf32>
    %cst_12 = arith.constant 1.24007944E-4 : f32
    %15 = vector.broadcast %cst_12 : f32 to vector<32x1xf32>
    %16 = arith.mulf %14, %15 : vector<32x1xf32>
    %cst_13 = arith.constant dense<0.000000e+00> : vector<32xf32>
    %17 = vector.multi_reduction <add>, %12#1, %cst_13 [1] : vector<32x72xf32> to vector<32xf32>
    %18 = vector.shape_cast %17 : vector<32xf32> to vector<32x1xf32>
    %cst_14 = arith.constant 1.24007944E-4 : f32
    %19 = vector.broadcast %cst_14 : f32 to vector<32x1xf32>
    %20 = arith.mulf %18, %19 : vector<32x1xf32>
    %21 = arith.mulf %16, %16 : vector<32x1xf32>
    %22 = arith.subf %20, %21 : vector<32x1xf32>
    %c0_15 = arith.constant 0 : index
    %c0_16 = arith.constant 0 : index
    %23 = vector.load %arg2[%c0_15, %c0_16] : memref<32x1xf32, #tpu.memory_space<vmem>>, vector<32x1xf32>
    %cst_17 = arith.constant 9.99999974E-6 : f32
    %24 = vector.broadcast %cst_17 : f32 to vector<32x1xf32>
    %25 = arith.addf %22, %24 : vector<32x1xf32>
    %26 = math.rsqrt %25 : vector<32x1xf32>
    %27 = arith.mulf %23, %26 : vector<32x1xf32>
    %c0_18 = arith.constant 0 : index
    %c0_19 = arith.constant 0 : index
    %28 = vector.load %arg3[%c0_18, %c0_19] : memref<32x1xf32, #tpu.memory_space<vmem>>, vector<32x1xf32>
    %29 = arith.mulf %16, %27 : vector<32x1xf32>
    %30 = arith.subf %28, %29 : vector<32x1xf32>
    %31 = vector.shape_cast %27 : vector<32x1xf32> to vector<32x1xf32>
    %32 = vector.broadcast %31 : vector<32x1xf32> to vector<32x72xf32>
    %33 = vector.shape_cast %30 : vector<32x1xf32> to vector<32x1xf32>
    %34 = vector.broadcast %33 : vector<32x1xf32> to vector<32x72xf32>
    %c0_i32_20 = arith.constant 0 : i32
    %c2_i32_21 = arith.constant 2 : i32
    %35 = arith.addi %c0_i32_20, %c2_i32_21 : i32
    %c1_i32_22 = arith.constant 1 : i32
    scf.for %arg7 = %c0_i32_20 to %35 step %c1_i32_22  : i32 {
      %c0_i32_24 = arith.constant 0 : i32
      %c14_i32 = arith.constant 14 : i32
      %36 = arith.addi %c0_i32_24, %c14_i32 : i32
      %c1_i32_25 = arith.constant 1 : i32
      scf.for %arg8 = %c0_i32_24 to %36 step %c1_i32_25  : i32 {
        %c56_i32 = arith.constant 56 : i32
        %37 = arith.muli %arg7, %c56_i32 : i32
        %c4_i32 = arith.constant 4 : i32
        %38 = arith.muli %arg8, %c4_i32 : i32
        %39 = arith.addi %37, %38 : i32
        %40 = tpu.assume_multiple %39, 4 : i32
        %41 = arith.index_cast %40 : i32 to index
        %c0_27 = arith.constant 0 : index
        %c0_28 = arith.constant 0 : index
        %42 = vector.load %arg6[%41, %c0_27, %c0_28] : memref<112x32x72xbf16, #tpu.memory_space<vmem>>, vector<4x32x72xbf16>
        %43 = arith.extf %42 : vector<4x32x72xbf16> to vector<4x32x72xf32>
        %44 = vector.shape_cast %32 : vector<32x72xf32> to vector<1x32x72xf32>
        %45 = vector.broadcast %44 : vector<1x32x72xf32> to vector<4x32x72xf32>
        %46 = arith.mulf %43, %45 : vector<4x32x72xf32>
        %47 = vector.shape_cast %34 : vector<32x72xf32> to vector<1x32x72xf32>
        %48 = vector.broadcast %47 : vector<1x32x72xf32> to vector<4x32x72xf32>
        %49 = arith.addf %46, %48 : vector<4x32x72xf32>
        %cst_29 = arith.constant 0.000000e+00 : f32
        %50 = vector.broadcast %cst_29 : f32 to vector<4x32x72xf32>
        %51 = arith.maximumf %49, %50 : vector<4x32x72xf32>
        %cst_30 = arith.constant dense<0xFF800000> : vector<32x72xf32>
        %52 = vector.multi_reduction <maximumf>, %51, %cst_30 [0] : vector<4x32x72xf32> to vector<32x72xf32>
        %53 = arith.truncf %52 : vector<32x72xf32> to vector<32x72xbf16>
        %c0_31 = arith.constant 0 : index
        %c0_32 = arith.constant 0 : index
        %c0_33 = arith.constant 0 : index
        %54 = vector.load %arg4[%c0_31, %c0_32, %c0_33] : memref<4x72x18xbf16, #tpu.memory_space<vmem>>, vector<1x72x18xbf16>
        %55 = vector.shape_cast %54 : vector<1x72x18xbf16> to vector<72x18xbf16>
        %cst_34 = arith.constant dense<0.000000e+00> : vector<32x18xf32>
        %56 = tpu.matmul %53, %55, %cst_34 {dimension_numbers = #tpu.dot_dimension_numbers<[1], [0], [0], [1], [0, 0, 1, 1], [], []>} : vector<32x72xbf16>, vector<72x18xbf16>, vector<32x18xf32> -> vector<32x18xf32>
        %c1_35 = arith.constant 1 : index
        %c0_36 = arith.constant 0 : index
        %c0_37 = arith.constant 0 : index
        %57 = vector.load %arg4[%c1_35, %c0_36, %c0_37] : memref<4x72x18xbf16, #tpu.memory_space<vmem>>, vector<1x72x18xbf16>
        %58 = vector.shape_cast %57 : vector<1x72x18xbf16> to vector<72x18xbf16>
        %cst_38 = arith.constant dense<0.000000e+00> : vector<32x18xf32>
        %59 = tpu.matmul %53, %58, %cst_38 {dimension_numbers = #tpu.dot_dimension_numbers<[1], [0], [0], [1], [0, 0, 1, 1], [], []>} : vector<32x72xbf16>, vector<72x18xbf16>, vector<32x18xf32> -> vector<32x18xf32>
        %60 = arith.maximumf %56, %59 : vector<32x18xf32>
        %c2_39 = arith.constant 2 : index
        %c0_40 = arith.constant 0 : index
        %c0_41 = arith.constant 0 : index
        %61 = vector.load %arg4[%c2_39, %c0_40, %c0_41] : memref<4x72x18xbf16, #tpu.memory_space<vmem>>, vector<1x72x18xbf16>
        %62 = vector.shape_cast %61 : vector<1x72x18xbf16> to vector<72x18xbf16>
        %cst_42 = arith.constant dense<0.000000e+00> : vector<32x18xf32>
        %63 = tpu.matmul %53, %62, %cst_42 {dimension_numbers = #tpu.dot_dimension_numbers<[1], [0], [0], [1], [0, 0, 1, 1], [], []>} : vector<32x72xbf16>, vector<72x18xbf16>, vector<32x18xf32> -> vector<32x18xf32>
        %64 = arith.maximumf %60, %63 : vector<32x18xf32>
        %c3_43 = arith.constant 3 : index
        %c0_44 = arith.constant 0 : index
        %c0_45 = arith.constant 0 : index
        %65 = vector.load %arg4[%c3_43, %c0_44, %c0_45] : memref<4x72x18xbf16, #tpu.memory_space<vmem>>, vector<1x72x18xbf16>
        %66 = vector.shape_cast %65 : vector<1x72x18xbf16> to vector<72x18xbf16>
        %cst_46 = arith.constant dense<0.000000e+00> : vector<32x18xf32>
        %67 = tpu.matmul %53, %66, %cst_46 {dimension_numbers = #tpu.dot_dimension_numbers<[1], [0], [0], [1], [0, 0, 1, 1], [], []>} : vector<32x72xbf16>, vector<72x18xbf16>, vector<32x18xf32> -> vector<32x18xf32>
        %68 = arith.maximumf %64, %67 : vector<32x18xf32>
        %c14_i32_47 = arith.constant 14 : i32
        %69 = arith.muli %arg7, %c14_i32_47 : i32
        %70 = arith.addi %69, %arg8 : i32
        %c32_i32 = arith.constant 32 : i32
        %71 = arith.muli %70, %c32_i32 : i32
        %72 = tpu.assume_multiple %71, 32 : i32
        %73 = arith.truncf %68 : vector<32x18xf32> to vector<32x18xbf16>
        %74 = arith.index_cast %72 : i32 to index
        %c0_48 = arith.constant 0 : index
        %75 = vector.load %arg5[%74, %c0_48] : memref<896x18xbf16, #tpu.memory_space<vmem>>, vector<32x18xbf16>
        tpu.vector_store %arg5[%74, %c0_48], %73 {strides = array<i32>} : memref<896x18xbf16, #tpu.memory_space<vmem>>, vector<32x18xbf16>,
      }
      %c14_i32_26 = arith.constant 14 : i32
    }
    %c2_i32_23 = arith.constant 2 : i32
    return
  }
}

module attributes {stable_mosaic.version = 11 : i64} {
  func.func @kernel(%arg0: memref<1152x22xbf16, #tpu.memory_space<vmem>>, %arg1: memref<5x64x160xbf16, #tpu.memory_space<vmem>>, %arg2: memref<64x1xf32, #tpu.memory_space<vmem>>, %arg3: memref<64x1xf32, #tpu.memory_space<vmem>>, %arg4: memref<2x18x9xbf16, #tpu.memory_space<vmem>>, %arg5: memref<896x9xbf16, #tpu.memory_space<vmem>>, %arg6: memref<28x64x18xbf16, #tpu.memory_space<vmem>>) attributes {dimension_semantics = [], scalar_prefetch = 0 : i64, scratch_operands = 1 : i64, tpu.core_type = #tpu.core_type<tc>} {
    %cst = arith.constant 0.000000e+00 : f32
    %0 = vector.broadcast %cst : f32 to vector<64x18xf32>
    %c0_i32 = arith.constant 0 : i32
    %c2_i32 = arith.constant 2 : i32
    %1 = arith.addi %c0_i32, %c2_i32 : i32
    %c1_i32 = arith.constant 1 : i32
    %2:2 = scf.for %arg7 = %c0_i32 to %1 step %c1_i32 iter_args(%arg8 = %0, %arg9 = %0) -> (vector<64x18xf32>, vector<64x18xf32>)  : i32 {
      %c18_i32 = arith.constant 18 : i32
      %26 = arith.muli %arg7, %c18_i32 : i32
      %c32_i32 = arith.constant 32 : i32
      %27 = arith.muli %26, %c32_i32 : i32
      %c0_i32_13 = arith.constant 0 : i32
      %c14_i32 = arith.constant 14 : i32
      %28 = arith.addi %c0_i32_13, %c14_i32 : i32
      %c1_i32_14 = arith.constant 1 : i32
      %29:2 = scf.for %arg10 = %c0_i32_13 to %28 step %c1_i32_14 iter_args(%arg11 = %arg8, %arg12 = %arg9) -> (vector<64x18xf32>, vector<64x18xf32>)  : i32 {
        %c32_i32_16 = arith.constant 32 : i32
        %30 = arith.muli %arg10, %c32_i32_16 : i32
        %31 = arith.addi %27, %30 : i32
        %32 = tpu.assume_multiple %31, 32 : i32
        %33 = arith.index_cast %32 : i32 to index
        %c0_17 = arith.constant 0 : index
        %34 = vector.load %arg0[%33, %c0_17] : memref<1152x22xbf16, #tpu.memory_space<vmem>>, vector<160x22xbf16>
        %cst_18 = arith.constant 0.000000e+00 : f32
        %35 = vector.broadcast %cst_18 : f32 to vector<64x18xf32>
        %c0_19 = arith.constant 0 : index
        %c0_20 = arith.constant 0 : index
        %c0_21 = arith.constant 0 : index
        %36 = vector.load %arg1[%c0_19, %c0_20, %c0_21] : memref<5x64x160xbf16, #tpu.memory_space<vmem>>, vector<1x64x160xbf16>
        %37 = vector.shape_cast %36 : vector<1x64x160xbf16> to vector<64x160xbf16>
        %38 = vector.extract_strided_slice %34 {offsets = [0, 0], sizes = [160, 18], strides = [1, 1]} : vector<160x22xbf16> to vector<160x18xbf16>
        %cst_22 = arith.constant dense<0.000000e+00> : vector<64x18xf32>
        %39 = tpu.matmul %37, %38, %cst_22 {dimension_numbers = #tpu.dot_dimension_numbers<[1], [0], [0], [1], [0, 0, 1, 1], [], []>} : vector<64x160xbf16>, vector<160x18xbf16>, vector<64x18xf32> -> vector<64x18xf32>
        %40 = arith.addf %35, %39 : vector<64x18xf32>
        %c1 = arith.constant 1 : index
        %c0_23 = arith.constant 0 : index
        %c0_24 = arith.constant 0 : index
        %41 = vector.load %arg1[%c1, %c0_23, %c0_24] : memref<5x64x160xbf16, #tpu.memory_space<vmem>>, vector<1x64x160xbf16>
        %42 = vector.shape_cast %41 : vector<1x64x160xbf16> to vector<64x160xbf16>
        %43 = vector.extract_strided_slice %34 {offsets = [0, 1], sizes = [160, 18], strides = [1, 1]} : vector<160x22xbf16> to vector<160x18xbf16>
        %cst_25 = arith.constant dense<0.000000e+00> : vector<64x18xf32>
        %44 = tpu.matmul %42, %43, %cst_25 {dimension_numbers = #tpu.dot_dimension_numbers<[1], [0], [0], [1], [0, 0, 1, 1], [], []>} : vector<64x160xbf16>, vector<160x18xbf16>, vector<64x18xf32> -> vector<64x18xf32>
        %45 = arith.addf %40, %44 : vector<64x18xf32>
        %c2 = arith.constant 2 : index
        %c0_26 = arith.constant 0 : index
        %c0_27 = arith.constant 0 : index
        %46 = vector.load %arg1[%c2, %c0_26, %c0_27] : memref<5x64x160xbf16, #tpu.memory_space<vmem>>, vector<1x64x160xbf16>
        %47 = vector.shape_cast %46 : vector<1x64x160xbf16> to vector<64x160xbf16>
        %48 = vector.extract_strided_slice %34 {offsets = [0, 2], sizes = [160, 18], strides = [1, 1]} : vector<160x22xbf16> to vector<160x18xbf16>
        %cst_28 = arith.constant dense<0.000000e+00> : vector<64x18xf32>
        %49 = tpu.matmul %47, %48, %cst_28 {dimension_numbers = #tpu.dot_dimension_numbers<[1], [0], [0], [1], [0, 0, 1, 1], [], []>} : vector<64x160xbf16>, vector<160x18xbf16>, vector<64x18xf32> -> vector<64x18xf32>
        %50 = arith.addf %45, %49 : vector<64x18xf32>
        %c3 = arith.constant 3 : index
        %c0_29 = arith.constant 0 : index
        %c0_30 = arith.constant 0 : index
        %51 = vector.load %arg1[%c3, %c0_29, %c0_30] : memref<5x64x160xbf16, #tpu.memory_space<vmem>>, vector<1x64x160xbf16>
        %52 = vector.shape_cast %51 : vector<1x64x160xbf16> to vector<64x160xbf16>
        %53 = vector.extract_strided_slice %34 {offsets = [0, 3], sizes = [160, 18], strides = [1, 1]} : vector<160x22xbf16> to vector<160x18xbf16>
        %cst_31 = arith.constant dense<0.000000e+00> : vector<64x18xf32>
        %54 = tpu.matmul %52, %53, %cst_31 {dimension_numbers = #tpu.dot_dimension_numbers<[1], [0], [0], [1], [0, 0, 1, 1], [], []>} : vector<64x160xbf16>, vector<160x18xbf16>, vector<64x18xf32> -> vector<64x18xf32>
        %55 = arith.addf %50, %54 : vector<64x18xf32>
        %c4 = arith.constant 4 : index
        %c0_32 = arith.constant 0 : index
        %c0_33 = arith.constant 0 : index
        %56 = vector.load %arg1[%c4, %c0_32, %c0_33] : memref<5x64x160xbf16, #tpu.memory_space<vmem>>, vector<1x64x160xbf16>
        %57 = vector.shape_cast %56 : vector<1x64x160xbf16> to vector<64x160xbf16>
        %58 = vector.extract_strided_slice %34 {offsets = [0, 4], sizes = [160, 18], strides = [1, 1]} : vector<160x22xbf16> to vector<160x18xbf16>
        %cst_34 = arith.constant dense<0.000000e+00> : vector<64x18xf32>
        %59 = tpu.matmul %57, %58, %cst_34 {dimension_numbers = #tpu.dot_dimension_numbers<[1], [0], [0], [1], [0, 0, 1, 1], [], []>} : vector<64x160xbf16>, vector<160x18xbf16>, vector<64x18xf32> -> vector<64x18xf32>
        %60 = arith.addf %55, %59 : vector<64x18xf32>
        %61 = arith.truncf %60 : vector<64x18xf32> to vector<64x18xbf16>
        %c14_i32_35 = arith.constant 14 : i32
        %62 = arith.muli %arg7, %c14_i32_35 : i32
        %63 = arith.addi %62, %arg10 : i32
        %64 = arith.index_cast %63 : i32 to index
        %c0_36 = arith.constant 0 : index
        %c0_37 = arith.constant 0 : index
        %65 = vector.load %arg6[%64, %c0_36, %c0_37] : memref<28x64x18xbf16, #tpu.memory_space<vmem>>, vector<1x64x18xbf16>
        %66 = vector.shape_cast %65 : vector<1x64x18xbf16> to vector<64x18xbf16>
        %67 = vector.shape_cast %61 : vector<64x18xbf16> to vector<1x64x18xbf16>
        tpu.vector_store %arg6[%64, %c0_36, %c0_37], %67 {strides = array<i32>} : memref<28x64x18xbf16, #tpu.memory_space<vmem>>, vector<1x64x18xbf16>,
        %68 = arith.addf %arg11, %60 : vector<64x18xf32>
        %69 = arith.mulf %60, %60 : vector<64x18xf32>
        %70 = arith.addf %arg12, %69 : vector<64x18xf32>
        scf.yield %68, %70 : vector<64x18xf32>, vector<64x18xf32>
      }
      %c14_i32_15 = arith.constant 14 : i32
      scf.yield %29#0, %29#1 : vector<64x18xf32>, vector<64x18xf32>
    }
    %c2_i32_0 = arith.constant 2 : i32
    %cst_1 = arith.constant dense<0.000000e+00> : vector<64xf32>
    %3 = vector.multi_reduction <add>, %2#0, %cst_1 [1] : vector<64x18xf32> to vector<64xf32>
    %4 = vector.shape_cast %3 : vector<64xf32> to vector<64x1xf32>
    %cst_2 = arith.constant 0.0019841271 : f32
    %5 = vector.broadcast %cst_2 : f32 to vector<64x1xf32>
    %6 = arith.mulf %4, %5 : vector<64x1xf32>
    %cst_3 = arith.constant dense<0.000000e+00> : vector<64xf32>
    %7 = vector.multi_reduction <add>, %2#1, %cst_3 [1] : vector<64x18xf32> to vector<64xf32>
    %8 = vector.shape_cast %7 : vector<64xf32> to vector<64x1xf32>
    %cst_4 = arith.constant 0.0019841271 : f32
    %9 = vector.broadcast %cst_4 : f32 to vector<64x1xf32>
    %10 = arith.mulf %8, %9 : vector<64x1xf32>
    %11 = arith.mulf %6, %6 : vector<64x1xf32>
    %12 = arith.subf %10, %11 : vector<64x1xf32>
    %c0 = arith.constant 0 : index
    %c0_5 = arith.constant 0 : index
    %13 = vector.load %arg2[%c0, %c0_5] : memref<64x1xf32, #tpu.memory_space<vmem>>, vector<64x1xf32>
    %cst_6 = arith.constant 9.99999974E-6 : f32
    %14 = vector.broadcast %cst_6 : f32 to vector<64x1xf32>
    %15 = arith.addf %12, %14 : vector<64x1xf32>
    %16 = math.rsqrt %15 : vector<64x1xf32>
    %17 = arith.mulf %13, %16 : vector<64x1xf32>
    %c0_7 = arith.constant 0 : index
    %c0_8 = arith.constant 0 : index
    %18 = vector.load %arg3[%c0_7, %c0_8] : memref<64x1xf32, #tpu.memory_space<vmem>>, vector<64x1xf32>
    %19 = arith.mulf %6, %17 : vector<64x1xf32>
    %20 = arith.subf %18, %19 : vector<64x1xf32>
    %21 = vector.shape_cast %17 : vector<64x1xf32> to vector<64x1xf32>
    %22 = vector.broadcast %21 : vector<64x1xf32> to vector<64x18xf32>
    %23 = vector.shape_cast %20 : vector<64x1xf32> to vector<64x1xf32>
    %24 = vector.broadcast %23 : vector<64x1xf32> to vector<64x18xf32>
    %c0_i32_9 = arith.constant 0 : i32
    %c2_i32_10 = arith.constant 2 : i32
    %25 = arith.addi %c0_i32_9, %c2_i32_10 : i32
    %c1_i32_11 = arith.constant 1 : i32
    scf.for %arg7 = %c0_i32_9 to %25 step %c1_i32_11  : i32 {
      %c0_i32_13 = arith.constant 0 : i32
      %c7_i32 = arith.constant 7 : i32
      %26 = arith.addi %c0_i32_13, %c7_i32 : i32
      %c1_i32_14 = arith.constant 1 : i32
      scf.for %arg8 = %c0_i32_13 to %26 step %c1_i32_14  : i32 {
        %c14_i32 = arith.constant 14 : i32
        %27 = arith.muli %arg7, %c14_i32 : i32
        %c2_i32_16 = arith.constant 2 : i32
        %28 = arith.muli %arg8, %c2_i32_16 : i32
        %29 = arith.addi %27, %28 : i32
        %30 = tpu.assume_multiple %29, 2 : i32
        %31 = arith.index_cast %30 : i32 to index
        %c0_17 = arith.constant 0 : index
        %c0_18 = arith.constant 0 : index
        %32 = vector.load %arg6[%31, %c0_17, %c0_18] : memref<28x64x18xbf16, #tpu.memory_space<vmem>>, vector<2x64x18xbf16>
        %33 = arith.extf %32 : vector<2x64x18xbf16> to vector<2x64x18xf32>
        %34 = vector.shape_cast %22 : vector<64x18xf32> to vector<1x64x18xf32>
        %35 = vector.broadcast %34 : vector<1x64x18xf32> to vector<2x64x18xf32>
        %36 = arith.mulf %33, %35 : vector<2x64x18xf32>
        %37 = vector.shape_cast %24 : vector<64x18xf32> to vector<1x64x18xf32>
        %38 = vector.broadcast %37 : vector<1x64x18xf32> to vector<2x64x18xf32>
        %39 = arith.addf %36, %38 : vector<2x64x18xf32>
        %cst_19 = arith.constant 0.000000e+00 : f32
        %40 = vector.broadcast %cst_19 : f32 to vector<2x64x18xf32>
        %41 = arith.maximumf %39, %40 : vector<2x64x18xf32>
        %cst_20 = arith.constant dense<0xFF800000> : vector<64x18xf32>
        %42 = vector.multi_reduction <maximumf>, %41, %cst_20 [0] : vector<2x64x18xf32> to vector<64x18xf32>
        %43 = arith.truncf %42 : vector<64x18xf32> to vector<64x18xbf16>
        %c0_21 = arith.constant 0 : index
        %c0_22 = arith.constant 0 : index
        %c0_23 = arith.constant 0 : index
        %44 = vector.load %arg4[%c0_21, %c0_22, %c0_23] : memref<2x18x9xbf16, #tpu.memory_space<vmem>>, vector<1x18x9xbf16>
        %45 = vector.shape_cast %44 : vector<1x18x9xbf16> to vector<18x9xbf16>
        %cst_24 = arith.constant dense<0.000000e+00> : vector<64x9xf32>
        %46 = tpu.matmul %43, %45, %cst_24 {dimension_numbers = #tpu.dot_dimension_numbers<[1], [0], [0], [1], [0, 0, 1, 1], [], []>} : vector<64x18xbf16>, vector<18x9xbf16>, vector<64x9xf32> -> vector<64x9xf32>
        %c1 = arith.constant 1 : index
        %c0_25 = arith.constant 0 : index
        %c0_26 = arith.constant 0 : index
        %47 = vector.load %arg4[%c1, %c0_25, %c0_26] : memref<2x18x9xbf16, #tpu.memory_space<vmem>>, vector<1x18x9xbf16>
        %48 = vector.shape_cast %47 : vector<1x18x9xbf16> to vector<18x9xbf16>
        %cst_27 = arith.constant dense<0.000000e+00> : vector<64x9xf32>
        %49 = tpu.matmul %43, %48, %cst_27 {dimension_numbers = #tpu.dot_dimension_numbers<[1], [0], [0], [1], [0, 0, 1, 1], [], []>} : vector<64x18xbf16>, vector<18x9xbf16>, vector<64x9xf32> -> vector<64x9xf32>
        %50 = arith.maximumf %46, %49 : vector<64x9xf32>
        %c7_i32_28 = arith.constant 7 : i32
        %51 = arith.muli %arg7, %c7_i32_28 : i32
        %52 = arith.addi %51, %arg8 : i32
        %c64_i32 = arith.constant 64 : i32
        %53 = arith.muli %52, %c64_i32 : i32
        %54 = tpu.assume_multiple %53, 64 : i32
        %55 = arith.truncf %50 : vector<64x9xf32> to vector<64x9xbf16>
        %56 = arith.index_cast %54 : i32 to index
        %c0_29 = arith.constant 0 : index
        %57 = vector.load %arg5[%56, %c0_29] : memref<896x9xbf16, #tpu.memory_space<vmem>>, vector<64x9xbf16>
        tpu.vector_store %arg5[%56, %c0_29], %55 {strides = array<i32>} : memref<896x9xbf16, #tpu.memory_space<vmem>>, vector<64x9xbf16>,
      }
      %c7_i32_15 = arith.constant 7 : i32
    }
    %c2_i32_12 = arith.constant 2 : i32
    return
  }
}

module attributes {stable_mosaic.version = 11 : i64} {
  func.func @_mlp_kernel(%arg0: memref<2x4032xbf16, #tpu.memory_space<vmem>>, %arg1: memref<4032x100xbf16, #tpu.memory_space<vmem>>, %arg2: memref<1x100xf32, #tpu.memory_space<vmem>>, %arg3: memref<100x100xbf16, #tpu.memory_space<vmem>>, %arg4: memref<1x100xf32, #tpu.memory_space<vmem>>, %arg5: memref<100x6xbf16, #tpu.memory_space<vmem>>, %arg6: memref<1x6xf32, #tpu.memory_space<vmem>>, %arg7: memref<2x6xf32, #tpu.memory_space<vmem>>) attributes {dimension_semantics = [], scalar_prefetch = 0 : i64, scratch_operands = 0 : i64, tpu.core_type = #tpu.core_type<tc>} {
    %c0 = arith.constant 0 : index
    %c0_0 = arith.constant 0 : index
    %0 = vector.load %arg0[%c0, %c0_0] : memref<2x4032xbf16, #tpu.memory_space<vmem>>, vector<2x4032xbf16>
    %c0_1 = arith.constant 0 : index
    %c0_2 = arith.constant 0 : index
    %1 = vector.load %arg1[%c0_1, %c0_2] : memref<4032x100xbf16, #tpu.memory_space<vmem>>, vector<4032x100xbf16>
    %cst = arith.constant dense<0.000000e+00> : vector<2x100xf32>
    %2 = tpu.matmul %0, %1, %cst {dimension_numbers = #tpu.dot_dimension_numbers<[1], [0], [0], [1], [0, 0, 1, 1], [], []>} : vector<2x4032xbf16>, vector<4032x100xbf16>, vector<2x100xf32> -> vector<2x100xf32>
    %c0_3 = arith.constant 0 : index
    %c0_4 = arith.constant 0 : index
    %3 = vector.load %arg2[%c0_3, %c0_4] : memref<1x100xf32, #tpu.memory_space<vmem>>, vector<1x100xf32>
    %4 = vector.broadcast %3 : vector<1x100xf32> to vector<2x100xf32>
    %5 = arith.addf %2, %4 : vector<2x100xf32>
    %6 = arith.truncf %5 : vector<2x100xf32> to vector<2x100xbf16>
    %c0_5 = arith.constant 0 : index
    %c0_6 = arith.constant 0 : index
    %7 = vector.load %arg3[%c0_5, %c0_6] : memref<100x100xbf16, #tpu.memory_space<vmem>>, vector<100x100xbf16>
    %cst_7 = arith.constant dense<0.000000e+00> : vector<2x100xf32>
    %8 = tpu.matmul %6, %7, %cst_7 {dimension_numbers = #tpu.dot_dimension_numbers<[1], [0], [0], [1], [0, 0, 1, 1], [], []>} : vector<2x100xbf16>, vector<100x100xbf16>, vector<2x100xf32> -> vector<2x100xf32>
    %c0_8 = arith.constant 0 : index
    %c0_9 = arith.constant 0 : index
    %9 = vector.load %arg4[%c0_8, %c0_9] : memref<1x100xf32, #tpu.memory_space<vmem>>, vector<1x100xf32>
    %10 = vector.broadcast %9 : vector<1x100xf32> to vector<2x100xf32>
    %11 = arith.addf %8, %10 : vector<2x100xf32>
    %12 = arith.truncf %11 : vector<2x100xf32> to vector<2x100xbf16>
    %c0_10 = arith.constant 0 : index
    %c0_11 = arith.constant 0 : index
    %13 = vector.load %arg5[%c0_10, %c0_11] : memref<100x6xbf16, #tpu.memory_space<vmem>>, vector<100x6xbf16>
    %cst_12 = arith.constant dense<0.000000e+00> : vector<2x6xf32>
    %14 = tpu.matmul %12, %13, %cst_12 {dimension_numbers = #tpu.dot_dimension_numbers<[1], [0], [0], [1], [0, 0, 1, 1], [], []>} : vector<2x100xbf16>, vector<100x6xbf16>, vector<2x6xf32> -> vector<2x6xf32>
    %c0_13 = arith.constant 0 : index
    %c0_14 = arith.constant 0 : index
    %15 = vector.load %arg6[%c0_13, %c0_14] : memref<1x6xf32, #tpu.memory_space<vmem>>, vector<1x6xf32>
    %16 = vector.broadcast %15 : vector<1x6xf32> to vector<2x6xf32>
    %17 = arith.addf %14, %16 : vector<2x6xf32>
    %c0_15 = arith.constant 0 : index
    %c0_16 = arith.constant 0 : index
    %18 = vector.load %arg7[%c0_15, %c0_16] : memref<2x6xf32, #tpu.memory_space<vmem>>, vector<2x6xf32>
    tpu.vector_store %arg7[%c0_15, %c0_16], %17 {strides = array<i32>} : memref<2x6xf32, #tpu.memory_space<vmem>>, vector<2x6xf32>,
    return
  }
}

</mosaic_0001>

<bundles_post_ra>
// kernel: cnn_bn_vo_forward.4
= control target key start
LH: loop header
LB: loop body
LE: loop exit
PB: predicated region body
PF: predicated region fallthrough
CT: control target
= control target key end

     0   :  { %v2457_v2 = vmov 0.0   ;;  %v2459_v3 = vmov 0.0   ;;  %v2461_v4 = vmov 0.0   ;;  %v2463_v5 = vmov 0.0   ;;  %s3045_s0 = inlined_call_operand.vmem [shape: bf16[3648,288], index: 0, kind: input, shape index: {}]   ;;  %s3046_s1 = inlined_call_operand.vmem [shape: bf16[1,16,40], index: 1, kind: input, shape index: {}]   ;;  %s3047_s2 = inlined_call_operand.vmem [shape: f32[16,1], index: 2, kind: input, shape index: {}]   ;;  %s3048_s3 = inlined_call_operand.vmem [shape: f32[16,1], index: 3, kind: input, shape index: {}]   ;;  %s3049_s4 = inlined_call_operand.vmem [shape: bf16[4,288,72], index: 4, kind: input, shape index: {}]   ;;  %s3050_s5 = inlined_call_operand.vmem [shape: bf16[1792,72], index: 5, kind: output, shape index: {}]  }
   0x1   :  { %v2450_v0 = vld [vmem:[%s3046_s1] sm:$0xf]  ;;  %v2455_v1 = vld [vmem:[%s3046_s1 + $0x4] sm:$0xf]  ;;  %v2465_v6 = vmov 0.0   ;;  %v2467_v7 = vmov 0.0  }
   0x2   :  { %v2469_v8 = vmov 0.0   ;;  %v2471_v9 = vmov 0.0   ;;  %v2473_v10 = vmov 0.0   ;;  %v2475_v11 = vmov 0.0   ;;  %s2481_s1 = smov 0  }
   0x3   :  { %v2477_v12 = vmov 0.0   ;;  %v2479_v13 = vmov 0.0  }
   0x4 LB: > { %s41_s22 = smul.u32 1824, %s2349_s1  ;;  %s2523_s23 = smov 0   ;;  %s2349_s1 = sphi %s2481_s1, %s28_s1   ;;  %v2345_v13 = vphi %v2479_v13, %v3077_v13   ;;  %v2341_v12 = vphi %v2477_v12, %v3076_v12   ;;  %v2337_v11 = vphi %v2475_v11, %v3075_v11   ;;  %v2333_v10 = vphi %v2473_v10, %v3074_v10   ;;  %v2329_v9 = vphi %v2471_v9, %v3073_v9   ;;  %v2325_v8 = vphi %v2469_v8, %v3072_v8   ;;  %v2321_v7 = vphi %v2467_v7, %v3071_v7   ;;  %v2317_v6 = vphi %v2465_v6, %v3070_v6   ;;  %v2313_v5 = vphi %v2463_v5, %v3069_v5   ;;  %v2309_v4 = vphi %v2461_v4, %v3068_v4   ;;  %v2305_v3 = vphi %v2459_v3, %v3067_v3   ;;  %v2301_v2 = vphi %v2457_v2, %v3066_v2  }
   0x5 LB: >> { %v2411_v14 = vmov 0.0   ;;  %vm2412_vm0 = vmmov 0   ;;  %s1511_s24 = sshll.u32 %s2401_s23, 3  ;;  %v2413_v15 = vmov 0   ;;  %vm126_vm1 = vcmask 1043456   ;;  %s223_s6 = smul.u32 224, %s2349_s1  ;;  %s2401_s23 = sphi %s2523_s23, %s47_s23   ;;  %v2397_v13 = vphi %v2345_v13, %v3064_v13   ;;  %v2393_v12 = vphi %v2341_v12, %v3063_v12   ;;  %v2389_v11 = vphi %v2337_v11, %v3062_v11   ;;  %v2385_v10 = vphi %v2333_v10, %v3061_v10   ;;  %v2381_v9 = vphi %v2329_v9, %v3060_v9   ;;  %v2377_v8 = vphi %v2325_v8, %v3059_v8   ;;  %v2373_v7 = vphi %v2321_v7, %v3058_v7   ;;  %v2369_v6 = vphi %v2317_v6, %v3057_v6   ;;  %v2365_v5 = vphi %v2313_v5, %v3056_v5   ;;  %v2361_v4 = vphi %v2309_v4, %v3055_v4   ;;  %v2357_v3 = vphi %v2305_v3, %v3054_v3   ;;  %v2353_v2 = vphi %v2301_v2, %v3053_v2  }
   0x6   : >> { %1826 = vmatprep.subr.bf16.mxu1 %v2411_v14  ;;  %1832 = vmatprep.mubr.msk.bf16.mxu1 %vm2412_vm0, %v2411_v14  ;;  %s61_s25 = sadd.s32 %s1511_s24, %s41_s22  ;;  %v1513_v28 = vcombine.low %v2450_v0, %v2455_v1  ;;  %vm122_vm2 = vcmask 326656   ;;  %vm230_vm3 = vcmask 261120  }
   0x7   : >> { %168 = vmatprep.mubr.bf16.mxu0 %v2413_v15  ;;  %s62_s26 = sshra.s32 %s61_s25, 3  ;;  %s224_s7 = sadd.s32 %s2401_s23, %s223_s6 }
   0x8   : >> { %s1717_s27 = smul.u32 12, %s62_s26  ;;  %s47_s23 = sadd.s32 1, %s2401_s23  }
   0x9   : >> { %s1718_s8 = smul.u32 24, %s224_s7  ;;  %p2578_p0 = scmp.ge.s32.totalorder %s47_s23, 224  }
   0xa   : >> { %s66_s30 = scalar_lea.vmem %s3045_s0, %s1717_s27  ;;  %s28_s1 = sadd.s32 (%p2578_p0), 1, %s2349_s1  }
   0xb   : >> { %v2098_v16 = vld [vmem:[%s66_s30 + $0x4] ss:$12 sps:$4 sm:$0xff]   ;;  %v2100_v17 = vld [vmem:[%s66_s30 + $0x8] ss:$12 sps:$4 sm:$0xff]   ;;  %v2101_v18 = vld [vmem:[%s66_s30] ss:$12 sps:$4 sm:$0xff]  }
   0xc   : >> { %136 = vmatprep.subr.bf16.mxu0 %v2098_v16  ;;  %1827 = vmatpush3.bf16.msra.mxu1 %v2100_v17  ;;  %v2102_v19 = vld [vmem:[%s66_s30 + $0x1c] ss:$12 sps:$4 sm:$0xff]   ;;  %v2104_v20 = vld [vmem:[%s66_s30 + $0x20] ss:$12 sps:$4 sm:$0xff]   ;;  %v2105_v21 = vld [vmem:[%s66_s30 + $0x18] ss:$12 sps:$4 sm:$0xff]  }
   0xd   : >> { %137 = vmatpush1.bf16.msra.mxu0 %v2101_v18  ;;  %1828 = vmatprep.subr.bf16.mxu1 %v2411_v14  ;;  %v75_v22 = vld [vmem:[%s66_s30 + $0x30] sm:$0xff]  ;;  %v2107_v24 = vld [vmem:[%s66_s30 + $0x38] ss:$0 sps:$4 sm:$0xff]   ;;  %s227_s9 = scalar_lea.vmem [#allocation2], %s1718_s8  ;;  %p2612_p1 = scmp.ge.s32.totalorder (%p2578_p0), %s28_s1, 2  }
   0xe   : >> { %138 = vmatprep.subr.bf16.mxu0 %v2102_v19  ;;  %v1521_v23 = vcombine.high %v75_v22, %v75_v22  ;;  %v1520_v25 = vcombine.low %v75_v22, %v75_v22  ;;  %v134_v26 = vsel %vm126_vm1, %v2107_v24, 0 }
  0x10   : >> { %1829 = vmatpush3.bf16.msra.mxu1 %v2104_v20  ;;  %v128_v27 = vsel %vm126_vm1, %v1520_v25, 0 }
  0x11   : >> { %139 = vmatpush1.bf16.msra.mxu0 %v2105_v21  ;;  %1830 = vmatprep.subr.bf16.mxu1 %v2411_v14 }
  0x12   : >> { %1523 = vmatprep.subr.msk.bf16.mxu0 %vm126_vm1, %v1521_v23 }
  0x14   : >> { %1831 = vmatpush3.bf16.msra.mxu1 %v134_v26 }
  0x15   : >> { %141 = vmatpush1.bf16.msra.mxu0 %v128_v27 }
  0x17   : >> { %1833 = vmatmul.mubr.msk.bf16.vlgmr.msra.gmra.mrb[0].mxu1 %vm122_vm2, %v1513_v28 }
  0x18   : >> { %1524 = vmatmul.mubr.msk.bf16.vlgmr.msra.gmra.mrb[0].mxu0 %vm122_vm2, %v1513_v28 }
  0xea   : >> { %v213_v29 = vpop.f32.mrb[0].mxu1 }
  0xeb   : >> { %v2566_v11 = vadd.f32 %v2389_v11, %v213_v29   ;;  %v240_v31 = vmul.f32 %v213_v29, %v213_v29  ;;  %v170_v32 = vpop.f32.mrb[0].mxu0  ;;  %v1834_v33 = vpop.f32.mrb[1].mxu1 }
  0xec   : >> { %v232_v34 = vadd.f32 %v2397_v13, %v170_v32   ;;  %v238_v35 = vmul.f32 %v170_v32, %v170_v32  ;;  %v172_v36 = vpop.f32.mrb[1].mxu0  ;;  %v216_v37 = vpop.f32.mrb[2].mxu1 }
  0xed   : >> { %v3051_v30 = vmov %v2566_v11  ;;  %v246_v38 = vadd.f32 %v2365_v5, %v240_v31   ;;  %v233_v39 = vadd.f32 %v2393_v12, %v172_v36   ;;  %v239_v40 = vmul.f32 %v172_v36, %v172_v36  ;;  %v174_v42 = vpop.f32.mrb[2].mxu0  ;;  %v1835_v43 = vpop.f32.mrb[3].mxu1 }
  0xee   : >> { %v222_v41 = vpack.c.bf16 %v216_v37, %v213_v29  ;;  %v244_v44 = vadd.f32 %v2373_v7, %v238_v35   ;;  %v237_v45 = vadd.f32 %v2377_v8, %v216_v37   ;;  %v243_v46 = vmul.f32 %v216_v37, %v216_v37  ;;  %v176_v48 = vpop.f32.mrb[3].mxu0  ;;  %46 = sbr.rel (!%p2578_p0) target bundleno = 5 (0x5), region = 75 }
  0xef   : >> { %v220_v47 = vpack.c.bf16 %v174_v42, %v170_v32  ;;  %v245_v49 = vadd.f32 %v2369_v6, %v239_v40   ;;  %v235_v50 = vadd.f32 %v2385_v10, %v174_v42   ;;  %v241_v51 = vmul.f32 %v174_v42, %v174_v42 }
  0xf0   : >> { %231 = vst.msk [vmem:[%s227_s9 + $0x10] sm:$0xff] %vm230_vm3, %v222_v41  ;;  %v221_v52 = vpack.c.bf16 %v176_v48, %v172_v36  ;;  %v249_v53 = vadd.f32 %v2353_v2, %v243_v46   ;;  %v236_v54 = vadd.f32 %v2381_v9, %v176_v48   ;;  %v242_v55 = vmul.f32 %v176_v48, %v176_v48 }
  0xf1   : >> { %228 = vst [vmem:[%s227_s9] sm:$0xff] %v220_v47  ;;  %v247_v56 = vadd.f32 %v2361_v4, %v241_v51   ;;  %v3056_v5 = vmov %v246_v38  ;;  %v3057_v6 = vmov %v245_v49  ;;  %v3058_v7 = vmov %v244_v44 }
  0xf2   : >> { %229 = vst [vmem:[%s227_s9 + $0x8] sm:$0xff] %v221_v52  ;;  %v248_v57 = vadd.f32 %v2357_v3, %v242_v55   ;;  %v3053_v2 = vmov %v249_v53  ;;  %v3059_v8 = vmov %v237_v45  ;;  %v3060_v9 = vmov %v236_v54 }
  0xf3   : >> { %v3055_v4 = vmov %v247_v56  ;;  %v3061_v10 = vmov %v235_v50  ;;  %v3062_v11 = vmov %v3051_v30  ;;  %v3063_v12 = vmov %v233_v39 }
  0xf4   : >> { %v3054_v3 = vmov %v248_v57  ;;  %v3064_v13 = vmov %v232_v34  ;;  %v3066_v2 = vmov (%p2578_p0), %v249_v53  ;;  %v3068_v4 = vmov (%p2578_p0), %v247_v56 }
  0xf5   : > { %v3067_v3 = vmov %v248_v57  ;;  %v3069_v5 = vmov %v246_v38  ;;  %v3070_v6 = vmov %v245_v49  ;;  %v3071_v7 = vmov %v244_v44  ;;  %27 = sbr.rel (!%p2612_p1) target bundleno = 4 (0x4), region = 86  ;;  %v279_v20 = vld [vmem:[%s3047_s2] sm:$0xff] (%p2612_p1)  ;;  %v280_v24 = vld [vmem:[%s3047_s2 + $0x8] sm:$0xff] (%p2612_p1)  ;;  %s2680_s2 = smov (%p2612_p1), 0  }
  0xf6   : > { %v3072_v8 = vmov %v237_v45  ;;  %v3073_v9 = vmov %v236_v54  ;;  %v3074_v10 = vmov %v235_v50  ;;  %v3075_v11 = vmov %v3051_v30  ;;  %v2658_v23 = vld [vmem:[%s3048_s3] sm:$0xff] (%p2612_p1)  ;;  %v2673_v29 = vld [vmem:[%s3048_s3 + $0x8] sm:$0xff] (%p2612_p1) }
  0xf7   : > { %v3076_v12 = vmov %v233_v39  ;;  %v3077_v13 = vmov %v232_v34  ;;  %v250_v58 = vadd.f32 (%p2612_p1), %v233_v39, %v232_v34  ;;  %v252_v59 = vsel (%p2612_p1), %vm230_vm3, %v3051_v30, 0.0 }
  0xf8   :  { %v263_v60 = vadd.f32 (%p2612_p1), %v245_v49, %v244_v44  ;;  %v264_v61 = vsel (%p2612_p1), %vm230_vm3, %v246_v38, 0.0  ;;  %v256_v62 = vadd.f32 (%p2612_p1), %v236_v54, %v235_v50  ;;  %v257_v63 = vsel (%p2612_p1), %vm230_vm3, %v237_v45, 0.0 }
  0xf9   :  { %v268_v13 = vadd.f32 (%p2612_p1), %v248_v57, %v247_v56  ;;  %v269_v14 = vsel (%p2612_p1), %vm230_vm3, %v249_v53, 0.0  ;;  %v253_v15 = vadd.f32 (%p2612_p1), %v252_v59, %v250_v58 }
  0xfa   :  { %v265_v16 = vadd.f32 (%p2612_p1), %v264_v61, %v263_v60  ;;  %v258_v17 = vadd.f32 (%p2612_p1), %v257_v63, %v256_v62 }
  0xfb   :  { %254 = vadd.xlane.f32.xlu0 (%p2612_p1), %v253_v15  ;;  %v270_v18 = vadd.f32 (%p2612_p1), %v269_v14, %v268_v13 }
  0xfc   :  { %266 = vadd.xlane.f32.xlu1 %v265_v16 }
  0xff   :  { %259 = vadd.xlane.f32.xlu0 %v258_v17 }
 0x100   :  { %271 = vadd.xlane.f32.xlu1 %v270_v18 }
 0x188   :  { %v255_v0 = vpop.xlane.xlu0 %254 }
 0x189   :  { %v267_v1 = vpop.xlane.xlu1 %266  ;;  %v261_v2 = vmul.f32 7.7504965e-06, %v255_v0 }
 0x18a   :  { %v273_v3 = vmul.f32 7.7504965e-06, %v267_v1 }
 0x18b   :  { %v275_v4 = vmul.f32 %v261_v2, %v261_v2 }
 0x18c   :  { %v260_v5 = vpop.xlane.xlu0 %259 }
 0x18d   :  { %v272_v6 = vpop.xlane.xlu1 %271  ;;  %v277_v7 = vsub.f32 %v273_v3, %v275_v4  ;;  %v262_v8 = vmul.f32 7.7504965e-06, %v260_v5 }
 0x18e   :  { %v274_v9 = vmul.f32 7.7504965e-06, %v272_v6 }
 0x18f   :  { %v281_v10 = vadd.f32 1e-05, %v277_v7  ;;  %v276_v11 = vmul.f32 %v262_v8, %v262_v8 }
 0x191   :  { %2109 = vrsqrt.f32 %v281_v10  ;;  %v278_v12 = vsub.f32 %v274_v9, %v276_v11 }
 0x193   :  { %v282_v19 = vadd.f32 1e-05, %v278_v12 }
 0x195   :  { %2111 = vrsqrt.f32 %v282_v19 }
 0x19b   :  { %v2110_v21 = vpop.eup %2109 }
 0x19c   :  { %v2653_v22 = vmul.f32 %v2110_v21, %v279_v20 }
 0x19e   :  { %v2664_v25 = vmul.f32 %v2653_v22, %v261_v2 }
 0x19f   :  { %v2112_v26 = vpop.eup %2111 }
 0x1a0   :  { %v291_v27 = vsub.f32 %v2658_v23, %v2664_v25  ;;  %v2668_v28 = vmul.f32 %v2112_v26, %v280_v24 }
 0x1a2   :  { %v2676_v30 = vmul.f32 %v2668_v28, %v262_v8 }
 0x1a4   :  { %v292_v31 = vsub.f32 %v2673_v29, %v2676_v30 }
 0x1a5 LB: > { %s2685_s19 = smov 0   ;;  %s2405_s2 = sphi %s2680_s2, %s298_s2  }
 0x1a6 LB: >> { %v2115_v32 = vld [vmem:[%s3049_s4 + $0x40] sm:$0xff]   ;;  %v2414_v33 = vmov 0   ;;  %v2117_v35 = vld [vmem:[%s3049_s4 + $0x48] sm:$0xff]   ;;  %v2119_v37 = vld [vmem:[%s3049_s4 + $0x50] sm:$0xff]   ;;  %v2415_v38 = vmov 0.0   ;;  %vm2416_vm4 = vmmov 0   ;;  %s2409_s19 = sphi %s2685_s19, %s304_s19  }
 0x1a7   : >> { %2114 = vset.pattern.permute.xlu1 %v2414_v33  ;;  %2113 = vset.pattern.permute.xlu0 %v2414_v33  ;;  %v2116_v34 = vld [vmem:[%s3049_s4] sm:$0xff]   ;;  %v2118_v36 = vld [vmem:[%s3049_s4 + $0x8] sm:$0xff]   ;;  %v2120_v39 = vld [vmem:[%s3049_s4 + $0x10] sm:$0xff]   ;;  %s305_s29 = smul.u32 224, %s2405_s2  ;;  %s1527_s30 = sshll.u32 %s2409_s19, 2  ;;  %vm1399_vm5 = vcmask 584704  }
 0x1a8   : >> { %383 = vperm.xlu1 %2114, %v291_v27   ;;  %349 = vperm.xlu0 %2113, %v2653_v22   ;;  %v2121_v40 = vld [vmem:[%s3049_s4 + $0x58] sm:$0xff]   ;;  %v2123_v42 = vld [vmem:[%s3049_s4 + $0x60] sm:$0xff]   ;;  %v2125_v45 = vld [vmem:[%s3049_s4 + $0x68] sm:$0xff]  }
 0x1a9   : >> { %1726 = vmatprep.subr.bf16.mxu0 %v2115_v32  ;;  %1836 = vmatprep.subr.bf16.mxu1 %v2415_v38  ;;  %v2122_v41 = vld [vmem:[%s3049_s4 + $0x18] sm:$0xff]   ;;  %v2129_v43 = vld [vmem:[%s3049_s4 + $0x80] sm:$0xff]   ;;  %v2132_v46 = vld [vmem:[%s3049_s4 + $0x88] sm:$0xff]   ;;  %s307_s6 = sadd.s32 %s1527_s30, %s305_s29 }
 0x1aa   : >> { %1727 = vmatpush3.bf16.msra.mxu0 %v2116_v34  ;;  %v2124_v44 = vld [vmem:[%s3049_s4 + $0x20] sm:$0xff]   ;;  %1837 = vmatpush3.bf16.msra.mxu1 %v2129_v43  ;;  %v2126_v47 = vld [vmem:[%s3049_s4 + $0x28] sm:$0xff]   ;;  %v2133_v48 = vld [vmem:[%s3049_s4 + $0xd0] sm:$0xff]   ;;  %s1719_s7 = smul.u32 24, %s307_s6 }
 0x1ab   : >> { %1728 = vmatprep.subr.bf16.mxu0 %v2117_v35  ;;  %1838 = vmatprep.subr.bf16.mxu1 %v2415_v38  ;;  %v2127_v49 = vld [vmem:[%s3049_s4 + $0x70] sm:$0xff]   ;;  %v2130_v51 = vld [vmem:[%s3049_s4 + $0x78] sm:$0xff]  }
 0x1ac   : >> { %388 = vperm.xlu1 %2114, %v292_v31   ;;  %354 = vperm.xlu0 %2113, %v2668_v28   ;;  %v2128_v50 = vld [vmem:[%s3049_s4 + $0x30] sm:$0xff]   ;;  %v2131_v52 = vld [vmem:[%s3049_s4 + $0x38] sm:$0xff]   ;;  %s310_s8 = scalar_lea.vmem [#allocation2], %s1719_s7  ;;  %s1384_s7 = smul.u32 56, %s2405_s2 }
 0x1ad   : >> { %1840 = vmatprep.mubr.msk.bf16.mxu1 %vm2416_vm4, %v2415_v38  ;;  %v312_v53 = vld [vmem:[%s310_s8 + $0x8] sm:$0xff]  ;;  %v315_v54 = vld [vmem:[%s310_s8 + $0x20] sm:$0xff]  ;;  %v318_v55 = vld [vmem:[%s310_s8 + $0x38] sm:$0xff] }
 0x1ae   : >> { %1729 = vmatpush3.bf16.msra.mxu0 %v2118_v36  ;;  %1839 = vmatpush3.bf16.msra.mxu1 %v2132_v46  ;;  %v321_v56 = vld [vmem:[%s310_s8 + $0x50] sm:$0xff]  ;;  %v2762_v57 = vld [vmem:[%s310_s8] sm:$0xff]  ;;  %v2764_v58 = vld [vmem:[%s310_s8 + $0x18] sm:$0xff]  ;;  %v324_v59 = vunpack.c.l.bf16 %v312_v53  ;;  %v327_v60 = vunpack.c.h.bf16 %v312_v53  ;;  %v330_v61 = vunpack.c.l.bf16 %v315_v54  ;;  %v333_v62 = vunpack.c.h.bf16 %v315_v54 }
 0x1af   : >> { %1730 = vmatprep.subr.bf16.mxu0 %v2119_v37  ;;  %1751 = vmatprep.subr.bf16.mxu1 %v2133_v48  ;;  %v317_v63 = vld [vmem:[%s310_s8 + $0x30] sm:$0xff]  ;;  %v2766_v13 = vld [vmem:[%s310_s8 + $0x48] sm:$0xff]  ;;  %v336_v14 = vunpack.c.l.bf16 %v318_v55  ;;  %v339_v15 = vunpack.c.h.bf16 %v318_v55  ;;  %v342_v16 = vunpack.c.l.bf16 %v321_v56  ;;  %v345_v17 = vunpack.c.h.bf16 %v321_v56  ;;  %v2776_v5 = vld [vmem:[%s310_s8 + $0x40] sm:$0xff] }
 0x1b0   : >> { %v2768_v18 = vld [vmem:[%s310_s8 + $0x10] sm:$0xff]  ;;  %v2770_v0 = vld [vmem:[%s310_s8 + $0x28] sm:$0xff]  ;;  %v323_v1 = vunpack.c.l.bf16 %v2762_v57  ;;  %v326_v2 = vunpack.c.h.bf16 %v2762_v57  ;;  %v329_v3 = vunpack.c.l.bf16 %v2764_v58  ;;  %v332_v4 = vunpack.c.h.bf16 %v2764_v58  ;;  %v2778_v6 = vld [vmem:[%s310_s8 + $0x58] sm:$0xff]  ;;  %s1385_s8 = sadd.s32 %s2409_s19, %s1384_s7  ;;  %s304_s19 = sadd.s32 1, %s2409_s19  }
 0x1b1   : >> { %v335_v7 = vunpack.c.l.bf16 %v317_v63  ;;  %v338_v8 = vunpack.c.h.bf16 %v317_v63  ;;  %v341_v9 = vunpack.c.l.bf16 %v2766_v13  ;;  %v344_v10 = vunpack.c.h.bf16 %v2766_v13  ;;  %s1713_s9 = sshll.u32 %s1385_s8, 4  ;;  %p301_p2 = scmp.ge.s32.totalorder %s304_s19, 56  }
 0x1b2   : >> { %1731 = vmatpush3.bf16.msra.mxu0 %v2120_v39  ;;  %v325_v11 = vunpack.c.l.bf16 %v2768_v18  ;;  %v328_v12 = vunpack.c.h.bf16 %v2768_v18  ;;  %v331_v19 = vunpack.c.l.bf16 %v2770_v0  ;;  %v334_v20 = vunpack.c.h.bf16 %v2770_v0  ;;  %s1395_s10 = sshra.s32 %s1713_s9, 3  ;;  %s298_s2 = sadd.s32 (%p301_p2), 1, %s2405_s2  }
 0x1b3   : >> { %1732 = vmatprep.subr.bf16.mxu0 %v2121_v40  ;;  %v337_v26 = vunpack.c.l.bf16 %v2776_v5  ;;  %v340_v32 = vunpack.c.h.bf16 %v2776_v5  ;;  %v343_v33 = vunpack.c.l.bf16 %v2778_v6  ;;  %v346_v34 = vunpack.c.h.bf16 %v2778_v6  ;;  %v2135_v6 = vld [vmem:[%s3049_s4 + $0x110] sm:$0xff]   ;;  %s1716_s11 = sshll.u32 %s1395_s10, 2  ;;  %p295_p3 = scmp.ge.s32.totalorder (%p301_p2), %s298_s2, 2  }
 0x1b4   : >> { %s1398_s13 = scalar_lea.vmem %s3050_s5, %s1716_s11 }
 0x1b6   : >> { %1733 = vmatpush3.bf16.msra.mxu0 %v2122_v41 }
 0x1b7   : >> { %1734 = vmatprep.subr.bf16.mxu0 %v2123_v42 }
 0x1ba   : >> { %1735 = vmatpush3.bf16.msra.mxu0 %v2124_v44 }
 0x1bb   : >> { %1736 = vmatprep.subr.bf16.mxu0 %v2125_v45 }
 0x1be   : >> { %1737 = vmatpush3.bf16.msra.mxu0 %v2126_v47 }
 0x1bf   : >> { %1738 = vmatprep.subr.bf16.mxu0 %v2127_v49 }
 0x1c2   : >> { %1739 = vmatpush3.bf16.msra.mxu0 %v2128_v50 }
 0x1c3   : >> { %1740 = vmatprep.subr.bf16.mxu0 %v2130_v51 }
 0x1c6   : >> { %1741 = vmatpush3.bf16.msra.mxu0 %v2131_v52 }
 0x1c7   : >> { %1844 = vmatprep.subr.bf16.mxu0 %v2415_v38 }
 0x227   : >> { %v2786_v21 = vpop.permute.xlu1 %383  ;;  %v2788_v24 = vpop.permute.xlu0 %349 }
 0x228   : >> { %v358_v35 = vmul.f32 %v2788_v24, %v324_v59  ;;  %v364_v36 = vmul.f32 %v2788_v24, %v330_v61  ;;  %v370_v37 = vmul.f32 %v2788_v24, %v336_v14  ;;  %v376_v39 = vmul.f32 %v2788_v24, %v342_v16 }
 0x229   : >> { %v357_v40 = vmul.f32 %v2788_v24, %v323_v1  ;;  %v363_v41 = vmul.f32 %v2788_v24, %v329_v3  ;;  %v369_v42 = vmul.f32 %v2788_v24, %v335_v7  ;;  %v375_v43 = vmul.f32 %v2788_v24, %v341_v9 }
 0x22a   : >> { %v392_v44 = vadd.f32 %v2786_v21, %v358_v35  ;;  %v398_v45 = vadd.f32 %v2786_v21, %v364_v36  ;;  %v404_v46 = vadd.f32 %v2786_v21, %v370_v37  ;;  %v410_v47 = vadd.f32 %v2786_v21, %v376_v39 }
 0x22b   : >> { %v355_v48 = vpop.permute.xlu0 %354  ;;  %v391_v49 = vadd.f32 %v2786_v21, %v357_v40  ;;  %v397_v50 = vadd.f32 %v2786_v21, %v363_v41  ;;  %v403_v51 = vadd.f32 %v2786_v21, %v369_v42  ;;  %v409_v52 = vadd.f32 %v2786_v21, %v375_v43  ;;  %v389_v57 = vpop.permute.xlu1 %388 }
 0x22c   : >> { %v361_v53 = vmul.f32 %v355_v48, %v327_v60  ;;  %v367_v54 = vmul.f32 %v355_v48, %v333_v62  ;;  %v373_v55 = vmul.f32 %v355_v48, %v339_v15  ;;  %v379_v56 = vmul.f32 %v355_v48, %v345_v17 }
 0x22d   : >> { %v416_v58 = vmax.f32 %v392_v44, 0.0  ;;  %v422_v59 = vmax.f32 %v398_v45, 0.0  ;;  %v428_v61 = vmax.f32 %v404_v46, 0.0  ;;  %v434_v63 = vmax.f32 %v410_v47, 0.0 }
 0x22e   : >> { %v395_v13 = vadd.f32 %v389_v57, %v361_v53  ;;  %v401_v14 = vadd.f32 %v389_v57, %v367_v54  ;;  %v407_v16 = vadd.f32 %v389_v57, %v373_v55  ;;  %v413_v1 = vadd.f32 %v389_v57, %v379_v56 }
 0x22f   : >> { %v442_v3 = vmax.f32 %v416_v58, %v422_v59  ;;  %v360_v7 = vmul.f32 %v355_v48, %v326_v2  ;;  %v366_v9 = vmul.f32 %v355_v48, %v332_v4  ;;  %v372_v35 = vmul.f32 %v355_v48, %v338_v8 }
 0x230   : >> { %v419_v36 = vmax.f32 %v395_v13, 0.0  ;;  %v425_v37 = vmax.f32 %v401_v14, 0.0  ;;  %v431_v39 = vmax.f32 %v407_v16, 0.0  ;;  %v437_v60 = vmax.f32 %v413_v1, 0.0 }
 0x231   : >> { %v443_v62 = vmax.f32 %v442_v3, %v428_v61  ;;  %v378_v15 = vmul.f32 %v355_v48, %v344_v10  ;;  %v394_v17 = vadd.f32 %v389_v57, %v360_v7  ;;  %v400_v40 = vadd.f32 %v389_v57, %v366_v9 }
 0x232   : >> { %v455_v41 = vmax.f32 %v419_v36, %v425_v37  ;;  %v406_v42 = vadd.f32 %v389_v57, %v372_v35  ;;  %v415_v43 = vmax.f32 %v391_v49, 0.0  ;;  %v421_v44 = vmax.f32 %v397_v50, 0.0 }
 0x233   : >> { %v444_v45 = vmax.f32 %v443_v62, %v434_v63  ;;  %v412_v46 = vadd.f32 %v389_v57, %v378_v15  ;;  %v418_v47 = vmax.f32 %v394_v17, 0.0  ;;  %v424_v53 = vmax.f32 %v400_v40, 0.0  ;;  %v2140_v40 = vld [vmem:[%s3049_s4 + $0x160] sm:$0xff]  }
 0x234   : >> { %v456_v54 = vmax.f32 %v455_v41, %v431_v39  ;;  %v427_v2 = vmax.f32 %v403_v51, 0.0  ;;  %v430_v4 = vmax.f32 %v406_v42, 0.0  ;;  %v433_v8 = vmax.f32 %v409_v52, 0.0 }
 0x235   : >> { %v436_v55 = vmax.f32 %v412_v46, 0.0  ;;  %v439_v56 = vmax.f32 %v415_v43, %v421_v44  ;;  %v452_v58 = vmax.f32 %v418_v47, %v424_v53  ;;  %v359_v10 = vmul.f32 %v2788_v24, %v325_v11 }
 0x236   : >> { %v457_v59 = vmax.f32 %v456_v54, %v437_v60  ;;  %v362_v49 = vmul.f32 %v355_v48, %v328_v12  ;;  %v365_v50 = vmul.f32 %v2788_v24, %v331_v19  ;;  %v368_v51 = vmul.f32 %v355_v48, %v334_v20  ;;  %v2134_v54 = vld [vmem:[%s3049_s4 + $0x90] sm:$0xff]  }
 0x237   : >> { %v440_v61 = vmax.f32 %v439_v56, %v427_v2  ;;  %v453_v52 = vmax.f32 %v452_v58, %v430_v4  ;;  %v371_v63 = vmul.f32 %v2788_v24, %v337_v26  ;;  %v374_v11 = vmul.f32 %v355_v48, %v340_v32  ;;  %v2136_v4 = vld [vmem:[%s3049_s4 + $0xd8] sm:$0xff]   ;;  %v2139_v58 = vld [vmem:[%s3049_s4 + $0xe0] sm:$0xff]  }
 0x238   : >> { %v2825_v13 = vpack.c.bf16 %v457_v59, %v444_v45  ;;  %v377_v18 = vmul.f32 %v2788_v24, %v343_v33  ;;  %v380_v12 = vmul.f32 %v355_v48, %v346_v34  ;;  %v393_v0 = vadd.f32 %v2786_v21, %v359_v10  ;;  %v2137_v56 = vld [vmem:[%s3049_s4 + $0x98] sm:$0xff]   ;;  %v2146_v10 = vld [vmem:[%s3049_s4 + $0x128] sm:$0xff]   ;;  %v2148_v59 = vld [vmem:[%s3049_s4 + $0x170] sm:$0xff]  }
 0x239   : >> { %v441_v19 = vmax.f32 %v440_v61, %v433_v8  ;;  %v454_v20 = vmax.f32 %v453_v52, %v436_v55  ;;  %v396_v14 = vadd.f32 %v389_v57, %v362_v49  ;;  %v399_v16 = vadd.f32 %v2786_v21, %v365_v50  ;;  %v2142_v8 = vld [vmem:[%s3049_s4 + $0x120] sm:$0xff]   ;;  %v2144_v55 = vld [vmem:[%s3049_s4 + $0x168] sm:$0xff]   ;;  %v2152_v61 = vld [vmem:[%s3049_s4 + $0x178] sm:$0xff]  }
 0x23a   : >> { %647 = vmatprep.mubr.bf16.mxu0 %v2825_v13  ;;  %v402_v5 = vadd.f32 %v389_v57, %v368_v51  ;;  %v405_v26 = vadd.f32 %v2786_v21, %v371_v63  ;;  %v408_v32 = vadd.f32 %v389_v57, %v374_v11  ;;  %v411_v1 = vadd.f32 %v2786_v21, %v377_v18  ;;  %v2141_v49 = vld [vmem:[%s3049_s4 + $0xa0] sm:$0xff]   ;;  %v2143_v50 = vld [vmem:[%s3049_s4 + $0xe8] sm:$0xff]   ;;  %v2150_v51 = vld [vmem:[%s3049_s4 + $0x130] sm:$0xff]  }
 0x23b   : >> { %v2840_v24 = vpack.c.bf16 %v454_v20, %v441_v19  ;;  %v414_v33 = vadd.f32 %v389_v57, %v380_v12  ;;  %v417_v34 = vmax.f32 %v393_v0, 0.0  ;;  %v420_v48 = vmax.f32 %v396_v14, 0.0  ;;  %v2138_v57 = vld [vmem:[%s3049_s4 + $0x118] sm:$0xff]   ;;  %v2145_v52 = vld [vmem:[%s3049_s4 + $0xa8] sm:$0xff]   ;;  %v2147_v63 = vld [vmem:[%s3049_s4 + $0xf0] sm:$0xff]  }
 0x23c   : >> { %v423_v3 = vmax.f32 %v399_v16, 0.0  ;;  %v426_v7 = vmax.f32 %v402_v5, 0.0  ;;  %v429_v9 = vmax.f32 %v405_v26, 0.0  ;;  %v432_v35 = vmax.f32 %v408_v32, 0.0  ;;  %v2154_v11 = vld [vmem:[%s3049_s4 + $0x138] sm:$0xff]   ;;  %v2156_v18 = vld [vmem:[%s3049_s4 + $0x180] sm:$0xff]  }
 0x23d   : >> { %648 = vmatmul.mubr.bf16.vlgmr.msra.gmra.mrb[0].mxu0 %v2840_v24  ;;  %v445_v36 = vsel %vm230_vm3, %v417_v34, -inf  ;;  %v458_v37 = vsel %vm230_vm3, %v420_v48, -inf  ;;  %v435_v21 = vmax.f32 %v411_v1, 0.0  ;;  %v438_v39 = vmax.f32 %v414_v33, 0.0  ;;  %v2149_v12 = vld [vmem:[%s3049_s4 + $0xb0] sm:$0xff]   ;;  %v2151_v0 = vld [vmem:[%s3049_s4 + $0xf8] sm:$0xff]  }
 0x23e   : >> { %v446_v60 = vsel %vm230_vm3, %v423_v3, -inf  ;;  %v459_v62 = vsel %vm230_vm3, %v426_v7, -inf  ;;  %1845 = vmatpush3.bf16.msra.mxu0 %v2135_v6  ;;  %1848 = vmatprep.mubr.msk.bf16.mxu0 %vm2416_vm4, %v2415_v38  ;;  %v448_v41 = vsel %vm230_vm3, %v429_v9, -inf  ;;  %v461_v42 = vsel %vm230_vm3, %v432_v35, -inf  ;;  %v2158_v19 = vld [vmem:[%s3049_s4 + $0x140] sm:$0xff]   ;;  %v2160_v20 = vld [vmem:[%s3049_s4 + $0x188] sm:$0xff]  }
 0x23f   : >> { %v447_v15 = vmax.f32 %v445_v36, %v446_v60  ;;  %v460_v17 = vmax.f32 %v458_v37, %v459_v62  ;;  %1846 = vmatprep.subr.bf16.mxu0 %v2415_v38  ;;  %v450_v45 = vsel %vm230_vm3, %v435_v21, -inf  ;;  %v463_v46 = vsel %vm230_vm3, %v438_v39, -inf  ;;  %v2153_v14 = vld [vmem:[%s3049_s4 + $0xb8] sm:$0xff]   ;;  %v2155_v16 = vld [vmem:[%s3049_s4 + $0x100] sm:$0xff]   ;;  %v2162_v5 = vld [vmem:[%s3049_s4 + $0x148] sm:$0xff]  }
 0x240   : >> { %v2163_v26 = vld [vmem:[%s3049_s4 + $0x190] sm:$0xff]   ;;  %v2157_v32 = vld [vmem:[%s3049_s4 + $0xc0] sm:$0xff]   ;;  %v2159_v1 = vld [vmem:[%s3049_s4 + $0x108] sm:$0xff]  }
 0x241   : >> { %v449_v43 = vmax.f32 %v447_v15, %v448_v41  ;;  %v462_v44 = vmax.f32 %v460_v17, %v461_v42  ;;  %v2164_v6 = vld [vmem:[%s3049_s4 + $0x150] sm:$0xff]   ;;  %v2166_v33 = vld [vmem:[%s3049_s4 + $0x198] sm:$0xff]   ;;  %v2161_v34 = vld [vmem:[%s3049_s4 + $0xc8] sm:$0xff]  }
 0x242   : >> { %1847 = vmatpush3.bf16.msra.mxu0 %v2138_v57  ;;  %v2167_v48 = vld [vmem:[%s3049_s4 + $0x158] sm:$0xff]   ;;  %v2165_v3 = vld [vmem:[%s3049_s4 + $0x1a0] sm:$0xff]   ;;  %v2171_v7 = vld [vmem:[%s3049_s4 + $0x230] sm:$0xff]  }
 0x243   : >> { %v451_v47 = vmax.f32 %v449_v43, %v450_v45  ;;  %v464_v53 = vmax.f32 %v462_v44, %v463_v46  ;;  %1776 = vmatprep.subr.bf16.mxu0 %v2140_v40  ;;  %v2168_v9 = vld [vmem:[%s3049_s4 + $0x1a8] sm:$0xff]   ;;  %v2169_v35 = vld [vmem:[%s3049_s4 + $0x1f0] sm:$0xff]   ;;  %v2174_v36 = vld [vmem:[%s3049_s4 + $0x238] sm:$0xff]  }
 0x244   : >> { %v2170_v37 = vld [vmem:[%s3049_s4 + $0x1b0] sm:$0xff]   ;;  %v2172_v21 = vld [vmem:[%s3049_s4 + $0x1f8] sm:$0xff]   ;;  %v2175_v39 = vld [vmem:[%s3049_s4 + $0x200] sm:$0xff]  }
 0x245   : >> { %v2863_v2 = vpack.c.bf16 %v464_v53, %v451_v47  ;;  %v2176_v60 = vld [vmem:[%s3049_s4 + $0x1c0] sm:$0xff]   ;;  %v2178_v62 = vld [vmem:[%s3049_s4 + $0x1c8] sm:$0xff]   ;;  %v2179_v57 = vld [vmem:[%s3049_s4 + $0x210] sm:$0xff]  }
 0x246   : >> { %v2180_v15 = vld [vmem:[%s3049_s4 + $0x1d0] sm:$0xff]   ;;  %v2181_v17 = vld [vmem:[%s3049_s4 + $0x218] sm:$0xff]   ;;  %v2183_v41 = vld [vmem:[%s3049_s4 + $0x220] sm:$0xff]  }
 0x247   : >> { %1841 = vmatmul.mubr.msk.bf16.vlgmr.msra.gmra.mrb[0].mxu1 %vm230_vm3, %v2863_v2  ;;  %1849 = vmatmul.mubr.msk.bf16.vlgmr.msra.gmra.mrb[4].mxu0 %vm230_vm3, %v2863_v2  ;;  %v2182_v40 = vld [vmem:[%s3049_s4 + $0x1d8] sm:$0xff]   ;;  %v2184_v42 = vld [vmem:[%s3049_s4 + $0x1e0] sm:$0xff]   ;;  %v2185_v43 = vld [vmem:[%s3049_s4 + $0x228] sm:$0xff]  }
 0x248   : >> { %1752 = vmatpush3.bf16.msra.mxu1 %v2134_v54  ;;  %874 = vmatprep.mubr.bf16.mxu1 %v2825_v13  ;;  %v2186_v44 = vld [vmem:[%s3049_s4 + $0x1e8] sm:$0xff]  }
 0x249   : >> { %1753 = vmatprep.subr.bf16.mxu1 %v2136_v4  ;;  %1777 = vmatpush3.bf16.msra.mxu0 %v2142_v8 }
 0x24a   : >> { %1103 = vmatprep.mubr.bf16.mxu0 %v2825_v13  ;;  %1778 = vmatprep.subr.bf16.mxu0 %v2144_v55 }
 0x24c   : >> { %1754 = vmatpush3.bf16.msra.mxu1 %v2137_v56 }
 0x24d   : >> { %1755 = vmatprep.subr.bf16.mxu1 %v2139_v58  ;;  %1779 = vmatpush3.bf16.msra.mxu0 %v2146_v10 }
 0x24e   : >> { %1780 = vmatprep.subr.bf16.mxu0 %v2148_v59 }
 0x250   : >> { %1756 = vmatpush3.bf16.msra.mxu1 %v2141_v49 }
 0x251   : >> { %1757 = vmatprep.subr.bf16.mxu1 %v2143_v50  ;;  %1781 = vmatpush3.bf16.msra.mxu0 %v2150_v51 }
 0x252   : >> { %1782 = vmatprep.subr.bf16.mxu0 %v2152_v61 }
 0x254   : >> { %1758 = vmatpush3.bf16.msra.mxu1 %v2145_v52 }
 0x255   : >> { %1759 = vmatprep.subr.bf16.mxu1 %v2147_v63  ;;  %1783 = vmatpush3.bf16.msra.mxu0 %v2154_v11 }
 0x256   : >> { %1784 = vmatprep.subr.bf16.mxu0 %v2156_v18 }
 0x258   : >> { %1760 = vmatpush3.bf16.msra.mxu1 %v2149_v12 }
 0x259   : >> { %1761 = vmatprep.subr.bf16.mxu1 %v2151_v0  ;;  %1785 = vmatpush3.bf16.msra.mxu0 %v2158_v19 }
 0x25a   : >> { %1786 = vmatprep.subr.bf16.mxu0 %v2160_v20 }
 0x25c   : >> { %1762 = vmatpush3.bf16.msra.mxu1 %v2153_v14 }
 0x25d   : >> { %1763 = vmatprep.subr.bf16.mxu1 %v2155_v16  ;;  %1787 = vmatpush3.bf16.msra.mxu0 %v2162_v5 }
 0x25e   : >> { %1788 = vmatprep.subr.bf16.mxu0 %v2163_v26 }
 0x260   : >> { %1764 = vmatpush3.bf16.msra.mxu1 %v2157_v32 }
 0x261   : >> { %1765 = vmatprep.subr.bf16.mxu1 %v2159_v1  ;;  %1789 = vmatpush3.bf16.msra.mxu0 %v2164_v6 }
 0x262   : >> { %1790 = vmatprep.subr.bf16.mxu0 %v2166_v33 }
 0x264   : >> { %1766 = vmatpush3.bf16.msra.mxu1 %v2161_v34 }
 0x265   : >> { %1852 = vmatprep.subr.bf16.mxu1 %v2415_v38  ;;  %1791 = vmatpush3.bf16.msra.mxu0 %v2167_v48 }
 0x266   : >> { %1860 = vmatprep.subr.bf16.mxu0 %v2415_v38 }
 0x267   : >> { %875 = vmatmul.mubr.bf16.vlgmr.msra.gmra.mrb[4].mxu1 %v2840_v24 }
 0x268   : >> { %1853 = vmatpush3.bf16.msra.mxu1 %v2165_v3  ;;  %1856 = vmatprep.mubr.msk.bf16.mxu1 %vm2416_vm4, %v2415_v38 }
 0x269   : >> { %1854 = vmatprep.subr.bf16.mxu1 %v2415_v38  ;;  %1104 = vmatmul.mubr.bf16.vlgmr.msra.gmra.mrb[8].mxu0 %v2840_v24 }
 0x26a   : >> { %1861 = vmatpush3.bf16.msra.mxu0 %v2171_v7  ;;  %1864 = vmatprep.mubr.msk.bf16.mxu0 %vm2416_vm4, %v2415_v38 }
 0x26b   : >> { %1862 = vmatprep.subr.bf16.mxu0 %v2415_v38  ;;  %v2173_v38 = vld [vmem:[%s3049_s4 + $0x1b8] sm:$0xff]  }
 0x26c   : >> { %1855 = vmatpush3.bf16.msra.mxu1 %v2168_v9 }
 0x26d   : >> { %1801 = vmatprep.subr.bf16.mxu1 %v2169_v35 }
 0x26e   : >> { %1863 = vmatpush3.bf16.msra.mxu0 %v2174_v36 }
 0x26f   : >> { %1857 = vmatmul.mubr.msk.bf16.vlgmr.msra.gmra.mrb[8].mxu1 %vm230_vm3, %v2863_v2 }
 0x270   : >> { %1802 = vmatpush3.bf16.msra.mxu1 %v2170_v37  ;;  %1332 = vmatprep.mubr.bf16.mxu1 %v2825_v13  ;;  %v2177_v13 = vld [vmem:[%s3049_s4 + $0x208] sm:$0xff]  }
 0x271   : >> { %1803 = vmatprep.subr.bf16.mxu1 %v2172_v21  ;;  %1865 = vmatmul.mubr.msk.bf16.vlgmr.msra.gmra.mrb[12].mxu0 %vm230_vm3, %v2863_v2 }
 0x274   : >> { %1804 = vmatpush3.bf16.msra.mxu1 %v2173_v38 }
 0x275   : >> { %1805 = vmatprep.subr.bf16.mxu1 %v2175_v39 }
 0x278   : >> { %1806 = vmatpush3.bf16.msra.mxu1 %v2176_v60 }
 0x279   : >> { %1807 = vmatprep.subr.bf16.mxu1 %v2177_v13 }
 0x27c   : >> { %1808 = vmatpush3.bf16.msra.mxu1 %v2178_v62 }
 0x27d   : >> { %1809 = vmatprep.subr.bf16.mxu1 %v2179_v57 }
 0x280   : >> { %1810 = vmatpush3.bf16.msra.mxu1 %v2180_v15 }
 0x281   : >> { %1811 = vmatprep.subr.bf16.mxu1 %v2181_v17 }
 0x284   : >> { %1812 = vmatpush3.bf16.msra.mxu1 %v2182_v40 }
 0x285   : >> { %1813 = vmatprep.subr.bf16.mxu1 %v2183_v41 }
 0x288   : >> { %1814 = vmatpush3.bf16.msra.mxu1 %v2184_v42 }
 0x289   : >> { %1815 = vmatprep.subr.bf16.mxu1 %v2185_v43 }
 0x28c   : >> { %1816 = vmatpush3.bf16.msra.mxu1 %v2186_v44 }
 0x28f   : >> { %1333 = vmatmul.mubr.bf16.vlgmr.msra.gmra.mrb[12].mxu1 %v2840_v24 }
 0x310   : >> { %v1742_v45 = vpop.f32.mrb[0].mxu0 }
 0x311   : >> { %v1743_v46 = vpop.f32.mrb[1].mxu0 }
 0x312   : >> { %v1744_v47 = vadd.f32 %v1743_v46, %v1742_v45  ;;  %v1745_v53 = vpop.f32.mrb[2].mxu0 }
 0x313   : >> { %v1746_v54 = vpop.f32.mrb[3].mxu0 }
 0x314   : >> { %v1747_v2 = vadd.f32 %v1746_v54, %v1745_v53 }
 0x31a   : >> { %v690_v4 = vpop.f32.mrb[0].mxu1  ;;  %v917_v8 = vpop.f32.mrb[4].mxu0 }
 0x31b   : >> { %v691_v55 = vadd.f32 %v1744_v47, %v690_v4  ;;  %v1842_v56 = vpop.f32.mrb[1].mxu1  ;;  %v1850_v58 = vpop.f32.mrb[5].mxu0 }
 0x31c   : >> { %v693_v10 = vpop.f32.mrb[2].mxu1  ;;  %v920_v59 = vpop.f32.mrb[6].mxu0 }
 0x31d   : >> { %v694_v49 = vadd.f32 %v1747_v2, %v693_v10  ;;  %v1843_v50 = vpop.f32.mrb[3].mxu1  ;;  %v1851_v51 = vpop.f32.mrb[7].mxu0 }
 0x33a   : >> { %v1767_v61 = vpop.f32.mrb[4].mxu1 }
 0x33b   : >> { %v1768_v52 = vpop.f32.mrb[5].mxu1 }
 0x33c   : >> { %v1769_v63 = vadd.f32 %v1768_v52, %v1767_v61  ;;  %v1770_v24 = vpop.f32.mrb[6].mxu1  ;;  %v1792_v11 = vpop.f32.mrb[8].mxu0 }
 0x33d   : >> { %v1771_v18 = vpop.f32.mrb[7].mxu1  ;;  %v1793_v12 = vpop.f32.mrb[9].mxu0 }
 0x33e   : >> { %v918_v0 = vadd.f32 %v1769_v63, %v917_v8  ;;  %v1772_v19 = vadd.f32 %v1771_v18, %v1770_v24  ;;  %v1794_v20 = vadd.f32 %v1793_v12, %v1792_v11  ;;  %v1795_v14 = vpop.f32.mrb[10].mxu0 }
 0x33f   : >> { %v1796_v16 = vpop.f32.mrb[11].mxu0 }
 0x340   : >> { %v924_v5 = vmax.f32 %v691_v55, %v918_v0  ;;  %v921_v26 = vadd.f32 %v1772_v19, %v920_v59  ;;  %v1797_v32 = vadd.f32 %v1796_v16, %v1795_v14 }
 0x342   : >> { %v925_v1 = vmax.f32 %v694_v49, %v921_v26  ;;  %v1146_v6 = vpop.f32.mrb[8].mxu1 }
 0x343   : >> { %v1147_v33 = vadd.f32 %v1794_v20, %v1146_v6  ;;  %v1858_v34 = vpop.f32.mrb[9].mxu1 }
 0x344   : >> { %v1149_v48 = vpop.f32.mrb[10].mxu1  ;;  %v1375_v3 = vpop.f32.mrb[12].mxu0 }
 0x345   : >> { %v1153_v7 = vmax.f32 %v924_v5, %v1147_v33  ;;  %v1150_v9 = vadd.f32 %v1797_v32, %v1149_v48  ;;  %v1859_v35 = vpop.f32.mrb[11].mxu1  ;;  %v1866_v36 = vpop.f32.mrb[13].mxu0 }
 0x346   : >> { %v1378_v37 = vpop.f32.mrb[14].mxu0 }
 0x347   : >> { %v1154_v21 = vmax.f32 %v925_v1, %v1150_v9  ;;  %v1867_v38 = vpop.f32.mrb[15].mxu0 }
 0x362   : >> { %v1817_v39 = vpop.f32.mrb[12].mxu1 }
 0x363   : >> { %v1818_v60 = vpop.f32.mrb[13].mxu1 }
 0x364   : >> { %v1819_v13 = vadd.f32 %v1818_v60, %v1817_v39  ;;  %v1820_v62 = vpop.f32.mrb[14].mxu1 }
 0x365   : >> { %v1821_v57 = vpop.f32.mrb[15].mxu1 }
 0x366   : >> { %v1376_v15 = vadd.f32 %v1819_v13, %v1375_v3  ;;  %v1822_v17 = vadd.f32 %v1821_v57, %v1820_v62 }
 0x368   : >> { %v1382_v40 = vmax.f32 %v1153_v7, %v1376_v15  ;;  %v1379_v41 = vadd.f32 %v1822_v17, %v1378_v37  ;;  %303 = sbr.rel (!%p301_p2) target bundleno = 422 (0x1a6), region = 97 }
 0x36a   : >> { %v1720_v42 = vpack.c.bf16 %v1382_v40, %v1382_v40  ;;  %v1383_v43 = vmax.f32 %v1154_v21, %v1379_v41 }
 0x36c   : >> { %1400 = vst.msk [vmem:[%s1398_s13] sm:$0xf] %vm1399_vm5, %v1720_v42  ;;  %v1721_v44 = vpack.c.bf16 %v1383_v43, %v1383_v43 }
 0x36e   : >> { %1401 = vst.msk [vmem:[%s1398_s13 + $0x4] sm:$0xf] %vm1399_vm5, %v1721_v44 }
 0x36f   :  { %297 = sbr.rel (!%p295_p3) target bundleno = 421 (0x1a5), region = 108 }

// kernel: cnn_bn_vo_forward.5
= control target key start
LH: loop header
LB: loop body
LE: loop exit
PB: predicated region body
PF: predicated region fallthrough
CT: control target
= control target key end

     0   :  { %v2075_v20 = vmov 0.0   ;;  %v2077_v21 = vmov 0.0   ;;  %v2079_v22 = vmov 0.0   ;;  %v2081_v23 = vmov 0.0   ;;  %s2091_s8 = smov 0   ;;  %s2483_s0 = inlined_call_operand.vmem [shape: bf16[1920,76], index: 0, kind: input, shape index: {}]   ;;  %s2484_s1 = inlined_call_operand.vmem [shape: bf16[5,32,80], index: 1, kind: input, shape index: {}]   ;;  %s2485_s2 = inlined_call_operand.vmem [shape: f32[32,1], index: 2, kind: input, shape index: {}]   ;;  %s2486_s3 = inlined_call_operand.vmem [shape: f32[32,1], index: 3, kind: input, shape index: {}]   ;;  %s2487_s4 = inlined_call_operand.vmem [shape: bf16[4,72,18], index: 4, kind: input, shape index: {}]   ;;  %s2488_s5 = inlined_call_operand.vmem [shape: bf16[896,18], index: 5, kind: output, shape index: {}]  }
   0x1   :  { %v1978_v0 = vld [vmem:[%s2484_s1] sm:$0xf]  ;;  %v1983_v1 = vld [vmem:[%s2484_s1 + $0x4] sm:$0xf]  ;;  %v1988_v2 = vld [vmem:[%s2484_s1 + $0x8] sm:$0xf] }
   0x2   :  { %v1993_v3 = vld [vmem:[%s2484_s1 + $0xc] sm:$0xf]  ;;  %v1998_v4 = vld [vmem:[%s2484_s1 + $0x10] sm:$0xf]  ;;  %v2003_v5 = vld [vmem:[%s2484_s1 + $0x14] sm:$0xf] }
   0x3   :  { %v2008_v6 = vld [vmem:[%s2484_s1 + $0x18] sm:$0xf]  ;;  %v2013_v7 = vld [vmem:[%s2484_s1 + $0x1c] sm:$0xf]  ;;  %v2018_v8 = vld [vmem:[%s2484_s1 + $0x20] sm:$0xf] }
   0x4   :  { %v2023_v9 = vld [vmem:[%s2484_s1 + $0x24] sm:$0xf]  ;;  %v2028_v10 = vld [vmem:[%s2484_s1 + $0x28] sm:$0xf]  ;;  %v2033_v11 = vld [vmem:[%s2484_s1 + $0x2c] sm:$0xf] }
   0x5   :  { %v2038_v12 = vld [vmem:[%s2484_s1 + $0x30] sm:$0xf]  ;;  %v2043_v13 = vld [vmem:[%s2484_s1 + $0x34] sm:$0xf]  ;;  %v2048_v14 = vld [vmem:[%s2484_s1 + $0x38] sm:$0xf] }
   0x6   :  { %v2053_v15 = vld [vmem:[%s2484_s1 + $0x3c] sm:$0xf]  ;;  %v2058_v16 = vld [vmem:[%s2484_s1 + $0x40] sm:$0xf]  ;;  %v2063_v17 = vld [vmem:[%s2484_s1 + $0x44] sm:$0xf] }
   0x7   :  { %v2068_v18 = vld [vmem:[%s2484_s1 + $0x48] sm:$0xf]  ;;  %v2073_v19 = vld [vmem:[%s2484_s1 + $0x4c] sm:$0xf]  ;;  %v2083_v24 = vmov 0.0   ;;  %v2085_v25 = vmov 0.0  }
   0x8   :  { %v2087_v26 = vmov 0.0   ;;  %v2089_v27 = vmov 0.0  }
   0x9 LB: > { %s59_s1 = smul.u32 960, %s1894_s8  ;;  %s2121_s9 = smov 0   ;;  %s1894_s8 = sphi %s2091_s8, %s50_s8   ;;  %v1890_v27 = vphi %v2089_v27, %v2504_v27   ;;  %v1886_v26 = vphi %v2087_v26, %v2503_v26   ;;  %v1882_v25 = vphi %v2085_v25, %v2502_v25   ;;  %v1878_v24 = vphi %v2083_v24, %v2501_v24   ;;  %v1874_v23 = vphi %v2081_v23, %v2500_v23   ;;  %v1870_v22 = vphi %v2079_v22, %v2499_v22   ;;  %v1866_v21 = vphi %v2077_v21, %v2498_v21   ;;  %v1862_v20 = vphi %v2075_v20, %v2497_v20  }
   0xa LB: >> { %s1272_s10 = sshll.u32 %s1930_s9, 4  ;;  %s1940_s17 = smov 126   ;;  %v1287_v33 = vcombine.low %v2018_v8, %v2023_v9  ;;  %vm140_vm0 = vcmask 654336   ;;  %v1274_v34 = vcombine.low %v1998_v4, %v2003_v5  ;;  %v1288_v45 = vcombine.low %v2028_v10, %v2033_v11  ;;  %s1930_s9 = sphi %s2121_s9, %s65_s9   ;;  %v1926_v27 = vphi %v1890_v27, %v2496_v27   ;;  %v1922_v26 = vphi %v1886_v26, %v2495_v26   ;;  %v1918_v25 = vphi %v1882_v25, %v2494_v25   ;;  %v1914_v24 = vphi %v1878_v24, %v2493_v24   ;;  %v1910_v23 = vphi %v1874_v23, %v2492_v23   ;;  %v1906_v22 = vphi %v1870_v22, %v2491_v22   ;;  %v1902_v21 = vphi %v1866_v21, %v2490_v21   ;;  %v1898_v20 = vphi %v1862_v20, %v2489_v20  }
   0xb   : >> { %s75_s11 = sadd.s32 %s1272_s10, %s59_s1  ;;  %s1941_s18 = smov 127   ;;  %v1291_v46 = vcombine.low %v2038_v12, %v2043_v13  ;;  %v1275_v50 = vcombine.low %v2008_v6, %v2013_v7  ;;  %v1283_v51 = vcombine.low %v1978_v0, %v1983_v1  ;;  %v1292_v55 = vcombine.low %v2048_v14, %v2053_v15 }
   0xc   : >> { %s76_s12 = sshra.s32 %s75_s11, 3  ;;  %1472 = vmatprep.mubr.msk.bf16.mxu0 %vm140_vm0, %v1287_v33  ;;  %s1942_s19 = smov 125   ;;  %1444 = vmatprep.mubr.msk.bf16.mxu1 %vm140_vm0, %v1274_v34  ;;  %v1295_v56 = vcombine.low %v2058_v16, %v2063_v17  ;;  %v1284_v59 = vcombine.low %v1988_v2, %v1993_v3  ;;  %v1296_v62 = vcombine.low %v2068_v18, %v2073_v19  ;;  %vm525_vm1 = vcmask 588800  }
   0xd   : >> { %s1273_s13 = sshll.u32 %s76_s12, 2  ;;  %s1943_s20 = smov 124  }
   0xe   : >> { %s79_s16 = scalar_lea.vmem %s2483_s0, %s1273_s13  ;;  %s520_s21 = smul.u32 56, %s1894_s8 }
   0xf   : >> { %v2156_v28 = vld [vmem:[%s79_s16 + $0x10] sm:$0xff]   ;;  %v2158_v29 = vld [vmem:[%s79_s16] sm:$0xff]   ;;  %v2161_v30 = vld [vmem:[%s79_s16 + $0x18] sm:$0xff]  }
  0x10   : >> { %280 = vrot.lane.b32.xlu1 %v2156_v28, %s1940_s17  ;;  %276 = vrot.lane.b32.xlu0 %v2158_v29, %s1940_s17  ;;  %v2164_v31 = vld [vmem:[%s79_s16 + $0x8] sm:$0xff]   ;;  %v2168_v32 = vld [vmem:[%s79_s16 + $0x20] sm:$0xff]   ;;  %s521_s22 = sadd.s32 %s1930_s9, %s520_s21  ;;  %s65_s9 = sadd.s32 1, %s1930_s9  }
  0x11   : >> { %s1365_s23 = sshll.u32 %s521_s22, 4  ;;  %p62_p0 = scmp.ge.s32.totalorder %s65_s9, 56  }
  0x12   : >> { %s524_s24 = scalar_lea.vmem [#allocation2], %s1365_s23  ;;  %s50_s8 = sadd.s32 (%p62_p0), 1, %s1894_s8  }
  0x13   : > { %p47_p1 = scmp.ge.s32.totalorder (%p62_p0), %s50_s8, 2  }
  0x14   : >> { %282 = vrot.lane.b32.xlu1 %v2161_v30, %s1940_s17  ;;  %278 = vrot.lane.b32.xlu0 %v2164_v31, %s1940_s17 }
  0x18   : >> { %125 = vrot.lane.b32.xlu1 %v2158_v29, %s1941_s18  ;;  %284 = vrot.lane.b32.xlu0 %v2168_v32, %s1940_s17 }
  0x1c   : >> { %127 = vrot.lane.b32.xlu1 %v2164_v31, %s1941_s18  ;;  %360 = vrot.lane.b32.xlu0 %v2158_v29, %s1942_s19 }
  0x20   : >> { %129 = vrot.lane.b32.xlu1 %v2156_v28, %s1941_s18  ;;  %362 = vrot.lane.b32.xlu0 %v2164_v31, %s1942_s19 }
  0x24   : >> { %131 = vrot.lane.b32.xlu1 %v2161_v30, %s1941_s18  ;;  %364 = vrot.lane.b32.xlu0 %v2156_v28, %s1942_s19 }
  0x28   : >> { %133 = vrot.lane.b32.xlu1 %v2168_v32, %s1941_s18  ;;  %366 = vrot.lane.b32.xlu0 %v2161_v30, %s1942_s19 }
  0x2c   : >> { %444 = vrot.lane.b32.xlu1 %v2158_v29, %s1943_s20  ;;  %368 = vrot.lane.b32.xlu0 %v2168_v32, %s1942_s19 }
  0x30   : >> { %448 = vrot.lane.b32.xlu1 %v2156_v28, %s1943_s20  ;;  %446 = vrot.lane.b32.xlu0 %v2164_v31, %s1943_s20 }
  0x34   : >> { %452 = vrot.lane.b32.xlu1 %v2168_v32, %s1943_s20  ;;  %450 = vrot.lane.b32.xlu0 %v2161_v30, %s1943_s20 }
  0x82   : >> { %v281_v35 = vpop.permute.xlu1 %280  ;;  %v277_v36 = vpop.permute.xlu0 %276 }
  0x83   : >> { %1462 = vmatprep.subr.bf16.mxu0 %v277_v36 }
  0x84   : >> { %1463 = vmatpush3.bf16.msra.mxu0 %v277_v36 }
  0x86   : >> { %v283_v37 = vpop.permute.xlu1 %282  ;;  %v279_v38 = vpop.permute.xlu0 %278 }
  0x87   : >> { %1464 = vmatprep.subr.bf16.mxu0 %v279_v38 }
  0x88   : >> { %1465 = vmatpush3.bf16.msra.mxu0 %v279_v38 }
  0x89   : >> { %1466 = vmatprep.subr.bf16.mxu0 %v281_v35 }
  0x8a   : >> { %v126_v39 = vpop.permute.xlu1 %125  ;;  %v285_v40 = vpop.permute.xlu0 %284 }
  0x8b   : >> { %1434 = vmatprep.subr.bf16.mxu1 %v126_v39 }
  0x8c   : >> { %1435 = vmatpush3.bf16.msra.mxu1 %v126_v39  ;;  %1467 = vmatpush3.bf16.msra.mxu0 %v281_v35 }
  0x8d   : >> { %1468 = vmatprep.subr.bf16.mxu0 %v283_v37 }
  0x8e   : >> { %v128_v41 = vpop.permute.xlu1 %127  ;;  %v361_v42 = vpop.permute.xlu0 %360 }
  0x8f   : >> { %1436 = vmatprep.subr.bf16.mxu1 %v128_v41 }
  0x90   : >> { %1437 = vmatpush3.bf16.msra.mxu1 %v128_v41  ;;  %1469 = vmatpush3.bf16.msra.mxu0 %v283_v37 }
  0x91   : >> { %1470 = vmatprep.subr.bf16.mxu0 %v285_v40 }
  0x92   : >> { %v130_v43 = vpop.permute.xlu1 %129  ;;  %v363_v44 = vpop.permute.xlu0 %362 }
  0x93   : >> { %1438 = vmatprep.subr.bf16.mxu1 %v130_v43 }
  0x94   : >> { %1439 = vmatpush3.bf16.msra.mxu1 %v130_v43  ;;  %1471 = vmatpush3.bf16.msra.mxu0 %v285_v40 }
  0x95   : >> { %1476 = vmatprep.subr.bf16.mxu0 %v361_v42 }
  0x96   : >> { %v132_v47 = vpop.permute.xlu1 %131  ;;  %v365_v48 = vpop.permute.xlu0 %364 }
  0x97   : >> { %1440 = vmatprep.subr.bf16.mxu1 %v132_v47  ;;  %1473 = vmatmul.mubr.msk.bf16.vlgmr.msra.gmra.mrb[0].mxu0 %vm140_vm0, %v1288_v45 }
  0x98   : >> { %1441 = vmatpush3.bf16.msra.mxu1 %v132_v47  ;;  %1477 = vmatpush3.bf16.msra.mxu0 %v361_v42 }
  0x99   : >> { %1486 = vmatprep.mubr.msk.bf16.mxu0 %vm140_vm0, %v1291_v46  ;;  %1478 = vmatprep.subr.bf16.mxu0 %v363_v44 }
  0x9a   : >> { %v134_v49 = vpop.permute.xlu1 %133  ;;  %v367_v52 = vpop.permute.xlu0 %366 }
  0x9b   : >> { %1442 = vmatprep.subr.bf16.mxu1 %v134_v49 }
  0x9c   : >> { %1443 = vmatpush3.bf16.msra.mxu1 %v134_v49  ;;  %1479 = vmatpush3.bf16.msra.mxu0 %v363_v44 }
  0x9d   : >> { %1448 = vmatprep.subr.bf16.mxu1 %v2158_v29  ;;  %1480 = vmatprep.subr.bf16.mxu0 %v365_v48 }
  0x9e   : >> { %v369_v53 = vpop.permute.xlu0 %368  ;;  %v445_v54 = vpop.permute.xlu1 %444 }
  0x9f   : >> { %1445 = vmatmul.mubr.msk.bf16.vlgmr.msra.gmra.mrb[0].mxu1 %vm140_vm0, %v1275_v50 }
  0xa0   : >> { %1449 = vmatpush3.bf16.msra.mxu1 %v2158_v29  ;;  %1458 = vmatprep.mubr.msk.bf16.mxu1 %vm140_vm0, %v1283_v51 }
  0xa1   : >> { %1481 = vmatpush3.bf16.msra.mxu0 %v365_v48  ;;  %1450 = vmatprep.subr.bf16.mxu1 %v2164_v31 }
  0xa2   : >> { %1482 = vmatprep.subr.bf16.mxu0 %v367_v52  ;;  %v447_v57 = vpop.permute.xlu0 %446  ;;  %v449_v58 = vpop.permute.xlu1 %448 }
  0xa4   : >> { %1451 = vmatpush3.bf16.msra.mxu1 %v2164_v31 }
  0xa5   : >> { %1483 = vmatpush3.bf16.msra.mxu0 %v367_v52  ;;  %1452 = vmatprep.subr.bf16.mxu1 %v2156_v28 }
  0xa6   : >> { %1484 = vmatprep.subr.bf16.mxu0 %v369_v53  ;;  %v451_v60 = vpop.permute.xlu0 %450  ;;  %v453_v61 = vpop.permute.xlu1 %452 }
  0xa8   : >> { %1453 = vmatpush3.bf16.msra.mxu1 %v2156_v28 }
  0xa9   : >> { %1485 = vmatpush3.bf16.msra.mxu0 %v369_v53  ;;  %1454 = vmatprep.subr.bf16.mxu1 %v2161_v30 }
  0xaa   : >> { %1490 = vmatprep.subr.bf16.mxu0 %v445_v54 }
  0xac   : >> { %1455 = vmatpush3.bf16.msra.mxu1 %v2161_v30  ;;  %1487 = vmatmul.mubr.msk.bf16.vlgmr.msra.gmra.mrb[0].mxu0 %vm140_vm0, %v1292_v55 }
  0xad   : >> { %1491 = vmatpush3.bf16.msra.mxu0 %v445_v54  ;;  %1456 = vmatprep.subr.bf16.mxu1 %v2168_v32 }
  0xae   : >> { %1492 = vmatprep.subr.bf16.mxu0 %v447_v57  ;;  %1500 = vmatprep.mubr.msk.bf16.mxu0 %vm140_vm0, %v1295_v56 }
  0xb0   : >> { %1457 = vmatpush3.bf16.msra.mxu1 %v2168_v32 }
  0xb1   : >> { %1493 = vmatpush3.bf16.msra.mxu0 %v447_v57 }
  0xb2   : >> { %1494 = vmatprep.subr.bf16.mxu0 %v449_v58 }
  0xb3   : >> { %1459 = vmatmul.mubr.msk.bf16.vlgmr.msra.gmra.mrb[0].mxu1 %vm140_vm0, %v1284_v59 }
  0xb5   : >> { %1495 = vmatpush3.bf16.msra.mxu0 %v449_v58 }
  0xb6   : >> { %1496 = vmatprep.subr.bf16.mxu0 %v451_v60 }
  0xb9   : >> { %1497 = vmatpush3.bf16.msra.mxu0 %v451_v60 }
  0xba   : >> { %1498 = vmatprep.subr.bf16.mxu0 %v453_v61 }
  0xbd   : >> { %1499 = vmatpush3.bf16.msra.mxu0 %v453_v61 }
  0xc0   : >> { %1501 = vmatmul.mubr.msk.bf16.vlgmr.msra.gmra.mrb[0].mxu0 %vm140_vm0, %v1296_v62 }
 0x186   : >> { %v1460_v63 = vpop.f32.mrb[0].mxu1 }
 0x187   : >> { %v251_v28 = vpop.f32.mrb[1].mxu1 }
 0x188   : >> { %v1461_v29 = vpop.f32.mrb[2].mxu1 }
 0x189   : >> { %v254_v30 = vpop.f32.mrb[3].mxu1 }
 0x193   : >> { %v1502_v31 = vpop.f32.mrb[0].mxu0 }
 0x194   : >> { %v1560_v32 = vadd.f32 %v1502_v31, %v1460_v63  ;;  %v499_v33 = vpop.f32.mrb[1].mxu0 }
 0x195   : >> { %v1561_v34 = vadd.f32 %v499_v33, %v251_v28  ;;  %v1503_v35 = vpop.f32.mrb[2].mxu0 }
 0x196   : >> { %v530_v36 = vadd.f32 %v1918_v25, %v1560_v32   ;;  %v534_v37 = vmul.f32 %v1560_v32, %v1560_v32  ;;  %v1562_v38 = vadd.f32 %v1503_v35, %v1461_v29  ;;  %v502_v39 = vpop.f32.mrb[3].mxu0 }
 0x197   : >> { %v528_v40 = vadd.f32 %v1926_v27, %v1561_v34   ;;  %v532_v41 = vmul.f32 %v1561_v34, %v1561_v34  ;;  %v1563_v42 = vadd.f32 %v502_v39, %v254_v30  ;;  %64 = sbr.rel (!%p62_p0) target bundleno = 10 (0xa), region = 79 }
 0x198   : >> { %v538_v43 = vadd.f32 %v1902_v21, %v534_v37   ;;  %v519_v44 = vpack.c.bf16 %v1562_v38, %v1560_v32  ;;  %v531_v45 = vadd.f32 %v1914_v24, %v1562_v38   ;;  %v535_v46 = vmul.f32 %v1562_v38, %v1562_v38 }
 0x199   : >> { %v536_v47 = vadd.f32 %v1910_v23, %v532_v41   ;;  %v518_v48 = vpack.c.bf16 %v1563_v42, %v1561_v34  ;;  %v529_v49 = vadd.f32 %v1922_v26, %v1563_v42   ;;  %v533_v25 = vmul.f32 %v1563_v42, %v1563_v42 }
 0x19a   : >> { %527 = vst.msk [vmem:[%s524_s24 + $0x8] sm:$0xff] %vm525_vm1, %v519_v44  ;;  %v539_v50 = vadd.f32 %v1898_v20, %v535_v46   ;;  %v2490_v21 = vmov %v538_v43  ;;  %v2493_v24 = vmov %v531_v45  ;;  %v2496_v27 = vmov %v528_v40 }
 0x19b   : >> { %526 = vst.msk [vmem:[%s524_s24] sm:$0xff] %vm525_vm1, %v518_v48  ;;  %v537_v51 = vadd.f32 %v1906_v22, %v533_v25   ;;  %v2492_v23 = vmov %v536_v47  ;;  %v2494_v25 = vmov %v530_v36  ;;  %v2495_v26 = vmov %v529_v49 }
 0x19c   : >> { %v2489_v20 = vmov %v539_v50  ;;  %v2498_v21 = vmov (%p62_p0), %v538_v43  ;;  %v2500_v23 = vmov (%p62_p0), %v536_v47  ;;  %v2501_v24 = vmov (%p62_p0), %v531_v45 }
 0x19d   : >> { %v2491_v22 = vmov %v537_v51  ;;  %v2497_v20 = vmov (%p62_p0), %v539_v50  ;;  %v2502_v25 = vmov (%p62_p0), %v530_v36  ;;  %v2503_v26 = vmov (%p62_p0), %v529_v49 }
 0x19e   : > { %v2499_v22 = vmov %v537_v51  ;;  %v2504_v27 = vmov %v528_v40  ;;  %49 = sbr.rel (!%p47_p1) target bundleno = 9 (0x9), region = 90  ;;  %v541_v52 = vsel (%p47_p1), %vm525_vm1, %v528_v40, 0.0  ;;  %v550_v53 = vsel (%p47_p1), %vm525_vm1, %v531_v45, 0.0  ;;  %v582_v61 = vld [vmem:[%s2485_s2 + $0x8] sm:$0xff] (%p47_p1)  ;;  %v581_v62 = vld [vmem:[%s2485_s2] sm:$0xff] (%p47_p1)  ;;  %v584_v32 = vld [vmem:[%s2485_s2 + $0x18] sm:$0xff] (%p47_p1) }
 0x19f   :  { %v547_v27 = vsel (%p47_p1), %vm525_vm1, %v530_v36, 0.0  ;;  %542 = vadd.xlane.f32.xlu0 (%p47_p1), %v541_v52  ;;  %v544_v54 = vsel (%p47_p1), %vm525_vm1, %v529_v49, 0.0  ;;  %v560_v55 = vsel (%p47_p1), %vm525_vm1, %v537_v51, 0.0  ;;  %v557_v56 = vsel (%p47_p1), %vm525_vm1, %v536_v47, 0.0  ;;  %v2295_v30 = vld [vmem:[%s2486_s3 + $0x8] sm:$0xff] (%p47_p1)  ;;  %v2308_v34 = vld [vmem:[%s2486_s3] sm:$0xff] (%p47_p1) }
 0x1a0   :  { %548 = vadd.xlane.f32.xlu1 (%p47_p1), %v547_v27  ;;  %v566_v57 = vsel (%p47_p1), %vm525_vm1, %v539_v50, 0.0  ;;  %v563_v0 = vsel (%p47_p1), %vm525_vm1, %v538_v43, 0.0  ;;  %v583_v35 = vld [vmem:[%s2485_s2 + $0x10] sm:$0xff] (%p47_p1)  ;;  %v2325_v42 = vld [vmem:[%s2486_s3 + $0x18] sm:$0xff] (%p47_p1)  ;;  %s2344_s13 = smov (%p47_p1), 0  }
 0x1a1   :  { %v2335_v45 = vld [vmem:[%s2486_s3 + $0x10] sm:$0xff] (%p47_p1) }
 0x1a3   :  { %545 = vadd.xlane.f32.xlu0 (%p47_p1), %v544_v54 }
 0x1a4   :  { %551 = vadd.xlane.f32.xlu1 (%p47_p1), %v550_v53 }
 0x1a7   :  { %558 = vadd.xlane.f32.xlu0 %v557_v56 }
 0x1a8   :  { %561 = vadd.xlane.f32.xlu1 %v560_v55 }
 0x1ab   :  { %564 = vadd.xlane.f32.xlu0 %v563_v0 }
 0x1ac   :  { %567 = vadd.xlane.f32.xlu1 %v566_v57 }
 0x22c   :  { %v543_v2 = vpop.xlane.xlu0 %542 }
 0x22d   :  { %v549_v1 = vpop.xlane.xlu1 %548  ;;  %v553_v3 = vmul.f32 0.00012400794, %v543_v2 }
 0x22e   :  { %v555_v14 = vmul.f32 0.00012400794, %v549_v1 }
 0x22f   :  { %v573_v7 = vmul.f32 %v553_v3, %v553_v3 }
 0x230   :  { %v546_v5 = vpop.xlane.xlu0 %545  ;;  %v575_v23 = vmul.f32 %v555_v14, %v555_v14 }
 0x231   :  { %v552_v4 = vpop.xlane.xlu1 %551  ;;  %v554_v6 = vmul.f32 0.00012400794, %v546_v5 }
 0x232   :  { %v556_v10 = vmul.f32 0.00012400794, %v552_v4 }
 0x233   :  { %v574_v11 = vmul.f32 %v554_v6, %v554_v6 }
 0x234   :  { %v559_v9 = vpop.xlane.xlu0 %558  ;;  %v576_v19 = vmul.f32 %v556_v10, %v556_v10 }
 0x235   :  { %v562_v8 = vpop.xlane.xlu1 %561  ;;  %v569_v13 = vmul.f32 0.00012400794, %v559_v9 }
 0x236   :  { %v570_v12 = vmul.f32 0.00012400794, %v562_v8 }
 0x237   :  { %v577_v16 = vsub.f32 %v569_v13, %v573_v7 }
 0x238   :  { %v578_v15 = vsub.f32 %v570_v12, %v574_v11  ;;  %v565_v18 = vpop.xlane.xlu0 %564 }
 0x239   :  { %v568_v17 = vpop.xlane.xlu1 %567  ;;  %v585_v21 = vadd.f32 1e-05, %v577_v16  ;;  %v571_v24 = vmul.f32 0.00012400794, %v565_v18 }
 0x23a   :  { %v586_v20 = vadd.f32 1e-05, %v578_v15  ;;  %v572_v22 = vmul.f32 0.00012400794, %v568_v17 }
 0x23b   :  { %v579_v58 = vsub.f32 %v571_v24, %v575_v23 }
 0x23c   :  { %1750 = vrsqrt.f32 %v586_v20  ;;  %v580_v26 = vsub.f32 %v572_v22, %v576_v19 }
 0x23d   :  { %1752 = vrsqrt.f32 %v585_v21  ;;  %v587_v60 = vadd.f32 1e-05, %v579_v58 }
 0x23e   :  { %v588_v59 = vadd.f32 1e-05, %v580_v26 }
 0x240   :  { %1754 = vrsqrt.f32 %v588_v59 }
 0x241   :  { %1756 = vrsqrt.f32 %v587_v60 }
 0x246   :  { %v1751_v63 = vpop.eup %1750 }
 0x247   :  { %v1753_v28 = vpop.eup %1752  ;;  %v2290_v29 = vmul.f32 %v1751_v63, %v582_v61 }
 0x248   :  { %v2297_v31 = vmul.f32 %v1753_v28, %v581_v62 }
 0x249   :  { %v2303_v33 = vmul.f32 %v2290_v29, %v554_v6 }
 0x24a   :  { %v1755_v36 = vpop.eup %1754  ;;  %v2314_v37 = vmul.f32 %v2297_v31, %v553_v3 }
 0x24b   :  { %v1757_v38 = vpop.eup %1756  ;;  %v606_v39 = vsub.f32 %v2295_v30, %v2303_v33  ;;  %v2318_v40 = vmul.f32 %v1755_v36, %v584_v32 }
 0x24c   :  { %v605_v41 = vsub.f32 %v2308_v34, %v2314_v37  ;;  %v2327_v43 = vmul.f32 %v1757_v38, %v583_v35 }
 0x24d   :  { %v2330_v44 = vmul.f32 %v2318_v40, %v556_v10 }
 0x24e   :  { %v2338_v46 = vmul.f32 %v2327_v43, %v555_v14 }
 0x24f   :  { %v608_v47 = vsub.f32 %v2325_v42, %v2330_v44 }
 0x250   :  { %v607_v48 = vsub.f32 %v2335_v45, %v2338_v46 }
 0x251 LB: > { %s2349_s14 = smov 0   ;;  %s1934_s13 = sphi %s2344_s13, %s614_s13  }
 0x252 LB: >> { %v1944_v49 = vmov 0   ;;  %v1760_v25 = vld [vmem:[%s2487_s4] sm:$0xff]   ;;  %v1762_v51 = vld [vmem:[%s2487_s4 + $0x8] sm:$0xff]   ;;  %v1764_v52 = vld [vmem:[%s2487_s4 + $0x10] sm:$0xff]   ;;  %vm811_vm2 = vcmask 1043456   ;;  %s621_s11 = smul.u32 56, %s1934_s13  ;;  %s1938_s14 = sphi %s2349_s14, %s620_s14  }
 0x253   : >> { %1759 = vset.pattern.permute.xlu1 %v1944_v49  ;;  %1758 = vset.pattern.permute.xlu0 %v1944_v49  ;;  %v1761_v50 = vld [vmem:[%s2487_s4 + $0x24] sm:$0xff]   ;;  %v1763_v27 = vld [vmem:[%s2487_s4 + $0x2c] sm:$0xff]   ;;  %v1765_v53 = vld [vmem:[%s2487_s4 + $0x34] sm:$0xff]   ;;  %s1301_s2 = sshll.u32 %s1938_s14, 2  ;;  %s1143_s6 = smul.u32 14, %s1934_s13  ;;  %vm1166_vm3 = vcmask 142336  }
 0x254   : >> { %663 = vperm.xlu1 %1759, %v2327_v43   ;;  %653 = vperm.xlu0 %1758, %v2297_v31   ;;  %v1766_v54 = vld [vmem:[%s2487_s4 + $0x18] sm:$0xff]   ;;  %v1768_v56 = vld [vmem:[%s2487_s4 + $0x20] ss:$0 sps:$4 sm:$0xff]   ;;  %v1769_v57 = vld [vmem:[%s2487_s4 + $0x44] ss:$0 sps:$4 sm:$0xff]   ;;  %s623_s12 = sadd.s32 %s1301_s2, %s621_s11 }
 0x255   : >> { %1504 = vmatprep.subr.bf16.mxu0 %v1760_v25  ;;  %1518 = vmatprep.subr.bf16.mxu1 %v1761_v50  ;;  %v1767_v55 = vld [vmem:[%s2487_s4 + $0x3c] sm:$0xff]   ;;  %v813_v0 = vsel %vm811_vm2, %v1768_v56, 0  ;;  %v902_v1 = vsel %vm811_vm2, %v1769_v57, 0  ;;  %v2407_v2 = vld [vmem:[%s2487_s4 + $0x48] sm:$0xff]   ;;  %s1366_s3 = sshll.u32 %s623_s12, 4  ;;  %s1144_s7 = sadd.s32 %s1938_s14, %s1143_s6 }
 0x256   : >> { %1505 = vmatpush3.bf16.msra.mxu0 %v1760_v25  ;;  %1519 = vmatpush3.bf16.msra.mxu1 %v1761_v50  ;;  %v2412_v3 = vld [vmem:[%s2487_s4 + $0x6c] sm:$0xff]   ;;  %s626_s15 = scalar_lea.vmem [#allocation2], %s1366_s3  ;;  %s1359_s8 = sshll.u32 %s1144_s7, 5 }
 0x257   : >> { %1506 = vmatprep.subr.bf16.mxu0 %v1762_v51  ;;  %1520 = vmatprep.subr.bf16.mxu1 %v1763_v27  ;;  %v627_v4 = vld [vmem:[%s626_s15] sm:$0xff]  ;;  %v629_v5 = vld [vmem:[%s626_s15 + $0x10] sm:$0xff]  ;;  %v628_v8 = vld [vmem:[%s626_s15 + $0x8] sm:$0xff]  ;;  %s1162_s1 = sshra.s32 %s1359_s8, 3  ;;  %s620_s14 = sadd.s32 1, %s1938_s14  }
 0x258   : >> { %668 = vperm.xlu1 %1759, %v2318_v40   ;;  %658 = vperm.xlu0 %1758, %v2290_v29   ;;  %v631_v6 = vld [vmem:[%s626_s15 + $0x20] sm:$0xff]  ;;  %v633_v7 = vld [vmem:[%s626_s15 + $0x30] sm:$0xff]  ;;  %v630_v9 = vld [vmem:[%s626_s15 + $0x18] sm:$0xff]  ;;  %v635_v13 = vunpack.c.l.bf16 %v627_v4  ;;  %v639_v14 = vunpack.c.l.bf16 %v629_v5  ;;  %v637_v18 = vunpack.c.l.bf16 %v628_v8  ;;  %v636_v21 = vunpack.c.h.bf16 %v627_v4  ;;  %s1364_s9 = sshll.u32 %s1162_s1, 2  ;;  %p617_p2 = scmp.ge.s32.totalorder %s620_s14, 14  }
 0x259   : >> { %v632_v10 = vld [vmem:[%s626_s15 + $0x28] sm:$0xff]  ;;  %v643_v15 = vunpack.c.l.bf16 %v631_v6  ;;  %v634_v16 = vld [vmem:[%s626_s15 + $0x38] sm:$0xff]  ;;  %v647_v17 = vunpack.c.l.bf16 %v633_v7  ;;  %v641_v19 = vunpack.c.l.bf16 %v630_v9  ;;  %v640_v22 = vunpack.c.h.bf16 %v629_v5  ;;  %s1165_s2 = scalar_lea.vmem %s2488_s5, %s1364_s9  ;;  %s614_s13 = sadd.s32 (%p617_p2), 1, %s1934_s13  }
 0x25a   : >> { %1507 = vmatpush3.bf16.msra.mxu0 %v1762_v51  ;;  %1521 = vmatpush3.bf16.msra.mxu1 %v1763_v27  ;;  %v645_v20 = vunpack.c.l.bf16 %v632_v10  ;;  %v644_v23 = vunpack.c.h.bf16 %v631_v6  ;;  %v648_v24 = vunpack.c.h.bf16 %v633_v7  ;;  %v638_v59 = vunpack.c.h.bf16 %v628_v8  ;;  %p611_p3 = scmp.ge.s32.totalorder (%p617_p2), %s614_s13, 2  }
 0x25b   : >> { %1508 = vmatprep.subr.bf16.mxu0 %v1764_v52  ;;  %1522 = vmatprep.subr.bf16.mxu1 %v1765_v53  ;;  %v642_v60 = vunpack.c.h.bf16 %v630_v9  ;;  %v646_v61 = vunpack.c.h.bf16 %v632_v10  ;;  %v649_v62 = vunpack.c.l.bf16 %v634_v16  ;;  %v650_v35 = vunpack.c.h.bf16 %v634_v16 }
 0x25c   : >> { %694 = vperm.xlu1 %1759, %v606_v39   ;;  %689 = vperm.xlu0 %1758, %v605_v41  }
 0x25e   : >> { %1509 = vmatpush3.bf16.msra.mxu0 %v1764_v52  ;;  %1523 = vmatpush3.bf16.msra.mxu1 %v1765_v53 }
 0x25f   : >> { %1510 = vmatprep.subr.bf16.mxu0 %v1766_v54  ;;  %1524 = vmatprep.subr.bf16.mxu1 %v1767_v55 }
 0x260   : >> { %704 = vperm.xlu1 %1759, %v608_v47   ;;  %699 = vperm.xlu0 %1758, %v607_v48  }
 0x262   : >> { %1511 = vmatpush3.bf16.msra.mxu0 %v1766_v54  ;;  %1525 = vmatpush3.bf16.msra.mxu1 %v1767_v55 }
 0x263   : >> { %1576 = vmatprep.subr.msk.bf16.mxu0 %vm811_vm2, %v1768_v56  ;;  %1577 = vmatprep.subr.msk.bf16.mxu1 %vm811_vm2, %v1769_v57 }
 0x266   : >> { %1513 = vmatpush3.bf16.msra.mxu0 %v813_v0  ;;  %1527 = vmatpush3.bf16.msra.mxu1 %v902_v1 }
 0x267   : >> { %1532 = vmatprep.subr.bf16.mxu0 %v2407_v2  ;;  %1546 = vmatprep.subr.bf16.mxu1 %v2412_v3 }
 0x2d3   : >> { %v664_v11 = vpop.permute.xlu1 %663  ;;  %v654_v12 = vpop.permute.xlu0 %653 }
 0x2d4   : >> { %v671_v63 = vmul.f32 %v654_v12, %v635_v13  ;;  %v675_v28 = vmul.f32 %v654_v12, %v639_v14  ;;  %v679_v32 = vmul.f32 %v654_v12, %v643_v15  ;;  %v683_v36 = vmul.f32 %v654_v12, %v647_v17 }
 0x2d5   : >> { %v673_v38 = vmul.f32 %v664_v11, %v637_v18  ;;  %v677_v49 = vmul.f32 %v664_v11, %v641_v19  ;;  %v681_v25 = vmul.f32 %v664_v11, %v645_v20  ;;  %v685_v0 = vmul.f32 %v664_v11, %v649_v62 }
 0x2d7   : >> { %v669_v26 = vpop.permute.xlu1 %668  ;;  %v659_v58 = vpop.permute.xlu0 %658 }
 0x2d8   : >> { %v672_v50 = vmul.f32 %v659_v58, %v636_v21  ;;  %v676_v51 = vmul.f32 %v659_v58, %v640_v22  ;;  %v680_v27 = vmul.f32 %v659_v58, %v644_v23  ;;  %v684_v52 = vmul.f32 %v659_v58, %v648_v24 }
 0x2d9   : >> { %v674_v55 = vmul.f32 %v669_v26, %v638_v59  ;;  %v678_v56 = vmul.f32 %v669_v26, %v642_v60  ;;  %v682_v57 = vmul.f32 %v669_v26, %v646_v61  ;;  %v686_v20 = vmul.f32 %v669_v26, %v650_v35 }
 0x2db   : >> { %v695_v53 = vpop.permute.xlu1 %694  ;;  %v690_v54 = vpop.permute.xlu0 %689 }
 0x2dc   : >> { %v708_v1 = vadd.f32 %v695_v53, %v672_v50  ;;  %v712_v4 = vadd.f32 %v695_v53, %v676_v51  ;;  %v716_v5 = vadd.f32 %v695_v53, %v680_v27  ;;  %v720_v6 = vadd.f32 %v695_v53, %v684_v52 }
 0x2dd   : >> { %v707_v7 = vadd.f32 %v690_v54, %v671_v63  ;;  %v711_v8 = vadd.f32 %v690_v54, %v675_v28  ;;  %v715_v9 = vadd.f32 %v690_v54, %v679_v32  ;;  %v719_v10 = vadd.f32 %v690_v54, %v683_v36 }
 0x2de   : >> { %v724_v12 = vmax.f32 %v708_v1, 0.0  ;;  %v728_v13 = vmax.f32 %v712_v4, 0.0  ;;  %v732_v14 = vmax.f32 %v716_v5, 0.0  ;;  %v736_v15 = vmax.f32 %v720_v6, 0.0 }
 0x2df   : >> { %v723_v16 = vmax.f32 %v707_v7, 0.0  ;;  %v727_v17 = vmax.f32 %v711_v8, 0.0  ;;  %v731_v18 = vmax.f32 %v715_v9, 0.0  ;;  %v705_v19 = vpop.permute.xlu1 %704  ;;  %v735_v23 = vmax.f32 %v719_v10, 0.0  ;;  %v700_v24 = vpop.permute.xlu0 %699 }
 0x2e0   : >> { %v746_v21 = vsel %vm525_vm1, %v724_v12, -inf  ;;  %v747_v11 = vsel %vm525_vm1, %v728_v13, -inf  ;;  %v749_v22 = vsel %vm525_vm1, %v732_v14, -inf  ;;  %v751_v59 = vsel %vm525_vm1, %v736_v15, -inf }
 0x2e1   : >> { %v748_v58 = vmax.f32 %v746_v21, %v747_v11  ;;  %v739_v60 = vsel %vm525_vm1, %v723_v16, -inf  ;;  %v740_v61 = vsel %vm525_vm1, %v727_v17, -inf  ;;  %v742_v63 = vsel %vm525_vm1, %v731_v18, -inf }
 0x2e2   : >> { %v741_v62 = vmax.f32 %v739_v60, %v740_v61  ;;  %v710_v28 = vadd.f32 %v705_v19, %v674_v55  ;;  %v714_v26 = vadd.f32 %v705_v19, %v678_v56  ;;  %v718_v35 = vadd.f32 %v705_v19, %v682_v57  ;;  %v1779_v60 = vld [vmem:[%s2487_s4 + $0x8c] ss:$0 sps:$4 sm:$0xff]  }
 0x2e3   : >> { %v750_v32 = vmax.f32 %v748_v58, %v749_v22  ;;  %v722_v36 = vadd.f32 %v705_v19, %v686_v20  ;;  %v709_v50 = vadd.f32 %v700_v24, %v673_v38  ;;  %v713_v53 = vadd.f32 %v700_v24, %v677_v49  ;;  %v1772_v22 = vld [vmem:[%s2487_s4 + $0x50] sm:$0xff]   ;;  %v1775_v58 = vld [vmem:[%s2487_s4 + $0x7c] sm:$0xff]  }
 0x2e4   : >> { %v743_v51 = vmax.f32 %v741_v62, %v742_v63  ;;  %v726_v27 = vmax.f32 %v710_v28, 0.0  ;;  %v730_v52 = vmax.f32 %v714_v26, 0.0  ;;  %v744_v1 = vsel %vm525_vm1, %v735_v23, -inf  ;;  %v1773_v23 = vld [vmem:[%s2487_s4 + $0x74] sm:$0xff]  }
 0x2e5   : >> { %v752_v54 = vmax.f32 %v750_v32, %v751_v59  ;;  %v734_v4 = vmax.f32 %v718_v35, 0.0  ;;  %v717_v5 = vadd.f32 %v700_v24, %v681_v25  ;;  %v721_v55 = vadd.f32 %v700_v24, %v685_v0  ;;  %v1774_v24 = vld [vmem:[%s2487_s4 + $0x58] sm:$0xff]   ;;  %v1778_v59 = vld [vmem:[%s2487_s4 + $0x68] ss:$0 sps:$4 sm:$0xff]  }
 0x2e6   : >> { %v745_v6 = vmax.f32 %v743_v51, %v744_v1  ;;  %v760_v7 = vsel %vm525_vm1, %v726_v27, -inf  ;;  %v761_v8 = vsel %vm525_vm1, %v730_v52, -inf  ;;  %v738_v56 = vmax.f32 %v722_v36, 0.0 }
 0x2e7   : >> { %v762_v9 = vmax.f32 %v760_v7, %v761_v8  ;;  %v725_v57 = vmax.f32 %v709_v50, 0.0  ;;  %v763_v38 = vsel %vm525_vm1, %v734_v4, -inf  ;;  %v729_v10 = vmax.f32 %v713_v53, 0.0 }
 0x2e8   : >> { %v733_v12 = vmax.f32 %v717_v5, 0.0  ;;  %v767_v13 = vpack.c.bf16 %v752_v54, %v745_v6  ;;  %v737_v15 = vmax.f32 %v721_v55, 0.0  ;;  %v765_v0 = vsel %vm525_vm1, %v738_v56, -inf }
 0x2e9   : >> { %v764_v49 = vmax.f32 %v762_v9, %v763_v38  ;;  %v753_v14 = vsel %vm525_vm1, %v725_v57, -inf  ;;  %v754_v25 = vsel %vm525_vm1, %v729_v10, -inf  ;;  %v995_v61 = vsel %vm811_vm2, %v1778_v59, 0 }
 0x2ea   : >> { %1514 = vmatprep.mubr.msk.bf16.mxu0 %vm525_vm1, %v767_v13  ;;  %1528 = vmatprep.mubr.msk.bf16.mxu1 %vm525_vm1, %v767_v13  ;;  %v755_v16 = vmax.f32 %v753_v14, %v754_v25  ;;  %v756_v17 = vsel %vm525_vm1, %v733_v12, -inf  ;;  %v758_v20 = vsel %vm525_vm1, %v737_v15, -inf  ;;  %v1088_v62 = vsel %vm811_vm2, %v1779_v60, 0 }
 0x2eb   : >> { %v766_v18 = vmax.f32 %v764_v49, %v765_v0 }
 0x2ec   : >> { %v757_v19 = vmax.f32 %v755_v16, %v756_v17 }
 0x2ee   : >> { %v759_v21 = vmax.f32 %v757_v19, %v758_v20 }
 0x2f0   : >> { %v768_v11 = vpack.c.bf16 %v766_v18, %v759_v21 }
 0x2f2   : >> { %1515 = vmatmul.mubr.msk.bf16.vlgmr.msra.gmra.mrb[0].mxu0 %vm525_vm1, %v768_v11  ;;  %1529 = vmatmul.mubr.msk.bf16.vlgmr.msra.gmra.mrb[0].mxu1 %vm525_vm1, %v768_v11 }
 0x2f3   : >> { %1533 = vmatpush3.bf16.msra.mxu0 %v2407_v2  ;;  %1547 = vmatpush3.bf16.msra.mxu1 %v2412_v3  ;;  %v1776_v2 = vld [vmem:[%s2487_s4 + $0x60] sm:$0xff]  }
 0x2f4   : >> { %1542 = vmatprep.mubr.msk.bf16.mxu0 %vm525_vm1, %v767_v13  ;;  %1556 = vmatprep.mubr.msk.bf16.mxu1 %vm525_vm1, %v767_v13  ;;  %v1777_v3 = vld [vmem:[%s2487_s4 + $0x84] sm:$0xff]  }
 0x2f5   : >> { %1534 = vmatprep.subr.bf16.mxu0 %v1772_v22  ;;  %1548 = vmatprep.subr.bf16.mxu1 %v1773_v23 }
 0x2f7   : >> { %1535 = vmatpush3.bf16.msra.mxu0 %v1772_v22  ;;  %1549 = vmatpush3.bf16.msra.mxu1 %v1773_v23 }
 0x2f8   : >> { %1536 = vmatprep.subr.bf16.mxu0 %v1774_v24  ;;  %1550 = vmatprep.subr.bf16.mxu1 %v1775_v58 }
 0x2fb   : >> { %1537 = vmatpush3.bf16.msra.mxu0 %v1774_v24  ;;  %1551 = vmatpush3.bf16.msra.mxu1 %v1775_v58 }
 0x2fc   : >> { %1538 = vmatprep.subr.bf16.mxu0 %v1776_v2  ;;  %1552 = vmatprep.subr.bf16.mxu1 %v1777_v3 }
 0x2ff   : >> { %1539 = vmatpush3.bf16.msra.mxu0 %v1776_v2  ;;  %1553 = vmatpush3.bf16.msra.mxu1 %v1777_v3 }
 0x300   : >> { %1578 = vmatprep.subr.msk.bf16.mxu0 %vm811_vm2, %v1778_v59  ;;  %1579 = vmatprep.subr.msk.bf16.mxu1 %vm811_vm2, %v1779_v60 }
 0x303   : >> { %1541 = vmatpush3.bf16.msra.mxu0 %v995_v61  ;;  %1555 = vmatpush3.bf16.msra.mxu1 %v1088_v62 }
 0x306   : >> { %1543 = vmatmul.mubr.msk.bf16.vlgmr.msra.gmra.mrb[4].mxu0 %vm525_vm1, %v768_v11  ;;  %1557 = vmatmul.mubr.msk.bf16.vlgmr.msra.gmra.mrb[4].mxu1 %vm525_vm1, %v768_v11 }
 0x3c5   : >> { %v1516_v63 = vpop.f32.mrb[0].mxu0  ;;  %v1530_v28 = vpop.f32.mrb[0].mxu1 }
 0x3c6   : >> { %v955_v26 = vmax.f32 %v1516_v63, %v1530_v28  ;;  %v849_v32 = vpop.f32.mrb[1].mxu0  ;;  %v938_v35 = vpop.f32.mrb[1].mxu1 }
 0x3c7   : >> { %v953_v36 = vmax.f32 %v849_v32, %v938_v35  ;;  %v1517_v50 = vpop.f32.mrb[2].mxu0  ;;  %v1531_v51 = vpop.f32.mrb[2].mxu1 }
 0x3c8   : >> { %v956_v27 = vmax.f32 %v1517_v50, %v1531_v51  ;;  %v852_v52 = vpop.f32.mrb[3].mxu0  ;;  %v941_v53 = vpop.f32.mrb[3].mxu1 }
 0x3c9   : >> { %v954_v54 = vmax.f32 %v852_v52, %v941_v53 }
 0x3d9   : >> { %v1544_v1 = vpop.f32.mrb[4].mxu0  ;;  %v1558_v4 = vpop.f32.mrb[4].mxu1 }
 0x3da   : >> { %v1048_v5 = vmax.f32 %v955_v26, %v1544_v1  ;;  %v1031_v6 = vpop.f32.mrb[5].mxu0  ;;  %v1124_v7 = vpop.f32.mrb[5].mxu1 }
 0x3db   : >> { %v1046_v8 = vmax.f32 %v953_v36, %v1031_v6  ;;  %v1545_v55 = vpop.f32.mrb[6].mxu0  ;;  %v1559_v56 = vpop.f32.mrb[6].mxu1 }
 0x3dc   : >> { %v1141_v9 = vmax.f32 %v1048_v5, %v1558_v4  ;;  %v1049_v57 = vmax.f32 %v956_v27, %v1545_v55  ;;  %v1034_v38 = vpop.f32.mrb[7].mxu0  ;;  %v1127_v10 = vpop.f32.mrb[7].mxu1 }
 0x3dd   : >> { %v1139_v12 = vmax.f32 %v1046_v8, %v1124_v7  ;;  %v1047_v13 = vmax.f32 %v954_v54, %v1034_v38  ;;  %619 = sbr.rel (!%p617_p2) target bundleno = 594 (0x252), region = 101 }
 0x3de   : >> { %v1369_v49 = vpack.c.bf16 %v1141_v9, %v1141_v9  ;;  %v1142_v14 = vmax.f32 %v1049_v57, %v1559_v56 }
 0x3df   : >> { %v1367_v15 = vpack.c.bf16 %v1139_v12, %v1139_v12  ;;  %v1140_v25 = vmax.f32 %v1047_v13, %v1127_v10 }
 0x3e0   : >> { %1169 = vst.msk [vmem:[%s1165_s2 + $0x8] sm:$0xf] %vm1166_vm3, %v1369_v49  ;;  %v1370_v16 = vpack.c.bf16 %v1142_v14, %v1142_v14 }
 0x3e1   : >> { %1167 = vst.msk [vmem:[%s1165_s2] sm:$0xf] %vm1166_vm3, %v1367_v15  ;;  %v1368_v0 = vpack.c.bf16 %v1140_v25, %v1140_v25 }
 0x3e2   : >> { %1170 = vst.msk [vmem:[%s1165_s2 + $0xc] sm:$0xf] %vm1166_vm3, %v1370_v16 }
 0x3e3   : >> { %1168 = vst.msk [vmem:[%s1165_s2 + $0x4] sm:$0xf] %vm1166_vm3, %v1368_v0 }
 0x3e4   :  { %613 = sbr.rel (!%p611_p3) target bundleno = 593 (0x251), region = 112 }

// kernel: cnn_bn_vo_forward.6
= control target key start
LH: loop header
LB: loop body
LE: loop exit
PB: predicated region body
PF: predicated region fallthrough
CT: control target
= control target key end

     0   :  { %v2606_v0 = vmov 0.0   ;;  %v2608_v1 = vmov 0.0   ;;  %v2610_v2 = vmov 0.0   ;;  %v2612_v3 = vmov 0.0   ;;  %s2638_s18 = smov 0   ;;  %s3524_s0 = inlined_call_operand.vmem [shape: bf16[1152,22], index: 0, kind: input, shape index: {}]   ;;  %s3525_s1 = inlined_call_operand.vmem [shape: bf16[5,64,160], index: 1, kind: input, shape index: {}]   ;;  %s3526_s2 = inlined_call_operand.vmem [shape: f32[64,1], index: 2, kind: input, shape index: {}]   ;;  %s3527_s3 = inlined_call_operand.vmem [shape: f32[64,1], index: 3, kind: input, shape index: {}]   ;;  %s3528_s4 = inlined_call_operand.vmem [shape: bf16[2,18,9], index: 4, kind: input, shape index: {}]   ;;  %s3529_s5 = inlined_call_operand.vmem [shape: bf16[896,9], index: 5, kind: output, shape index: {}]  }
   0x1   :  { %v2614_v4 = vmov 0.0   ;;  %v2616_v5 = vmov 0.0   ;;  %v2618_v6 = vmov 0.0   ;;  %v2620_v7 = vmov 0.0  }
   0x2   :  { %v2622_v8 = vmov 0.0   ;;  %v2624_v9 = vmov 0.0   ;;  %v2626_v10 = vmov 0.0   ;;  %v2628_v11 = vmov 0.0  }
   0x3   :  { %v2630_v12 = vmov 0.0   ;;  %v2632_v13 = vmov 0.0   ;;  %v2634_v14 = vmov 0.0   ;;  %v2636_v15 = vmov 0.0  }
   0x4 LB: > { %s43_s19 = smul.u32 576, %s2492_s18  ;;  %s2692_s20 = smov 0   ;;  %s2492_s18 = sphi %s2638_s18, %s26_s18   ;;  %v2488_v15 = vphi %v2636_v15, %v3576_v15   ;;  %v2484_v14 = vphi %v2634_v14, %v3575_v14   ;;  %v2480_v13 = vphi %v2632_v13, %v3574_v13   ;;  %v2476_v12 = vphi %v2630_v12, %v3573_v12   ;;  %v2472_v11 = vphi %v2628_v11, %v3572_v11   ;;  %v2468_v10 = vphi %v2626_v10, %v3571_v10   ;;  %v2464_v9 = vphi %v2624_v9, %v3570_v9   ;;  %v2460_v8 = vphi %v2622_v8, %v3569_v8   ;;  %v2456_v7 = vphi %v2620_v7, %v3568_v7   ;;  %v2452_v6 = vphi %v2618_v6, %v3567_v6   ;;  %v2448_v5 = vphi %v2616_v5, %v3566_v5   ;;  %v2444_v4 = vphi %v2614_v4, %v3565_v4   ;;  %v2440_v3 = vphi %v2612_v3, %v3564_v3   ;;  %v2436_v2 = vphi %v2610_v2, %v3563_v2   ;;  %v2432_v1 = vphi %v2608_v1, %v3562_v1   ;;  %v2428_v0 = vphi %v2606_v0, %v3561_v0  }
   0x5 LB: >> { %v2570_v16 = vmov 0   ;;  %s1642_s21 = sshll.u32 %s2560_s20, 5  ;;  %s2571_s28 = smov 127   ;;  %v2202_v24 = vld [vmem:[%s3525_s1 + $0x44] ss:$8 sps:$4 sm:$0xff]   ;;  %vm225_vm0 = vcmask 261120   ;;  %s2560_s20 = sphi %s2692_s20, %s49_s20   ;;  %v2556_v15 = vphi %v2488_v15, %v3559_v15   ;;  %v2552_v14 = vphi %v2484_v14, %v3558_v14   ;;  %v2548_v13 = vphi %v2480_v13, %v3557_v13   ;;  %v2544_v12 = vphi %v2476_v12, %v3556_v12   ;;  %v2540_v11 = vphi %v2472_v11, %v3555_v11   ;;  %v2536_v10 = vphi %v2468_v10, %v3554_v10   ;;  %v2532_v9 = vphi %v2464_v9, %v3553_v9   ;;  %v2528_v8 = vphi %v2460_v8, %v3552_v8   ;;  %v2524_v7 = vphi %v2456_v7, %v3551_v7   ;;  %v2520_v6 = vphi %v2452_v6, %v3550_v6   ;;  %v2516_v5 = vphi %v2448_v5, %v3549_v5   ;;  %v2512_v4 = vphi %v2444_v4, %v3548_v4   ;;  %v2508_v3 = vphi %v2440_v3, %v3547_v3   ;;  %v2504_v2 = vphi %v2436_v2, %v3546_v2   ;;  %v2500_v1 = vphi %v2432_v1, %v3545_v1   ;;  %v2496_v0 = vphi %v2428_v0, %v3544_v0  }
   0x6   : >> { %238 = vmatprep.subr.bf16.mxu1 %v2570_v16  ;;  %513 = vmatprep.subr.bf16.mxu0 %v2570_v16  ;;  %s67_s22 = sadd.s32 %s1642_s21, %s43_s19  ;;  %s2572_s29 = smov 126   ;;  %v2205_v27 = vld [vmem:[%s3525_s1 + $0x84] ss:$8 sps:$4 sm:$0xff]   ;;  %v2200_v48 = vld [vmem:[%s3525_s1 + $0x40] ss:$8 sps:$4 sm:$0xff]   ;;  %vm915_vm1 = vcmask 146432  }
   0x7   : >> { %s68_s23 = sshra.s32 %s67_s22, 3  ;;  %1670 = vmatprep.mubr.msk.bf16.mxu1 %vm225_vm0, %v2202_v24  ;;  %1702 = vmatprep.mubr.msk.bf16.mxu0 %vm225_vm0, %v2205_v27  ;;  %s2573_s9 = smov 125   ;;  %v2206_v50 = vld [vmem:[%s3525_s1 + $0x54] ss:$8 sps:$4 sm:$0xff]   ;;  %v2203_v51 = vld [vmem:[%s3525_s1 + $0x80] ss:$8 sps:$4 sm:$0xff]  }
   0x8   : >> { %s1643_s24 = sshll.u32 %s68_s23, 2  ;;  %s2574_s10 = smov 124   ;;  %v2209_v53 = vld [vmem:[%s3525_s1 + $0x94] ss:$8 sps:$4 sm:$0xff]   ;;  %v2208_v54 = vld [vmem:[%s3525_s1 + $0x50] ss:$8 sps:$4 sm:$0xff]  }
   0x9   : >> { %s2753_s27 = scalar_lea.vmem %s3524_s0, %s1643_s24  ;;  %v2212_v56 = vld [vmem:[%s3525_s1 + $0x64] ss:$8 sps:$4 sm:$0xff]   ;;  %v2211_v57 = vld [vmem:[%s3525_s1 + $0x90] ss:$8 sps:$4 sm:$0xff]   ;;  %v2214_v60 = vld [vmem:[%s3525_s1 + $0x60] ss:$8 sps:$4 sm:$0xff]  }
   0xa   : >> { %v2756_v17 = vld [vmem:[%s2753_s27] sm:$0xff]   ;;  %v2759_v18 = vld [vmem:[%s2753_s27 + $0x8] sm:$0xff]   ;;  %v2768_v19 = vld [vmem:[%s2753_s27 + $0x10] sm:$0xff]   ;;  %s910_s24 = smul.u32 14, %s2492_s18 }
   0xb   : >> { %195 = vrot.lane.b32.xlu0 %v2756_v17, %s2571_s28  ;;  %197 = vrot.lane.b32.xlu1 %v2759_v18, %s2571_s28  ;;  %v2773_v20 = vld [vmem:[%s2753_s27 + $0x18] sm:$0xff]   ;;  %v2780_v21 = vld [vmem:[%s2753_s27 + $0x20] sm:$0xff]  }
   0xc   : >> { %v2789_v22 = vld [vmem:[%s2753_s27 + $0x28] sm:$0xff]   ;;  %v2796_v23 = vld [vmem:[%s2753_s27 + $0x30] sm:$0xff]   ;;  %v2806_v25 = vld [vmem:[%s2753_s27 + $0x38] sm:$0xff]   ;;  %s911_s25 = sadd.s32 %s2560_s20, %s910_s24  ;;  %s49_s20 = sadd.s32 1, %s2560_s20  }
   0xd   : >> { %v2814_v26 = vld [vmem:[%s2753_s27 + $0x40] sm:$0xff]   ;;  %v2825_v28 = vld [vmem:[%s2753_s27 + $0x48] sm:$0xff]   ;;  %v2218_v62 = vld [vmem:[%s3525_s1 + $0x74] ss:$8 sps:$4 sm:$0xff]   ;;  %s1776_s26 = sshll.u32 %s911_s25, 5  ;;  %p3114_p0 = scmp.ge.s32.totalorder %s49_s20, 14  }
   0xe   : >> { %v2215_v59 = vld [vmem:[%s3525_s1 + $0xa4] ss:$8 sps:$4 sm:$0xff]   ;;  %v2217_v63 = vld [vmem:[%s3525_s1 + $0xa0] ss:$8 sps:$4 sm:$0xff]   ;;  %v2223_v24 = vld [vmem:[%s3525_s1 + $0xb0] ss:$8 sps:$4 sm:$0xff]  }
   0xf   : >> { %471 = vrot.lane.b32.xlu0 %v2756_v17, %s2572_s29  ;;  %473 = vrot.lane.b32.xlu1 %v2759_v18, %s2572_s29  ;;  %v2229_v27 = vld [vmem:[%s3525_s1 + $0xc4] ss:$8 sps:$4 sm:$0xff]   ;;  %s3068_s27 = scalar_lea.vmem [#allocation2], %s1776_s26  ;;  %s26_s18 = sadd.s32 (%p3114_p0), 1, %s2492_s18  }
  0x10   : > { %p3168_p1 = scmp.ge.s32.totalorder (%p3114_p0), %s26_s18, 2  }
  0x13   : >> { %199 = vrot.lane.b32.xlu0 %v2768_v19, %s2571_s28  ;;  %475 = vrot.lane.b32.xlu1 %v2768_v19, %s2572_s29 }
  0x17   : >> { %201 = vrot.lane.b32.xlu0 %v2773_v20, %s2571_s28  ;;  %477 = vrot.lane.b32.xlu1 %v2773_v20, %s2572_s29 }
  0x1b   : >> { %203 = vrot.lane.b32.xlu0 %v2780_v21, %s2571_s28  ;;  %479 = vrot.lane.b32.xlu1 %v2780_v21, %s2572_s29 }
  0x1f   : >> { %205 = vrot.lane.b32.xlu0 %v2789_v22, %s2571_s28  ;;  %481 = vrot.lane.b32.xlu1 %v2789_v22, %s2572_s29 }
  0x23   : >> { %207 = vrot.lane.b32.xlu0 %v2796_v23, %s2571_s28  ;;  %483 = vrot.lane.b32.xlu1 %v2796_v23, %s2572_s29 }
  0x27   : >> { %209 = vrot.lane.b32.xlu0 %v2806_v25, %s2571_s28  ;;  %485 = vrot.lane.b32.xlu1 %v2806_v25, %s2572_s29 }
  0x2b   : >> { %211 = vrot.lane.b32.xlu0 %v2814_v26, %s2571_s28  ;;  %487 = vrot.lane.b32.xlu1 %v2814_v26, %s2572_s29 }
  0x2f   : >> { %213 = vrot.lane.b32.xlu0 %v2825_v28, %s2571_s28  ;;  %489 = vrot.lane.b32.xlu1 %v2825_v28, %s2572_s29 }
  0x33   : >> { %631 = vrot.lane.b32.xlu0 %v2756_v17, %s2573_s9  ;;  %633 = vrot.lane.b32.xlu1 %v2759_v18, %s2573_s9 }
  0x37   : >> { %635 = vrot.lane.b32.xlu0 %v2768_v19, %s2573_s9  ;;  %637 = vrot.lane.b32.xlu1 %v2773_v20, %s2573_s9 }
  0x3b   : >> { %639 = vrot.lane.b32.xlu0 %v2780_v21, %s2573_s9  ;;  %641 = vrot.lane.b32.xlu1 %v2789_v22, %s2573_s9 }
  0x3f   : >> { %643 = vrot.lane.b32.xlu0 %v2796_v23, %s2573_s9  ;;  %645 = vrot.lane.b32.xlu1 %v2806_v25, %s2573_s9 }
  0x43   : >> { %647 = vrot.lane.b32.xlu0 %v2814_v26, %s2573_s9  ;;  %649 = vrot.lane.b32.xlu1 %v2825_v28, %s2573_s9 }
  0x47   : >> { %791 = vrot.lane.b32.xlu0 %v2756_v17, %s2574_s10  ;;  %793 = vrot.lane.b32.xlu1 %v2759_v18, %s2574_s10 }
  0x4b   : >> { %795 = vrot.lane.b32.xlu0 %v2768_v19, %s2574_s10  ;;  %797 = vrot.lane.b32.xlu1 %v2773_v20, %s2574_s10 }
  0x4f   : >> { %799 = vrot.lane.b32.xlu0 %v2780_v21, %s2574_s10  ;;  %801 = vrot.lane.b32.xlu1 %v2789_v22, %s2574_s10 }
  0x53   : >> { %803 = vrot.lane.b32.xlu0 %v2796_v23, %s2574_s10  ;;  %805 = vrot.lane.b32.xlu1 %v2806_v25, %s2574_s10 }
  0x57   : >> { %807 = vrot.lane.b32.xlu0 %v2814_v26, %s2574_s10  ;;  %809 = vrot.lane.b32.xlu1 %v2825_v28, %s2574_s10 }
  0x7d   : >> { %v196_v29 = vpop.permute.xlu0 %195  ;;  %v198_v30 = vpop.permute.xlu1 %197 }
  0x7e   : >> { %239 = vmatpush1.bf16.msra.mxu1 %v196_v29 }
  0x7f   : >> { %240 = vmatprep.subr.bf16.mxu1 %v2570_v16 }
  0x81   : >> { %v472_v31 = vpop.permute.xlu0 %471  ;;  %v474_v32 = vpop.permute.xlu1 %473 }
  0x82   : >> { %241 = vmatpush1.bf16.msra.mxu1 %v198_v30  ;;  %514 = vmatpush1.bf16.msra.mxu0 %v472_v31 }
  0x83   : >> { %242 = vmatprep.subr.bf16.mxu1 %v2570_v16  ;;  %515 = vmatprep.subr.bf16.mxu0 %v2570_v16 }
  0x85   : >> { %v200_v33 = vpop.permute.xlu0 %199  ;;  %v476_v34 = vpop.permute.xlu1 %475 }
  0x86   : >> { %243 = vmatpush1.bf16.msra.mxu1 %v200_v33  ;;  %516 = vmatpush1.bf16.msra.mxu0 %v474_v32  ;;  %v2227_v32 = vld [vmem:[%s3525_s1 + $0xc0] ss:$8 sps:$4 sm:$0xff]  }
  0x87   : >> { %244 = vmatprep.subr.bf16.mxu1 %v2570_v16  ;;  %517 = vmatprep.subr.bf16.mxu0 %v2570_v16 }
  0x89   : >> { %v202_v35 = vpop.permute.xlu0 %201  ;;  %v478_v36 = vpop.permute.xlu1 %477 }
  0x8a   : >> { %245 = vmatpush1.bf16.msra.mxu1 %v202_v35  ;;  %518 = vmatpush1.bf16.msra.mxu0 %v476_v34  ;;  %v2232_v34 = vld [vmem:[%s3525_s1 + $0x10] ss:$8 sps:$4 sm:$0xff]  }
  0x8b   : >> { %246 = vmatprep.subr.bf16.mxu1 %v2570_v16  ;;  %519 = vmatprep.subr.bf16.mxu0 %v2570_v16 }
  0x8d   : >> { %v204_v37 = vpop.permute.xlu0 %203  ;;  %v480_v38 = vpop.permute.xlu1 %479 }
  0x8e   : >> { %247 = vmatpush1.bf16.msra.mxu1 %v204_v37  ;;  %520 = vmatpush1.bf16.msra.mxu0 %v478_v36  ;;  %v2236_v36 = vld [vmem:[%s3525_s1 + $0x24] ss:$8 sps:$4 sm:$0xff]   ;;  %v2235_v37 = vld [vmem:[%s3525_s1 + $0xd0] ss:$8 sps:$4 sm:$0xff]  }
  0x8f   : >> { %248 = vmatprep.subr.bf16.mxu1 %v2570_v16  ;;  %521 = vmatprep.subr.bf16.mxu0 %v2570_v16 }
  0x91   : >> { %v206_v39 = vpop.permute.xlu0 %205  ;;  %v482_v40 = vpop.permute.xlu1 %481 }
  0x92   : >> { %249 = vmatpush1.bf16.msra.mxu1 %v206_v39  ;;  %522 = vmatpush1.bf16.msra.mxu0 %v480_v38  ;;  %v2239_v39 = vld [vmem:[%s3525_s1 + $0xe4] ss:$8 sps:$4 sm:$0xff]  }
  0x93   : >> { %250 = vmatprep.subr.bf16.mxu1 %v2570_v16  ;;  %523 = vmatprep.subr.bf16.mxu0 %v2570_v16 }
  0x95   : >> { %v208_v41 = vpop.permute.xlu0 %207  ;;  %v484_v42 = vpop.permute.xlu1 %483 }
  0x96   : >> { %251 = vmatpush1.bf16.msra.mxu1 %v208_v41  ;;  %524 = vmatpush1.bf16.msra.mxu0 %v482_v40  ;;  %v2238_v40 = vld [vmem:[%s3525_s1 + $0x20] ss:$8 sps:$4 sm:$0xff]  }
  0x97   : >> { %252 = vmatprep.subr.bf16.mxu1 %v2570_v16  ;;  %525 = vmatprep.subr.bf16.mxu0 %v2570_v16 }
  0x99   : >> { %v210_v43 = vpop.permute.xlu0 %209  ;;  %v486_v44 = vpop.permute.xlu1 %485 }
  0x9a   : >> { %253 = vmatpush1.bf16.msra.mxu1 %v210_v43  ;;  %526 = vmatpush1.bf16.msra.mxu0 %v484_v42  ;;  %v2242_v42 = vld [vmem:[%s3525_s1 + $0x34] ss:$8 sps:$4 sm:$0xff]   ;;  %v2241_v43 = vld [vmem:[%s3525_s1 + $0xe0] ss:$8 sps:$4 sm:$0xff]  }
  0x9b   : >> { %254 = vmatprep.subr.bf16.mxu1 %v2570_v16  ;;  %527 = vmatprep.subr.bf16.mxu0 %v2570_v16 }
  0x9d   : >> { %v212_v45 = vpop.permute.xlu0 %211  ;;  %v488_v46 = vpop.permute.xlu1 %487 }
  0x9e   : >> { %255 = vmatpush1.bf16.msra.mxu1 %v212_v45  ;;  %528 = vmatpush1.bf16.msra.mxu0 %v486_v44  ;;  %v2245_v45 = vld [vmem:[%s3525_s1 + $0xf4] ss:$8 sps:$4 sm:$0xff]  }
  0x9f   : >> { %256 = vmatprep.subr.bf16.mxu1 %v2570_v16  ;;  %529 = vmatprep.subr.bf16.mxu0 %v2570_v16 }
  0xa1   : >> { %v214_v47 = vpop.permute.xlu0 %213  ;;  %v490_v49 = vpop.permute.xlu1 %489 }
  0xa2   : >> { %257 = vmatpush1.bf16.msra.mxu1 %v214_v47  ;;  %530 = vmatpush1.bf16.msra.mxu0 %v488_v46  ;;  %v2244_v46 = vld [vmem:[%s3525_s1 + $0x30] ss:$8 sps:$4 sm:$0xff]  }
  0xa3   : >> { %361 = vmatprep.subr.bf16.mxu1 %v2570_v16  ;;  %531 = vmatprep.subr.bf16.mxu0 %v2570_v16 }
  0xa5   : >> { %271 = vmatmul.mubr.bf16.vlgmr.msra.gmra.mrb[0].mxu1 %v2200_v48  ;;  %v632_v52 = vpop.permute.xlu0 %631  ;;  %v634_v55 = vpop.permute.xlu1 %633  ;;  %v2250_v48 = vld [vmem:[%s3525_s1 + $0x124] ss:$8 sps:$4 sm:$0xff]  }
  0xa6   : >> { %362 = vmatpush1.bf16.msra.mxu1 %v2756_v17  ;;  %532 = vmatpush1.bf16.msra.mxu0 %v490_v49  ;;  %v2247_v49 = vld [vmem:[%s3525_s1 + $0xf0] ss:$8 sps:$4 sm:$0xff]  }
  0xa7   : >> { %363 = vmatprep.subr.bf16.mxu1 %v2570_v16  ;;  %673 = vmatprep.subr.bf16.mxu0 %v2570_v16 }
  0xa8   : >> { %1671 = vmatprep.mubr.msk.bf16.mxu1 %vm225_vm0, %v2206_v50 }
  0xa9   : >> { %546 = vmatmul.mubr.bf16.vlgmr.msra.gmra.mrb[0].mxu0 %v2203_v51  ;;  %v636_v58 = vpop.permute.xlu0 %635  ;;  %v638_v61 = vpop.permute.xlu1 %637  ;;  %v2253_v51 = vld [vmem:[%s3525_s1 + $0x104] ss:$8 sps:$4 sm:$0xff]  }
  0xaa   : >> { %364 = vmatpush1.bf16.msra.mxu1 %v2759_v18  ;;  %674 = vmatpush1.bf16.msra.mxu0 %v632_v52  ;;  %v2221_v18 = vld [vmem:[%s3525_s1 + $0xb4] ss:$8 sps:$4 sm:$0xff]  }
  0xab   : >> { %365 = vmatprep.subr.bf16.mxu1 %v2570_v16  ;;  %675 = vmatprep.subr.bf16.mxu0 %v2570_v16 }
  0xac   : >> { %1703 = vmatprep.mubr.msk.bf16.mxu0 %vm225_vm0, %v2209_v53 }
  0xad   : >> { %279 = vmatmul.mubr.bf16.gmra.mrb[4].mxu1 %v2208_v54  ;;  %v640_v17 = vpop.permute.xlu0 %639  ;;  %v2248_v54 = vld [vmem:[%s3525_s1 + $0x120] ss:$8 sps:$4 sm:$0xff]  }
  0xae   : >> { %366 = vmatpush1.bf16.msra.mxu1 %v2768_v19  ;;  %676 = vmatpush1.bf16.msra.mxu0 %v634_v55  ;;  %v2220_v19 = vld [vmem:[%s3525_s1 + $0x70] ss:$8 sps:$4 sm:$0xff]   ;;  %v2254_v55 = vld [vmem:[%s3525_s1 + $0x134] ss:$8 sps:$4 sm:$0xff]  }
  0xaf   : >> { %367 = vmatprep.subr.bf16.mxu1 %v2570_v16  ;;  %677 = vmatprep.subr.bf16.mxu0 %v2570_v16 }
  0xb0   : >> { %1672 = vmatprep.mubr.msk.bf16.mxu1 %vm225_vm0, %v2212_v56  ;;  %v2251_v56 = vld [vmem:[%s3525_s1 + $0x100] ss:$8 sps:$4 sm:$0xff]  }
  0xb1   : >> { %554 = vmatmul.mubr.bf16.gmra.mrb[4].mxu0 %v2211_v57  ;;  %v2257_v57 = vld [vmem:[%s3525_s1 + $0x114] ss:$8 sps:$4 sm:$0xff]  }
  0xb2   : >> { %368 = vmatpush1.bf16.msra.mxu1 %v2773_v20  ;;  %678 = vmatpush1.bf16.msra.mxu0 %v636_v58  ;;  %v642_v20 = vpop.permute.xlu1 %641  ;;  %v2256_v58 = vld [vmem:[%s3525_s1 + $0x130] ss:$8 sps:$4 sm:$0xff]  }
  0xb3   : >> { %369 = vmatprep.subr.bf16.mxu1 %v2570_v16  ;;  %679 = vmatprep.subr.bf16.mxu0 %v2570_v16 }
  0xb4   : >> { %1704 = vmatprep.mubr.msk.bf16.mxu0 %vm225_vm0, %v2215_v59 }
  0xb5   : >> { %287 = vmatmul.mubr.bf16.gmra.mrb[8].mxu1 %v2214_v60 }
  0xb6   : >> { %370 = vmatpush1.bf16.msra.mxu1 %v2780_v21  ;;  %680 = vmatpush1.bf16.msra.mxu0 %v638_v61  ;;  %v2226_v21 = vld [vmem:[%s3525_s1 + $0x4] ss:$8 sps:$4 sm:$0xff]   ;;  %v646_v29 = vpop.permute.xlu1 %645 }
  0xb7   : >> { %371 = vmatprep.subr.bf16.mxu1 %v2570_v16  ;;  %681 = vmatprep.subr.bf16.mxu0 %v2570_v16 }
  0xb8   : >> { %1673 = vmatprep.mubr.msk.bf16.mxu1 %vm225_vm0, %v2218_v62 }
  0xb9   : >> { %562 = vmatmul.mubr.bf16.gmra.mrb[8].mxu0 %v2217_v63 }
  0xba   : >> { %372 = vmatpush1.bf16.msra.mxu1 %v2789_v22  ;;  %682 = vmatpush1.bf16.msra.mxu0 %v640_v17  ;;  %v644_v22 = vpop.permute.xlu0 %643  ;;  %v650_v30 = vpop.permute.xlu1 %649 }
  0xbb   : >> { %373 = vmatprep.subr.bf16.mxu1 %v2570_v16  ;;  %683 = vmatprep.subr.bf16.mxu0 %v2570_v16 }
  0xbc   : >> { %1705 = vmatprep.mubr.msk.bf16.mxu0 %vm225_vm0, %v2221_v18 }
  0xbd   : >> { %295 = vmatmul.mubr.bf16.gmra.mrb[12].mxu1 %v2220_v19 }
  0xbe   : >> { %374 = vmatpush1.bf16.msra.mxu1 %v2796_v23  ;;  %684 = vmatpush1.bf16.msra.mxu0 %v642_v20  ;;  %v648_v23 = vpop.permute.xlu0 %647  ;;  %v794_v33 = vpop.permute.xlu1 %793 }
  0xbf   : >> { %375 = vmatprep.subr.bf16.mxu1 %v2570_v16  ;;  %685 = vmatprep.subr.bf16.mxu0 %v2570_v16 }
  0xc0   : >> { %1682 = vmatprep.mubr.msk.bf16.mxu1 %vm225_vm0, %v2226_v21 }
  0xc1   : >> { %570 = vmatmul.mubr.bf16.gmra.mrb[12].mxu0 %v2223_v24 }
  0xc2   : >> { %376 = vmatpush1.bf16.msra.mxu1 %v2806_v25  ;;  %686 = vmatpush1.bf16.msra.mxu0 %v644_v22  ;;  %v2224_v25 = vld [vmem:[%s3525_s1] ss:$8 sps:$4 sm:$0xff]   ;;  %v792_v31 = vpop.permute.xlu0 %791  ;;  %v798_v38 = vpop.permute.xlu1 %797 }
  0xc3   : >> { %377 = vmatprep.subr.bf16.mxu1 %v2570_v16  ;;  %687 = vmatprep.subr.bf16.mxu0 %v2570_v16 }
  0xc4   : >> { %1722 = vmatprep.mubr.msk.bf16.mxu0 %vm225_vm0, %v2229_v27 }
  0xc6   : >> { %378 = vmatpush1.bf16.msra.mxu1 %v2814_v26  ;;  %688 = vmatpush1.bf16.msra.mxu0 %v646_v29  ;;  %v2230_v26 = vld [vmem:[%s3525_s1 + $0x14] ss:$8 sps:$4 sm:$0xff]   ;;  %v796_v35 = vpop.permute.xlu0 %795  ;;  %v802_v44 = vpop.permute.xlu1 %801 }
  0xc7   : >> { %379 = vmatprep.subr.bf16.mxu1 %v2570_v16  ;;  %689 = vmatprep.subr.bf16.mxu0 %v2570_v16 }
  0xca   : >> { %380 = vmatpush1.bf16.msra.mxu1 %v2825_v28  ;;  %690 = vmatpush1.bf16.msra.mxu0 %v648_v23  ;;  %v2233_v28 = vld [vmem:[%s3525_s1 + $0xd4] ss:$8 sps:$4 sm:$0xff]   ;;  %v800_v41 = vpop.permute.xlu0 %799  ;;  %v806_v50 = vpop.permute.xlu1 %805 }
  0xcb   : >> { %691 = vmatprep.subr.bf16.mxu0 %v2570_v16  ;;  %1822 = vmatprep.subr.bf16.mxu1 %v2570_v16 }
  0xcd   : >> { %394 = vmatmul.mubr.bf16.vlgmr.msra.gmra.mrb[0].mxu1 %v2224_v25 }
  0xce   : >> { %692 = vmatpush1.bf16.msra.mxu0 %v650_v30  ;;  %1832 = vmatpush1.bf16.msra.mxu1 %v792_v31  ;;  %v804_v47 = vpop.permute.xlu0 %803  ;;  %v810_v53 = vpop.permute.xlu1 %809 }
  0xcf   : >> { %833 = vmatprep.subr.bf16.mxu0 %v2570_v16  ;;  %1823 = vmatprep.subr.bf16.mxu1 %v2570_v16 }
  0xd0   : >> { %1683 = vmatprep.mubr.msk.bf16.mxu1 %vm225_vm0, %v2230_v26 }
  0xd1   : >> { %706 = vmatmul.mubr.bf16.vlgmr.msra.gmra.mrb[0].mxu0 %v2227_v32 }
  0xd2   : >> { %834 = vmatpush1.bf16.msra.mxu0 %v792_v31  ;;  %1833 = vmatpush1.bf16.msra.mxu1 %v794_v33  ;;  %v808_v52 = vpop.permute.xlu0 %807 }
  0xd3   : >> { %835 = vmatprep.subr.bf16.mxu0 %v2570_v16  ;;  %1824 = vmatprep.subr.bf16.mxu1 %v2570_v16 }
  0xd4   : >> { %1723 = vmatprep.mubr.msk.bf16.mxu0 %vm225_vm0, %v2233_v28 }
  0xd5   : >> { %402 = vmatmul.mubr.bf16.gmra.mrb[4].mxu1 %v2232_v34 }
  0xd6   : >> { %836 = vmatpush1.bf16.msra.mxu0 %v794_v33  ;;  %1834 = vmatpush1.bf16.msra.mxu1 %v796_v35 }
  0xd7   : >> { %837 = vmatprep.subr.bf16.mxu0 %v2570_v16  ;;  %1825 = vmatprep.subr.bf16.mxu1 %v2570_v16 }
  0xd8   : >> { %1684 = vmatprep.mubr.msk.bf16.mxu1 %vm225_vm0, %v2236_v36 }
  0xd9   : >> { %714 = vmatmul.mubr.bf16.gmra.mrb[4].mxu0 %v2235_v37 }
  0xda   : >> { %838 = vmatpush1.bf16.msra.mxu0 %v796_v35  ;;  %1835 = vmatpush1.bf16.msra.mxu1 %v798_v38 }
  0xdb   : >> { %839 = vmatprep.subr.bf16.mxu0 %v2570_v16  ;;  %1826 = vmatprep.subr.bf16.mxu1 %v2570_v16 }
  0xdc   : >> { %1724 = vmatprep.mubr.msk.bf16.mxu0 %vm225_vm0, %v2239_v39 }
  0xdd   : >> { %410 = vmatmul.mubr.bf16.gmra.mrb[8].mxu1 %v2238_v40 }
  0xde   : >> { %840 = vmatpush1.bf16.msra.mxu0 %v798_v38  ;;  %1836 = vmatpush1.bf16.msra.mxu1 %v800_v41 }
  0xdf   : >> { %841 = vmatprep.subr.bf16.mxu0 %v2570_v16  ;;  %1827 = vmatprep.subr.bf16.mxu1 %v2570_v16 }
  0xe0   : >> { %1685 = vmatprep.mubr.msk.bf16.mxu1 %vm225_vm0, %v2242_v42 }
  0xe1   : >> { %722 = vmatmul.mubr.bf16.gmra.mrb[8].mxu0 %v2241_v43 }
  0xe2   : >> { %842 = vmatpush1.bf16.msra.mxu0 %v800_v41  ;;  %1837 = vmatpush1.bf16.msra.mxu1 %v802_v44 }
  0xe3   : >> { %843 = vmatprep.subr.bf16.mxu0 %v2570_v16  ;;  %1828 = vmatprep.subr.bf16.mxu1 %v2570_v16 }
  0xe4   : >> { %1725 = vmatprep.mubr.msk.bf16.mxu0 %vm225_vm0, %v2245_v45 }
  0xe5   : >> { %418 = vmatmul.mubr.bf16.gmra.mrb[12].mxu1 %v2244_v46 }
  0xe6   : >> { %844 = vmatpush1.bf16.msra.mxu0 %v802_v44  ;;  %1838 = vmatpush1.bf16.msra.mxu1 %v804_v47 }
  0xe7   : >> { %845 = vmatprep.subr.bf16.mxu0 %v2570_v16  ;;  %1829 = vmatprep.subr.bf16.mxu1 %v2570_v16 }
  0xe8   : >> { %1744 = vmatprep.mubr.msk.bf16.mxu1 %vm225_vm0, %v2250_v48 }
  0xe9   : >> { %730 = vmatmul.mubr.bf16.gmra.mrb[12].mxu0 %v2247_v49 }
  0xea   : >> { %846 = vmatpush1.bf16.msra.mxu0 %v804_v47  ;;  %1839 = vmatpush1.bf16.msra.mxu1 %v806_v50 }
  0xeb   : >> { %847 = vmatprep.subr.bf16.mxu0 %v2570_v16  ;;  %1830 = vmatprep.subr.bf16.mxu1 %v2570_v16 }
  0xec   : >> { %1742 = vmatprep.mubr.msk.bf16.mxu0 %vm225_vm0, %v2253_v51 }
  0xee   : >> { %848 = vmatpush1.bf16.msra.mxu0 %v806_v50  ;;  %1840 = vmatpush1.bf16.msra.mxu1 %v808_v52 }
  0xef   : >> { %849 = vmatprep.subr.bf16.mxu0 %v2570_v16  ;;  %1831 = vmatprep.subr.bf16.mxu1 %v2570_v16 }
  0xf2   : >> { %850 = vmatpush1.bf16.msra.mxu0 %v808_v52  ;;  %1841 = vmatpush1.bf16.msra.mxu1 %v810_v53 }
  0xf3   : >> { %851 = vmatprep.subr.bf16.mxu0 %v2570_v16  ;;  %v2259_v16 = vld [vmem:[%s3525_s1 + $0x110] ss:$8 sps:$4 sm:$0xff]  }
  0xf5   : >> { %882 = vmatmul.mubr.bf16.vlgmr.msra.gmra.mrb[16].mxu1 %v2248_v54 }
  0xf6   : >> { %852 = vmatpush1.bf16.msra.mxu0 %v810_v53  ;;  %1745 = vmatprep.mubr.msk.bf16.mxu1 %vm225_vm0, %v2254_v55 }
  0xf9   : >> { %866 = vmatmul.mubr.bf16.vlgmr.msra.gmra.mrb[0].mxu0 %v2251_v56 }
  0xfa   : >> { %1743 = vmatprep.mubr.msk.bf16.mxu0 %vm225_vm0, %v2257_v57 }
  0xfd   : >> { %890 = vmatmul.mubr.bf16.gmra.mrb[20].mxu1 %v2256_v58 }
 0x101   : >> { %874 = vmatmul.mubr.bf16.gmra.mrb[4].mxu0 %v2259_v16 }
 0x1a0   : >> { %v395_v59 = vpop.f32.mrb[0].mxu1 }
 0x1a1   : >> { %v397_v60 = vpop.f32.mrb[1].mxu1 }
 0x1a2   : >> { %v398_v61 = vpop.f32.mrb[2].mxu1 }
 0x1a3   : >> { %v400_v62 = vpop.f32.mrb[3].mxu1 }
 0x1a8   : >> { %v3053_v63 = vpop.f32.mrb[4].mxu1 }
 0x1a9   : >> { %v405_v17 = vpop.f32.mrb[5].mxu1 }
 0x1aa   : >> { %v3055_v18 = vpop.f32.mrb[6].mxu1 }
 0x1ab   : >> { %v408_v19 = vpop.f32.mrb[7].mxu1 }
 0x1b0   : >> { %v411_v20 = vpop.f32.mrb[8].mxu1 }
 0x1b1   : >> { %v413_v21 = vpop.f32.mrb[9].mxu1 }
 0x1b2   : >> { %v414_v24 = vpop.f32.mrb[10].mxu1 }
 0x1b3   : >> { %v416_v22 = vpop.f32.mrb[11].mxu1 }
 0x1b4   : >> { %v723_v27 = vpop.f32.mrb[8].mxu0 }
 0x1b5   : >> { %v1846_v29 = vadd.f32 %v723_v27, %v411_v20  ;;  %v725_v23 = vpop.f32.mrb[9].mxu0 }
 0x1b6   : >> { %v726_v25 = vpop.f32.mrb[10].mxu0 }
 0x1b7   : >> { %v1848_v30 = vadd.f32 %v726_v25, %v414_v24  ;;  %v728_v31 = vpop.f32.mrb[11].mxu0 }
 0x1b8   : >> { %v419_v26 = vpop.f32.mrb[12].mxu1 }
 0x1b9   : >> { %v421_v32 = vpop.f32.mrb[13].mxu1 }
 0x1ba   : >> { %v422_v33 = vpop.f32.mrb[14].mxu1 }
 0x1bb   : >> { %v424_v28 = vpop.f32.mrb[15].mxu1 }
 0x1bc   : >> { %v731_v34 = vpop.f32.mrb[12].mxu0 }
 0x1bd   : >> { %v1850_v35 = vadd.f32 %v731_v34, %v419_v26  ;;  %v733_v36 = vpop.f32.mrb[13].mxu0 }
 0x1be   : >> { %v734_v37 = vpop.f32.mrb[14].mxu0 }
 0x1bf   : >> { %v1852_v38 = vadd.f32 %v734_v37, %v422_v33  ;;  %v736_v39 = vpop.f32.mrb[15].mxu0 }
 0x1c8   : >> { %v883_v40 = vpop.f32.mrb[16].mxu1 }
 0x1c9   : >> { %v1847_v41 = vadd.f32 %v1846_v29, %v883_v40  ;;  %v885_v42 = vpop.f32.mrb[17].mxu1 }
 0x1ca   : >> { %v886_v43 = vpop.f32.mrb[18].mxu1 }
 0x1cb   : >> { %v3060_v11 = vadd.f32 %v2540_v11, %v1847_v41   ;;  %v932_v45 = vmul.f32 %v1847_v41, %v1847_v41  ;;  %v1849_v46 = vadd.f32 %v1848_v30, %v886_v43  ;;  %v888_v47 = vpop.f32.mrb[19].mxu1 }
 0x1cc   : >> { %v867_v48 = vpop.f32.mrb[0].mxu0 }
 0x1cd   : >> { %v3530_v44 = vmov %v3060_v11  ;;  %v3063_v3 = vadd.f32 %v2508_v3, %v932_v45   ;;  %v908_v50 = vpack.c.bf16 %v1849_v46, %v1847_v41  ;;  %v3066_v10 = vadd.f32 %v2536_v10, %v1849_v46   ;;  %v869_v53 = vpop.f32.mrb[1].mxu0 }
 0x1ce   : >> { %v933_v52 = vmul.f32 %v1849_v46, %v1849_v46  ;;  %v1842_v54 = vadd.f32 %v867_v48, %v395_v59  ;;  %v870_v55 = vpop.f32.mrb[2].mxu0 }
 0x1cf   : >> { %v3531_v49 = vmov %v3063_v3  ;;  %v3532_v51 = vmov %v3066_v10  ;;  %918 = vst.msk [vmem:[%s3068_s27 + $0x10] sm:$0xff] %vm915_vm1, %v908_v50  ;;  %v1843_v11 = vadd.f32 %v870_v55, %v398_v61  ;;  %v872_v57 = vpop.f32.mrb[3].mxu0 }
 0x1d0   : >> { %v3073_v2 = vadd.f32 %v2504_v2, %v933_v52   ;;  %v3076_v15 = vadd.f32 %v2556_v15, %v1842_v54   ;;  %v928_v3 = vmul.f32 %v1842_v54, %v1842_v54  ;;  %v891_v10 = vpop.f32.mrb[20].mxu1 }
 0x1d1   : >> { %v906_v16 = vpack.c.bf16 %v1843_v11, %v1842_v54  ;;  %v3079_v14 = vadd.f32 %v2552_v14, %v1843_v11   ;;  %v929_v60 = vmul.f32 %v1843_v11, %v1843_v11  ;;  %v1851_v62 = vadd.f32 %v1850_v35, %v891_v10  ;;  %v893_v17 = vpop.f32.mrb[21].mxu1 }
 0x1d2   : >> { %v3533_v56 = vmov %v3073_v2  ;;  %v3534_v58 = vmov %v3076_v15  ;;  %v3082_v7 = vadd.f32 %v2524_v7, %v928_v3   ;;  %v894_v20 = vpop.f32.mrb[22].mxu1  ;;  %v3547_v3 = vmov %v3531_v49 }
 0x1d3   : >> { %v3535_v59 = vmov %v3079_v14  ;;  %916 = vst.msk [vmem:[%s3068_s27] sm:$0xff] %vm915_vm1, %v906_v16  ;;  %v3087_v6 = vadd.f32 %v2520_v6, %v929_v60   ;;  %v3090_v9 = vadd.f32 %v2532_v9, %v1851_v62   ;;  %v934_v2 = vmul.f32 %v1851_v62, %v1851_v62  ;;  %v896_v24 = vpop.f32.mrb[23].mxu1 }
 0x1d4   : >> { %v3536_v19 = vmov %v3082_v7  ;;  %v1853_v15 = vadd.f32 %v1852_v38, %v894_v20  ;;  %v875_v14 = vpop.f32.mrb[4].mxu0  ;;  %v3554_v10 = vmov %v3532_v51  ;;  %v3555_v11 = vmov %v3530_v44 }
 0x1d5   : >> { %v3537_v61 = vmov %v3087_v6  ;;  %v3538_v21 = vmov %v3090_v9  ;;  %v3093_v1 = vadd.f32 %v2500_v1, %v934_v2   ;;  %v877_v23 = vpop.f32.mrb[5].mxu0  ;;  %v1844_v25 = vadd.f32 %v875_v14, %v3053_v63 }
 0x1d6   : >> { %v909_v27 = vpack.c.bf16 %v1853_v15, %v1851_v62  ;;  %v3096_v8 = vadd.f32 %v2528_v8, %v1853_v15   ;;  %v935_v7 = vmul.f32 %v1853_v15, %v1853_v15  ;;  %v878_v6 = vpop.f32.mrb[6].mxu0  ;;  %v3546_v2 = vmov %v3533_v56 }
 0x1d7   : >> { %v3539_v22 = vmov %v3093_v1  ;;  %v1845_v9 = vadd.f32 %v878_v6, %v3055_v18  ;;  %v880_v31 = vpop.f32.mrb[7].mxu0  ;;  %v922_v26 = vadd.f32 %v2548_v13, %v1844_v25   ;;  %v930_v1 = vmul.f32 %v1844_v25, %v1844_v25  ;;  %48 = sbr.rel (!%p3114_p0) target bundleno = 5 (0x5), region = 77 }
 0x1d8   : >> { %v3540_v29 = vmov %v3096_v8  ;;  %919 = vst.msk [vmem:[%s3068_s27 + $0x18] sm:$0xff] %vm915_vm1, %v909_v27  ;;  %v3102_v0 = vadd.f32 %v2496_v0, %v935_v7   ;;  %v3550_v6 = vmov %v3537_v61  ;;  %v3551_v7 = vmov %v3536_v19 }
 0x1d9   : >> { %v907_v32 = vpack.c.bf16 %v1845_v9, %v1844_v25  ;;  %v923_v33 = vadd.f32 %v2544_v12, %v1845_v9   ;;  %v931_v8 = vmul.f32 %v1845_v9, %v1845_v9  ;;  %v3108_v5 = vadd.f32 %v2516_v5, %v930_v1  }
 0x1da   : >> { %v3541_v30 = vmov %v3102_v0  ;;  %v3545_v1 = vmov %v3539_v22  ;;  %v3553_v9 = vmov %v3538_v21  ;;  %v3557_v13 = vmov %v922_v26 }
 0x1db   : >> { %v3542_v28 = vmov %v3108_v5  ;;  %917 = vst.msk [vmem:[%s3068_s27 + $0x8] sm:$0xff] %vm915_vm1, %v907_v32  ;;  %v939_v63 = vadd.f32 %v2512_v4, %v931_v8   ;;  %v3544_v0 = vmov %v3541_v30  ;;  %v3552_v8 = vmov %v3540_v29 }
 0x1dc   : >> { %v3549_v5 = vmov %v3542_v28  ;;  %v3556_v12 = vmov %v923_v33  ;;  %v3558_v14 = vmov %v3535_v59  ;;  %v3559_v15 = vmov %v3534_v58 }
 0x1dd   : >> { %v3548_v4 = vmov %v939_v63  ;;  %v3561_v0 = vmov (%p3114_p0), %v3541_v30  ;;  %v3562_v1 = vmov (%p3114_p0), %v3539_v22  ;;  %v3563_v2 = vmov (%p3114_p0), %v3533_v56 }
 0x1de   : > { %v3564_v3 = vmov %v3531_v49  ;;  %v3565_v4 = vmov %v939_v63  ;;  %v3566_v5 = vmov %v3542_v28  ;;  %v3567_v6 = vmov %v3537_v61  ;;  %25 = sbr.rel (!%p3168_p1) target bundleno = 4 (0x4), region = 88  ;;  %s3405_s20 = smov (%p3168_p1), 0  }
 0x1df   : > { %v3568_v7 = vmov %v3536_v19  ;;  %v3569_v8 = vmov %v3540_v29  ;;  %v3570_v9 = vmov %v3538_v21  ;;  %v3571_v10 = vmov %v3532_v51 }
 0x1e0   : > { %v3572_v11 = vmov %v3530_v44  ;;  %v3573_v12 = vmov %v923_v33  ;;  %v3574_v13 = vmov %v922_v26  ;;  %v3575_v14 = vmov %v3535_v59 }
 0x1e1   : > { %v3576_v15 = vmov %v3534_v58  ;;  %v951_v18 = vsel (%p3168_p1), %vm915_vm1, %v922_v26, 0.0  ;;  %v945_v34 = vsel (%p3168_p1), %vm915_vm1, %v3534_v58, 0.0  ;;  %v954_v35 = vsel (%p3168_p1), %vm915_vm1, %v923_v33, 0.0 }
 0x1e2   :  { %952 = vadd.xlane.f32.xlu1 (%p3168_p1), %v951_v18  ;;  %946 = vadd.xlane.f32.xlu0 (%p3168_p1), %v945_v34  ;;  %v948_v36 = vsel (%p3168_p1), %vm915_vm1, %v3535_v59, 0.0  ;;  %v960_v37 = vsel (%p3168_p1), %vm915_vm1, %v3532_v51, 0.0  ;;  %v957_v38 = vsel (%p3168_p1), %vm915_vm1, %v3530_v44, 0.0  ;;  %v966_v0 = vsel (%p3168_p1), %vm915_vm1, %v3540_v29, 0.0 }
 0x1e3   :  { %v963_v4 = vsel (%p3168_p1), %vm915_vm1, %v3538_v21, 0.0  ;;  %v980_v5 = vsel (%p3168_p1), %vm915_vm1, %v3537_v61, 0.0  ;;  %v977_v12 = vsel (%p3168_p1), %vm915_vm1, %v3536_v19, 0.0  ;;  %v986_v13 = vsel (%p3168_p1), %vm915_vm1, %v939_v63, 0.0 }
 0x1e4   :  { %v983_v39 = vsel (%p3168_p1), %vm915_vm1, %v3542_v28, 0.0  ;;  %v992_v40 = vsel (%p3168_p1), %vm915_vm1, %v3533_v56, 0.0  ;;  %v989_v41 = vsel (%p3168_p1), %vm915_vm1, %v3531_v49, 0.0  ;;  %v998_v42 = vsel (%p3168_p1), %vm915_vm1, %v3541_v30, 0.0 }
 0x1e5   :  { %v995_v43 = vsel %vm915_vm1, %v3539_v22, 0.0 }
 0x1e6   :  { %955 = vadd.xlane.f32.xlu1 %v954_v35  ;;  %949 = vadd.xlane.f32.xlu0 %v948_v36 }
 0x1ea   :  { %961 = vadd.xlane.f32.xlu1 %v960_v37  ;;  %958 = vadd.xlane.f32.xlu0 %v957_v38  ;;  %v1026_v37 = vld [vmem:[%s3526_s2 + $0x8] sm:$0xff] }
 0x1ee   :  { %967 = vadd.xlane.f32.xlu1 %v966_v0  ;;  %964 = vadd.xlane.f32.xlu0 %v963_v4  ;;  %v1025_v0 = vld [vmem:[%s3526_s2] sm:$0xff] }
 0x1f2   :  { %981 = vadd.xlane.f32.xlu1 %v980_v5  ;;  %978 = vadd.xlane.f32.xlu0 %v977_v12 }
 0x1f6   :  { %987 = vadd.xlane.f32.xlu1 %v986_v13  ;;  %984 = vadd.xlane.f32.xlu0 %v983_v39 }
 0x1fa   :  { %993 = vadd.xlane.f32.xlu1 %v992_v40  ;;  %990 = vadd.xlane.f32.xlu0 %v989_v41  ;;  %v3289_v41 = vld [vmem:[%s3527_s3 + $0x8] sm:$0xff] }
 0x1fe   :  { %999 = vadd.xlane.f32.xlu1 %v998_v42  ;;  %996 = vadd.xlane.f32.xlu0 %v995_v43  ;;  %v1028_v43 = vld [vmem:[%s3526_s2 + $0x18] sm:$0xff] }
 0x26f   :  { %v953_v44 = vpop.xlane.xlu1 %952  ;;  %v947_v45 = vpop.xlane.xlu0 %946 }
 0x270   :  { %v3250_v51 = vmul.f32 0.001984127, %v947_v45  ;;  %v3256_v10 = vmul.f32 0.001984127, %v953_v44  ;;  %v3302_v45 = vld [vmem:[%s3527_s3] sm:$0xff] }
 0x272   :  { %v1009_v54 = vmul.f32 %v3250_v51, %v3250_v51  ;;  %v1011_v15 = vmul.f32 %v3256_v10, %v3256_v10 }
 0x273   :  { %v956_v46 = vpop.xlane.xlu1 %955  ;;  %v950_v47 = vpop.xlane.xlu0 %949 }
 0x274   :  { %v970_v53 = vmul.f32 0.001984127, %v950_v47  ;;  %v3254_v11 = vmul.f32 0.001984127, %v956_v46  ;;  %v1027_v46 = vld [vmem:[%s3526_s2 + $0x10] sm:$0xff] }
 0x276   :  { %v1010_v57 = vmul.f32 %v970_v53, %v970_v53  ;;  %v1012_v20 = vmul.f32 %v3254_v11, %v3254_v11 }
 0x277   :  { %v962_v48 = vpop.xlane.xlu1 %961  ;;  %v959_v50 = vpop.xlane.xlu0 %958 }
 0x278   :  { %v3258_v60 = vmul.f32 0.001984127, %v962_v48  ;;  %v3260_v62 = vmul.f32 0.001984127, %v959_v50 }
 0x27a   :  { %v1014_v22 = vmul.f32 %v3258_v60, %v3258_v60  ;;  %v1013_v25 = vmul.f32 %v3260_v62, %v3260_v62 }
 0x27b   :  { %v968_v52 = vpop.xlane.xlu1 %967  ;;  %v965_v49 = vpop.xlane.xlu0 %964 }
 0x27c   :  { %v3268_v27 = vmul.f32 0.001984127, %v968_v52  ;;  %v3272_v31 = vmul.f32 0.001984127, %v965_v49 }
 0x27e   :  { %v1016_v28 = vmul.f32 %v3268_v27, %v3268_v27  ;;  %v1015_v35 = vmul.f32 %v3272_v31, %v3272_v31 }
 0x27f   :  { %v982_v55 = vpop.xlane.xlu1 %981  ;;  %v979_v56 = vpop.xlane.xlu0 %978 }
 0x280   :  { %v1002_v58 = vmul.f32 0.001984127, %v982_v55  ;;  %v1001_v3 = vmul.f32 0.001984127, %v979_v56 }
 0x282   :  { %v1018_v16 = vsub.f32 %v1002_v58, %v1010_v57  ;;  %v1017_v59 = vsub.f32 %v1001_v3, %v1009_v54  ;;  %v3320_v54 = vld [vmem:[%s3527_s3 + $0x18] sm:$0xff]  ;;  %v3334_v57 = vld [vmem:[%s3527_s3 + $0x10] sm:$0xff]  ;;  %v1029_v58 = vld [vmem:[%s3526_s2 + $0x20] sm:$0xff] }
 0x283   :  { %v988_v17 = vpop.xlane.xlu1 %987  ;;  %v985_v19 = vpop.xlane.xlu0 %984 }
 0x284   :  { %v1034_v61 = vadd.f32 1e-05, %v1018_v16  ;;  %v1033_v21 = vadd.f32 1e-05, %v1017_v59  ;;  %v1004_v2 = vmul.f32 0.001984127, %v988_v17 }
 0x285   :  { %v1003_v24 = vmul.f32 0.001984127, %v985_v19 }
 0x286   :  { %2260 = vrsqrt.f32 %v1034_v61  ;;  %v1020_v14 = vsub.f32 %v1004_v2, %v1012_v20  ;;  %v3352_v20 = vld [vmem:[%s3527_s3 + $0x28] sm:$0xff]  ;;  %v3366_v2 = vld [vmem:[%s3527_s3 + $0x20] sm:$0xff] }
 0x287   :  { %2262 = vrsqrt.f32 %v1033_v21  ;;  %v1019_v29 = vsub.f32 %v1003_v24, %v1011_v15  ;;  %v994_v7 = vpop.xlane.xlu1 %993  ;;  %v991_v23 = vpop.xlane.xlu0 %990  ;;  %v1031_v15 = vld [vmem:[%s3526_s2 + $0x30] sm:$0xff] }
 0x288   :  { %v1036_v6 = vadd.f32 1e-05, %v1020_v14  ;;  %v1006_v30 = vmul.f32 0.001984127, %v994_v7  ;;  %v1005_v9 = vmul.f32 0.001984127, %v991_v23 }
 0x289   :  { %v1035_v26 = vadd.f32 1e-05, %v1019_v29  ;;  %v3384_v23 = vld [vmem:[%s3527_s3 + $0x38] sm:$0xff] }
 0x28a   :  { %2264 = vrsqrt.f32 %v1036_v6  ;;  %v1022_v1 = vsub.f32 %v1006_v30, %v1014_v22  ;;  %v1021_v32 = vsub.f32 %v1005_v9, %v1013_v25  ;;  %v3395_v6 = vld [vmem:[%s3527_s3 + $0x30] sm:$0xff] }
 0x28b   :  { %2266 = vrsqrt.f32 %v1035_v26  ;;  %v1000_v33 = vpop.xlane.xlu1 %999  ;;  %v997_v8 = vpop.xlane.xlu0 %996 }
 0x28c   :  { %v1038_v63 = vadd.f32 1e-05, %v1022_v1  ;;  %v1037_v18 = vadd.f32 1e-05, %v1021_v32  ;;  %v1008_v34 = vmul.f32 0.001984127, %v1000_v33 }
 0x28d   :  { %v1007_v36 = vmul.f32 0.001984127, %v997_v8 }
 0x28e   :  { %2268 = vrsqrt.f32 %v1038_v63  ;;  %v1024_v38 = vsub.f32 %v1008_v34, %v1016_v28 }
 0x28f   :  { %2270 = vrsqrt.f32 %v1037_v18  ;;  %v1023_v4 = vsub.f32 %v1007_v36, %v1015_v35 }
 0x290   :  { %v2261_v5 = vpop.eup %2260  ;;  %v1040_v12 = vadd.f32 1e-05, %v1024_v38 }
 0x291   :  { %v2263_v13 = vpop.eup %2262  ;;  %v3284_v39 = vmul.f32 %v2261_v5, %v1026_v37  ;;  %v1039_v40 = vadd.f32 1e-05, %v1023_v4 }
 0x292   :  { %v3291_v42 = vmul.f32 %v2263_v13, %v1025_v0  ;;  %2272 = vrsqrt.f32 %v1040_v12 }
 0x293   :  { %v3297_v44 = vmul.f32 %v3284_v39, %v970_v53  ;;  %2274 = vrsqrt.f32 %v1039_v40 }
 0x294   :  { %v2265_v47 = vpop.eup %2264  ;;  %v3309_v48 = vmul.f32 %v3291_v42, %v3250_v51  ;;  %v1030_v51 = vld [vmem:[%s3526_s2 + $0x28] sm:$0xff] }
 0x295   :  { %v2267_v50 = vpop.eup %2266  ;;  %v1074_v52 = vsub.f32 %v3289_v41, %v3297_v44  ;;  %v3313_v49 = vmul.f32 %v2265_v47, %v1028_v43 }
 0x296   :  { %v1073_v53 = vsub.f32 %v3302_v45, %v3309_v48  ;;  %v3322_v55 = vmul.f32 %v2267_v50, %v1027_v46 }
 0x297   :  { %v3329_v56 = vmul.f32 %v3313_v49, %v3254_v11 }
 0x298   :  { %v2269_v3 = vpop.eup %2268  ;;  %v3341_v16 = vmul.f32 %v3322_v55, %v3256_v10  ;;  %v1032_v10 = vld [vmem:[%s3526_s2 + $0x38] sm:$0xff] }
 0x299   :  { %v2271_v59 = vpop.eup %2270  ;;  %v1076_v17 = vsub.f32 %v3320_v54, %v3329_v56  ;;  %v3345_v11 = vmul.f32 %v2269_v3, %v1030_v51 }
 0x29a   :  { %v1075_v19 = vsub.f32 %v3334_v57, %v3341_v16  ;;  %v3354_v61 = vmul.f32 %v2271_v59, %v1029_v58 }
 0x29b   :  { %v3361_v21 = vmul.f32 %v3345_v11, %v3258_v60 }
 0x29c   :  { %v2273_v24 = vpop.eup %2272  ;;  %v3373_v14 = vmul.f32 %v3354_v61, %v3260_v62 }
 0x29d   :  { %v2275_v22 = vpop.eup %2274  ;;  %v1078_v29 = vsub.f32 %v3352_v20, %v3361_v21  ;;  %v3377_v60 = vmul.f32 %v2273_v24, %v1032_v10 }
 0x29e   :  { %v1077_v7 = vsub.f32 %v3366_v2, %v3373_v14  ;;  %v3386_v25 = vmul.f32 %v2275_v22, %v1031_v15 }
 0x29f   :  { %v3390_v62 = vmul.f32 %v3377_v60, %v3268_v27 }
 0x2a0   :  { %v3399_v30 = vmul.f32 %v3386_v25, %v3272_v31 }
 0x2a1   :  { %v1080_v9 = vsub.f32 %v3384_v23, %v3390_v62 }
 0x2a2   :  { %v1079_v26 = vsub.f32 %v3395_v6, %v3399_v30 }
 0x2a3 LB: > { %s3410_s30 = smov 0   ;;  %s2564_s20 = sphi %s3405_s20, %s1086_s20  }
 0x2a4 LB: >> { %v2575_v27 = vmov 0   ;;  %v2278_v31 = vld [vmem:[%s3528_s4] sm:$0xff]   ;;  %v2279_v1 = vld [vmem:[%s3528_s4 + $0xc] sm:$0xff]   ;;  %v2280_v32 = vld [vmem:[%s3528_s4 + $0x8] ss:$0 sps:$4 sm:$0x11]   ;;  %s2568_s30 = sphi %s3410_s30, %s1092_s30  }
 0x2a5   : >> { %2277 = vset.pattern.permute.xlu1 %v2575_v27  ;;  %2276 = vset.pattern.permute.xlu0 %v2575_v27  ;;  %vm1303_vm2 = vcmask 1040384   ;;  %v2281_v33 = vld [vmem:[%s3528_s4 + $0x14] ss:$0 sps:$4 sm:$0x11]   ;;  %s1093_s13 = smul.u32 14, %s2564_s20  ;;  %s1748_s14 = sshll.u32 %s2568_s30, 1 }
 0x2a6   : >> { %1135 = vperm.xlu1 %2277, %v3322_v55   ;;  %1125 = vperm.xlu0 %2276, %v3291_v42   ;;  %v1305_v8 = vsel %vm1303_vm2, %v2280_v32, 0  ;;  %v1386_v28 = vsel %vm1303_vm2, %v2281_v33, 0  ;;  %s1461_s21 = smul.u32 7, %s2564_s20  ;;  %vm1500_vm3 = vcmask 68608  }
 0x2a7   : >> { %1798 = vmatprep.subr.bf16.mxu0 %v2278_v31  ;;  %1810 = vmatprep.subr.bf16.mxu1 %v2279_v1  ;;  %s1095_s15 = sadd.s32 %s1748_s14, %s1093_s13 }
 0x2a8   : >> { %1799 = vmatpush3.bf16.msra.mxu0 %v2278_v31  ;;  %1811 = vmatpush3.bf16.msra.mxu1 %v2279_v1  ;;  %s1777_s16 = sshll.u32 %s1095_s15, 5  ;;  %s1462_s22 = sadd.s32 %s2568_s30, %s1461_s21 }
 0x2a9   : >> { %1894 = vmatprep.subr.msk.bf16.mxu0 %vm1303_vm2, %v2280_v32  ;;  %1895 = vmatprep.subr.msk.bf16.mxu1 %vm1303_vm2, %v2281_v33  ;;  %s3461_s17 = scalar_lea.vmem [#allocation2], %s1777_s16  ;;  %s1766_s23 = sshll.u32 %s1462_s22, 6 }
 0x2aa   : >> { %1140 = vperm.xlu1 %2277, %v3313_v49   ;;  %1130 = vperm.xlu0 %2276, %v3284_v39   ;;  %v1099_v34 = vld [vmem:[%s3461_s17] sm:$0xff]  ;;  %v1100_v12 = vld [vmem:[%s3461_s17 + $0x8] sm:$0xff]  ;;  %s1496_s24 = sshra.s32 %s1766_s23, 3  ;;  %s1092_s30 = sadd.s32 1, %s2568_s30  }
 0x2ab   : >> { %v1103_v35 = vld [vmem:[%s3461_s17 + $0x20] sm:$0xff]  ;;  %v1107_v36 = vunpack.c.l.bf16 %v1099_v34  ;;  %v1108_v38 = vunpack.c.h.bf16 %v1099_v34  ;;  %v1104_v13 = vld [vmem:[%s3461_s17 + $0x28] sm:$0xff]  ;;  %v1109_v50 = vunpack.c.l.bf16 %v1100_v12  ;;  %v1110_v58 = vunpack.c.h.bf16 %v1100_v12  ;;  %s1775_s25 = sshll.u32 %s1496_s24, 2  ;;  %p1089_p2 = scmp.ge.s32.totalorder %s1092_s30, 7  }
 0x2ac   : >> { %1801 = vmatpush3.bf16.msra.mxu0 %v1305_v8  ;;  %1813 = vmatpush3.bf16.msra.mxu1 %v1386_v28  ;;  %v1115_v37 = vunpack.c.l.bf16 %v1103_v35  ;;  %v1116_v0 = vunpack.c.h.bf16 %v1103_v35  ;;  %v1117_v51 = vunpack.c.l.bf16 %v1104_v13  ;;  %v1118_v3 = vunpack.c.h.bf16 %v1104_v13  ;;  %s3500_s28 = scalar_lea.vmem %s3529_s5, %s1775_s25  ;;  %s1086_s20 = sadd.s32 (%p1089_p2), 1, %s2564_s20  }
 0x2ad   : > { %p1083_p3 = scmp.ge.s32.totalorder (%p1089_p2), %s1086_s20, 2  }
 0x2ae   : >> { %1186 = vperm.xlu1 %2277, %v1074_v52   ;;  %1181 = vperm.xlu0 %2276, %v1073_v53  }
 0x2b2   : >> { %1196 = vperm.xlu1 %2277, %v1076_v17   ;;  %1191 = vperm.xlu0 %2276, %v1075_v19  }
 0x2b6   : >> { %1150 = vperm.xlu1 %2277, %v3345_v11   ;;  %1145 = vperm.xlu0 %2276, %v3354_v61  }
 0x2ba   : >> { %1160 = vperm.xlu1 %2277, %v3377_v60   ;;  %1155 = vperm.xlu0 %2276, %v3386_v25  }
 0x2be   : >> { %1206 = vperm.xlu1 %2277, %v1078_v29   ;;  %1201 = vperm.xlu0 %2276, %v1077_v7  }
 0x2c2   : >> { %1216 = vperm.xlu1 %2277, %v1080_v9   ;;  %1211 = vperm.xlu0 %2276, %v1079_v26  }
 0x325   : >> { %v1136_v63 = vpop.permute.xlu1 %1135  ;;  %v1126_v18 = vpop.permute.xlu0 %1125 }
 0x326   : >> { %v1163_v40 = vmul.f32 %v1126_v18, %v1107_v36  ;;  %v1171_v43 = vmul.f32 %v1126_v18, %v1115_v37  ;;  %v1165_v8 = vmul.f32 %v1136_v63, %v1109_v50  ;;  %v1173_v28 = vmul.f32 %v1136_v63, %v1117_v51 }
 0x329   : >> { %v1141_v4 = vpop.permute.xlu1 %1140  ;;  %v1131_v5 = vpop.permute.xlu0 %1130 }
 0x32a   : >> { %v1164_v46 = vmul.f32 %v1131_v5, %v1108_v38  ;;  %v1172_v47 = vmul.f32 %v1131_v5, %v1116_v0  ;;  %v1166_v18 = vmul.f32 %v1141_v4, %v1110_v58  ;;  %v1174_v34 = vmul.f32 %v1141_v4, %v1118_v3 }
 0x32d   : >> { %v1187_v59 = vpop.permute.xlu1 %1186  ;;  %v1182_v10 = vpop.permute.xlu0 %1181 }
 0x32e   : >> { %v1220_v15 = vadd.f32 %v1187_v59, %v1164_v46  ;;  %v1228_v24 = vadd.f32 %v1187_v59, %v1172_v47  ;;  %v1219_v22 = vadd.f32 %v1182_v10, %v1163_v40  ;;  %v1227_v27 = vadd.f32 %v1182_v10, %v1171_v43  ;;  %v1101_v46 = vld [vmem:[%s3461_s17 + $0x10] sm:$0xff] }
 0x32f   : >> { %v1105_v47 = vld [vmem:[%s3461_s17 + $0x30] sm:$0xff] }
 0x330   : >> { %v1236_v31 = vmax.f32 %v1220_v15, 0.0  ;;  %v1244_v1 = vmax.f32 %v1228_v24, 0.0  ;;  %v1235_v32 = vmax.f32 %v1219_v22, 0.0  ;;  %v1243_v33 = vmax.f32 %v1227_v27, 0.0 }
 0x331   : >> { %v1197_v35 = vpop.permute.xlu1 %1196  ;;  %v1192_v36 = vpop.permute.xlu0 %1191  ;;  %v1112_v15 = vunpack.c.h.bf16 %v1101_v46  ;;  %v1120_v24 = vunpack.c.h.bf16 %v1105_v47  ;;  %v1111_v22 = vunpack.c.l.bf16 %v1101_v46 }
 0x332   : >> { %v1254_v37 = vsel %vm915_vm1, %v1236_v31, -inf  ;;  %v1255_v38 = vsel %vm915_vm1, %v1244_v1, -inf  ;;  %v1251_v0 = vsel %vm915_vm1, %v1235_v32, -inf  ;;  %v1252_v5 = vsel %vm915_vm1, %v1243_v33, -inf }
 0x333   : >> { %v1222_v12 = vadd.f32 %v1197_v35, %v1166_v18  ;;  %v1230_v13 = vadd.f32 %v1197_v35, %v1174_v34  ;;  %v1221_v40 = vadd.f32 %v1192_v36, %v1165_v8  ;;  %v1229_v43 = vadd.f32 %v1192_v36, %v1173_v28  ;;  %v1102_v36 = vld [vmem:[%s3461_s17 + $0x18] sm:$0xff] }
 0x334   : >> { %v1253_v50 = vmax.f32 %v1251_v0, %v1252_v5  ;;  %v1256_v63 = vmax.f32 %v1254_v37, %v1255_v38  ;;  %v1119_v28 = vunpack.c.l.bf16 %v1105_v47  ;;  %v1106_v37 = vld [vmem:[%s3461_s17 + $0x38] sm:$0xff]  ;;  %v1113_v46 = vunpack.c.l.bf16 %v1102_v36 }
 0x335   : >> { %v1238_v51 = vmax.f32 %v1222_v12, 0.0  ;;  %v1246_v4 = vmax.f32 %v1230_v13, 0.0  ;;  %v1237_v58 = vmax.f32 %v1221_v40, 0.0  ;;  %v1245_v3 = vmax.f32 %v1229_v43, 0.0  ;;  %v1151_v59 = vpop.permute.xlu1 %1150  ;;  %v1146_v10 = vpop.permute.xlu0 %1145 }
 0x336   : >> { %v1275_v18 = vpack.c.bf16 %v1256_v63, %v1253_v50  ;;  %v1168_v0 = vmul.f32 %v1151_v59, %v1112_v15  ;;  %v1176_v5 = vmul.f32 %v1151_v59, %v1120_v24  ;;  %v1167_v12 = vmul.f32 %v1146_v10, %v1111_v22 }
 0x337   : >> { %v1260_v27 = vsel %vm915_vm1, %v1238_v51, -inf  ;;  %v1261_v31 = vsel %vm915_vm1, %v1246_v4, -inf  ;;  %v1257_v1 = vsel %vm915_vm1, %v1237_v58, -inf  ;;  %v1258_v32 = vsel %vm915_vm1, %v1245_v3, -inf }
 0x338   : >> { %v1262_v33 = vmax.f32 %v1260_v27, %v1261_v31  ;;  %v1259_v8 = vmax.f32 %v1257_v1, %v1258_v32  ;;  %1802 = vmatprep.mubr.msk.bf16.mxu0 %vm915_vm1, %v1275_v18  ;;  %1814 = vmatprep.mubr.msk.bf16.mxu1 %vm915_vm1, %v1275_v18  ;;  %v1175_v13 = vmul.f32 %v1146_v10, %v1119_v28  ;;  %v1114_v40 = vunpack.c.h.bf16 %v1102_v36 }
 0x339   : >> { %v1161_v34 = vpop.permute.xlu1 %1160  ;;  %v1156_v35 = vpop.permute.xlu0 %1155  ;;  %v1122_v43 = vunpack.c.h.bf16 %v1106_v37  ;;  %v1121_v51 = vunpack.c.l.bf16 %v1106_v37 }
 0x33a   : >> { %v1276_v38 = vpack.c.bf16 %v1262_v33, %v1259_v8  ;;  %v1170_v24 = vmul.f32 %v1161_v34, %v1114_v40  ;;  %v1169_v22 = vmul.f32 %v1156_v35, %v1113_v46 }
 0x33b   : >> { %v1178_v10 = vmul.f32 %v1161_v34, %v1122_v43  ;;  %v1177_v1 = vmul.f32 %v1156_v35, %v1121_v51 }
 0x33c   : >> { %1803 = vmatmul.mubr.msk.bf16.vlgmr.msra.gmra.mrb[0].mxu0 %vm915_vm1, %v1276_v38  ;;  %1815 = vmatmul.mubr.msk.bf16.vlgmr.msra.gmra.mrb[0].mxu1 %vm915_vm1, %v1276_v38 }
 0x33d   : >> { %v1207_v47 = vpop.permute.xlu1 %1206  ;;  %v1202_v50 = vpop.permute.xlu0 %1201 }
 0x33e   : >> { %v1224_v63 = vadd.f32 %v1207_v47, %v1168_v0  ;;  %v1232_v4 = vadd.f32 %v1207_v47, %v1176_v5  ;;  %v1223_v58 = vadd.f32 %v1202_v50, %v1167_v12  ;;  %v1231_v3 = vadd.f32 %v1202_v50, %v1175_v13 }
 0x340   : >> { %v1240_v27 = vmax.f32 %v1224_v63, 0.0  ;;  %v1248_v31 = vmax.f32 %v1232_v4, 0.0  ;;  %v1239_v15 = vmax.f32 %v1223_v58, 0.0  ;;  %v1247_v59 = vmax.f32 %v1231_v3, 0.0 }
 0x341   : >> { %v1217_v32 = vpop.permute.xlu1 %1216  ;;  %v1212_v33 = vpop.permute.xlu0 %1211 }
 0x342   : >> { %v1266_v8 = vsel %vm915_vm1, %v1240_v27, -inf  ;;  %v1267_v28 = vsel %vm915_vm1, %v1248_v31, -inf  ;;  %v1263_v18 = vsel %vm915_vm1, %v1239_v15, -inf  ;;  %v1264_v36 = vsel %vm915_vm1, %v1247_v59, -inf }
 0x343   : >> { %v1268_v37 = vmax.f32 %v1266_v8, %v1267_v28  ;;  %v1265_v38 = vmax.f32 %v1263_v18, %v1264_v36  ;;  %v1226_v0 = vadd.f32 %v1217_v32, %v1170_v24  ;;  %v1234_v5 = vadd.f32 %v1217_v32, %v1178_v10 }
 0x344   : >> { %v1225_v12 = vadd.f32 %v1212_v33, %v1169_v22  ;;  %v1233_v13 = vadd.f32 %v1212_v33, %v1177_v1 }
 0x345   : >> { %v1242_v40 = vmax.f32 %v1226_v0, 0.0  ;;  %v1250_v34 = vmax.f32 %v1234_v5, 0.0  ;;  %v1277_v35 = vpack.c.bf16 %v1268_v37, %v1265_v38 }
 0x346   : >> { %v1241_v43 = vmax.f32 %v1225_v12, 0.0  ;;  %v1249_v46 = vmax.f32 %v1233_v13, 0.0 }
 0x347   : >> { %v1272_v51 = vsel %vm915_vm1, %v1242_v40, -inf  ;;  %v1273_v47 = vsel %vm915_vm1, %v1250_v34, -inf  ;;  %1806 = vmatprep.mubr.msk.bf16.mxu0 %vm915_vm1, %v1277_v35  ;;  %1818 = vmatprep.mubr.msk.bf16.mxu1 %vm915_vm1, %v1277_v35 }
 0x348   : >> { %v1274_v50 = vmax.f32 %v1272_v51, %v1273_v47  ;;  %v1269_v63 = vsel %vm915_vm1, %v1241_v43, -inf  ;;  %v1270_v4 = vsel %vm915_vm1, %v1249_v46, -inf }
 0x349   : >> { %v1271_v58 = vmax.f32 %v1269_v63, %v1270_v4 }
 0x34b   : >> { %v1278_v3 = vpack.c.bf16 %v1274_v50, %v1271_v58 }
 0x34d   : >> { %1807 = vmatmul.mubr.msk.bf16.gmra.mrb[4].mxu0 %vm915_vm1, %v1278_v3  ;;  %1819 = vmatmul.mubr.msk.bf16.gmra.mrb[4].mxu1 %vm915_vm1, %v1278_v3 }
 0x40f   : >> { %v1804_v27 = vpop.f32.mrb[0].mxu0  ;;  %v1816_v31 = vpop.f32.mrb[0].mxu1 }
 0x410   : >> { %v1455_v15 = vmax.f32 %v1804_v27, %v1816_v31  ;;  %v1341_v59 = vpop.f32.mrb[1].mxu0  ;;  %v1422_v24 = vpop.f32.mrb[1].mxu1 }
 0x411   : >> { %v1453_v10 = vmax.f32 %v1341_v59, %v1422_v24  ;;  %v1805_v22 = vpop.f32.mrb[2].mxu0  ;;  %v1817_v1 = vpop.f32.mrb[2].mxu1 }
 0x412   : >> { %v1780_v32 = vpack.c.bf16 %v1455_v15, %v1455_v15  ;;  %v1456_v33 = vmax.f32 %v1805_v22, %v1817_v1  ;;  %v1344_v8 = vpop.f32.mrb[3].mxu0  ;;  %v1425_v28 = vpop.f32.mrb[3].mxu1 }
 0x413   : >> { %v1778_v18 = vpack.c.bf16 %v1453_v10, %v1453_v10  ;;  %v1454_v36 = vmax.f32 %v1344_v8, %v1425_v28 }
 0x414   : >> { %1503 = vst.msk [vmem:[%s3500_s28 + $0x8] sm:$0xf] %vm1500_vm3, %v1780_v32  ;;  %v1781_v37 = vpack.c.bf16 %v1456_v33, %v1456_v33 }
 0x415   : >> { %1501 = vst.msk [vmem:[%s3500_s28] sm:$0xf] %vm1500_vm3, %v1778_v18  ;;  %v1779_v38 = vpack.c.bf16 %v1454_v36, %v1454_v36 }
 0x416   : >> { %1504 = vst.msk [vmem:[%s3500_s28 + $0xc] sm:$0xf] %vm1500_vm3, %v1781_v37 }
 0x417   : >> { %1502 = vst.msk [vmem:[%s3500_s28 + $0x4] sm:$0xf] %vm1500_vm3, %v1779_v38 }
 0x420   : >> { %v1808_v0 = vpop.f32.mrb[4].mxu0  ;;  %v1820_v5 = vpop.f32.mrb[4].mxu1 }
 0x421   : >> { %v1459_v12 = vmax.f32 %v1808_v0, %v1820_v5  ;;  %v1357_v13 = vpop.f32.mrb[5].mxu0  ;;  %v1438_v40 = vpop.f32.mrb[5].mxu1 }
 0x422   : >> { %v1457_v34 = vmax.f32 %v1357_v13, %v1438_v40  ;;  %v1809_v35 = vpop.f32.mrb[6].mxu0  ;;  %v1821_v43 = vpop.f32.mrb[6].mxu1  ;;  %1091 = sbr.rel (!%p1089_p2) target bundleno = 676 (0x2a4), region = 99 }
 0x423   : >> { %v1784_v46 = vpack.c.bf16 %v1459_v12, %v1459_v12  ;;  %v1460_v51 = vmax.f32 %v1809_v35, %v1821_v43  ;;  %v1360_v47 = vpop.f32.mrb[7].mxu0  ;;  %v1441_v50 = vpop.f32.mrb[7].mxu1 }
 0x424   : >> { %v1782_v63 = vpack.c.bf16 %v1457_v34, %v1457_v34  ;;  %v1458_v4 = vmax.f32 %v1360_v47, %v1441_v50 }
 0x425   : >> { %1507 = vst.msk [vmem:[%s3500_s28 + $0x18] sm:$0xf] %vm1500_vm3, %v1784_v46  ;;  %v1785_v58 = vpack.c.bf16 %v1460_v51, %v1460_v51 }
 0x426   : >> { %1505 = vst.msk [vmem:[%s3500_s28 + $0x10] sm:$0xf] %vm1500_vm3, %v1782_v63  ;;  %v1783_v3 = vpack.c.bf16 %v1458_v4, %v1458_v4 }
 0x427   : >> { %1508 = vst.msk [vmem:[%s3500_s28 + $0x1c] sm:$0xf] %vm1500_vm3, %v1785_v58 }
 0x428   : >> { %1506 = vst.msk [vmem:[%s3500_s28 + $0x14] sm:$0xf] %vm1500_vm3, %v1783_v3 }
 0x429   :  { %1085 = sbr.rel (!%p1083_p3) target bundleno = 675 (0x2a3), region = 110 }

// kernel: cnn_bn_vo_forward.7
= control target key start
LH: loop header
LB: loop body
LE: loop exit
PB: predicated region body
PF: predicated region fallthrough
CT: control target
= control target key end

     0   :  { %v551_v28 = vlaneseq  ;;  %v4113_v36 = vmov 1966171168   ;;  %vm2286_vm0 = vcmask 523264   ;;  %s5065_s0 = inlined_call_operand.vmem [shape: bf16[2,4032], index: 0, kind: input, shape index: {}]   ;;  %s5066_s1 = inlined_call_operand.vmem [shape: bf16[4032,100], index: 1, kind: input, shape index: {}]   ;;  %s5067_s2 = inlined_call_operand.vmem [shape: f32[1,100], index: 2, kind: input, shape index: {}]   ;;  %s5068_s3 = inlined_call_operand.vmem [shape: bf16[100,100], index: 3, kind: input, shape index: {}]   ;;  %s5069_s4 = inlined_call_operand.vmem [shape: f32[1,100], index: 4, kind: input, shape index: {}]   ;;  %s5070_s5 = inlined_call_operand.vmem [shape: bf16[100,6], index: 5, kind: input, shape index: {}]   ;;  %s5071_s6 = inlined_call_operand.vmem [shape: f32[1,6], index: 6, kind: input, shape index: {}]   ;;  %s5072_s7 = inlined_call_operand.hbm [shape: f32[2,6], index: 7, kind: output, shape index: {}]  }
   0x1   :  { %v3819_v0 = vld [vmem:[%s5066_s1 + $0x40] sm:$0xff]   ;;  %v3823_v4 = vld [vmem:[%s5066_s1 + $0x48] sm:$0xff]   ;;  %v3827_v8 = vld [vmem:[%s5066_s1 + $0x50] sm:$0xff]   ;;  %v549_v37 = vunpack.c.l.s4 %v4113_v36 }
   0x2   :  { %v3820_v1 = vld [vmem:[%s5066_s1 + $0xc0] sm:$0xff]   ;;  %3432 = vmatprep.subr.bf16.mxu0 %v3819_v0  ;;  %v3824_v5 = vld [vmem:[%s5066_s1 + $0xc8] sm:$0xff]   ;;  %v3828_v9 = vld [vmem:[%s5066_s1 + $0xd0] sm:$0xff]   ;;  %v552_v33 = vshrl.u32 %v551_v28, 7 }
   0x3   :  { %v3821_v2 = vld [vmem:[%s5066_s1] sm:$0xff]   ;;  %3454 = vmatprep.subr.bf16.mxu1 %v3820_v1  ;;  %v3825_v6 = vld [vmem:[%s5066_s1 + $0x8] sm:$0xff]   ;;  %v3829_v10 = vld [vmem:[%s5066_s1 + $0x10] sm:$0xff]   ;;  %v550_v40 = vunpack.c.0.s8 %v549_v37 }
   0x4   :  { %v3822_v3 = vld [vmem:[%s5066_s1 + $0x80] sm:$0xff]   ;;  %3433 = vmatpush3.bf16.msra.mxu0 %v3821_v2  ;;  %v3826_v7 = vld [vmem:[%s5066_s1 + $0x88] sm:$0xff]   ;;  %v3830_v11 = vld [vmem:[%s5066_s1 + $0x90] sm:$0xff]  }
   0x5   :  { %3455 = vmatpush3.bf16.msra.mxu1 %v3822_v3  ;;  %3434 = vmatprep.subr.bf16.mxu0 %v3823_v4  ;;  %v3831_v12 = vld [vmem:[%s5066_s1 + $0x58] sm:$0xff]   ;;  %v3835_v16 = vld [vmem:[%s5066_s1 + $0x60] sm:$0xff]   ;;  %v3839_v20 = vld [vmem:[%s5066_s1 + $0x68] sm:$0xff]   ;;  %v4263_v41 = vsub.s32 %v550_v40, %v552_v33 }
   0x6   :  { %3456 = vmatprep.subr.bf16.mxu1 %v3824_v5  ;;  %v3832_v13 = vld [vmem:[%s5066_s1 + $0xd8] sm:$0xff]   ;;  %v3836_v17 = vld [vmem:[%s5066_s1 + $0xe0] sm:$0xff]   ;;  %v3840_v21 = vld [vmem:[%s5066_s1 + $0xe8] sm:$0xff]  }
   0x7   :  { %v3833_v14 = vld [vmem:[%s5066_s1 + $0x18] sm:$0xff]   ;;  %v3837_v18 = vld [vmem:[%s5066_s1 + $0x20] sm:$0xff]   ;;  %v3841_v22 = vld [vmem:[%s5066_s1 + $0x28] sm:$0xff]  }
   0x8   :  { %3435 = vmatpush3.bf16.msra.mxu0 %v3825_v6  ;;  %v3834_v15 = vld [vmem:[%s5066_s1 + $0x98] sm:$0xff]   ;;  %v3838_v19 = vld [vmem:[%s5066_s1 + $0xa0] sm:$0xff]   ;;  %v3842_v23 = vld [vmem:[%s5066_s1 + $0xa8] sm:$0xff]  }
   0x9   :  { %3457 = vmatpush3.bf16.msra.mxu1 %v3826_v7  ;;  %3436 = vmatprep.subr.bf16.mxu0 %v3827_v8  ;;  %v3843_v24 = vld [vmem:[%s5066_s1 + $0x70] sm:$0xff]   ;;  %v3847_v29 = vld [vmem:[%s5066_s1 + $0x78] sm:$0xff]   ;;  %v28_v34 = vld [vmem:[%s5065_s0] sm:$0xff] }
   0xa   :  { %3458 = vmatprep.subr.bf16.mxu1 %v3828_v9  ;;  %v3844_v25 = vld [vmem:[%s5066_s1 + $0xf0] sm:$0xff]   ;;  %v3848_v30 = vld [vmem:[%s5066_s1 + $0xf8] sm:$0xff]   ;;  %v3852_v35 = vld [vmem:[%s5066_s1 + $0x140] sm:$0xff]   ;;  %v547_v39 = vcombine.high %v28_v34, %v28_v34  ;;  %v554_v42 = vrot.slane %v28_v34, %v4263_v41 }
   0xb   :  { %v3845_v26 = vld [vmem:[%s5066_s1 + $0x30] sm:$0xff]   ;;  %v3849_v31 = vld [vmem:[%s5066_s1 + $0x38] sm:$0xff]   ;;  %v3853_v38 = vld [vmem:[%s5066_s1 + $0x1c0] sm:$0xff]  }
   0xc   :  { %3437 = vmatpush3.bf16.msra.mxu0 %v3829_v10  ;;  %v3846_v27 = vld [vmem:[%s5066_s1 + $0xb0] sm:$0xff]   ;;  %v3850_v32 = vld [vmem:[%s5066_s1 + $0xb8] sm:$0xff]   ;;  %v4267_v43 = vrot.slane %v547_v39, %v4263_v41  ;;  %v562_v44 = vcombine.high %v554_v42, %v554_v42  ;;  %v570_v45 = vrot.slane %v554_v42, %v4263_v41  ;;  %v3854_v47 = vld [vmem:[%s5066_s1 + $0x100] sm:$0xff]  }
   0xd   :  { %3459 = vmatpush3.bf16.msra.mxu1 %v3830_v11  ;;  %3438 = vmatprep.subr.bf16.mxu0 %v3831_v12  ;;  %v3855_v49 = vld [vmem:[%s5066_s1 + $0x180] sm:$0xff]   ;;  %v3856_v52 = vld [vmem:[%s5066_s1 + $0x148] sm:$0xff]   ;;  %v3860_v58 = vld [vmem:[%s5066_s1 + $0x150] sm:$0xff]  }
   0xe   :  { %3460 = vmatprep.subr.bf16.mxu1 %v3832_v13  ;;  %v563_v46 = vcombine.high %v4267_v43, %v4267_v43  ;;  %v584_v48 = vrot.slane %v562_v44, %v4263_v41  ;;  %v592_v51 = vcombine.high %v570_v45, %v570_v45  ;;  %v3857_v54 = vld [vmem:[%s5066_s1 + $0x1c8] sm:$0xff]   ;;  %v3861_v59 = vld [vmem:[%s5066_s1 + $0x1d0] sm:$0xff]   ;;  %v3864_v62 = vld [vmem:[%s5066_s1 + $0x158] sm:$0xff]  }
   0xf   :  { %v3858_v55 = vld [vmem:[%s5066_s1 + $0x108] sm:$0xff]   ;;  %v3862_v60 = vld [vmem:[%s5066_s1 + $0x110] sm:$0xff]   ;;  %v3865_v63 = vld [vmem:[%s5066_s1 + $0x1d8] sm:$0xff]  }
  0x10   :  { %3439 = vmatpush3.bf16.msra.mxu0 %v3833_v14  ;;  %v591_v50 = vrot.slane %v563_v46, %v4263_v41  ;;  %2322 = vmatprep.mubr.bf16.mxu0 %v584_v48  ;;  %v594_v53 = vcombine.high %v584_v48, %v584_v48  ;;  %v3859_v57 = vld [vmem:[%s5066_s1 + $0x188] sm:$0xff]   ;;  %v3863_v61 = vld [vmem:[%s5066_s1 + $0x190] sm:$0xff]   ;;  %v3866_v0 = vld [vmem:[%s5066_s1 + $0x118] sm:$0xff]  }
  0x11   :  { %3461 = vmatpush3.bf16.msra.mxu1 %v3834_v15  ;;  %3440 = vmatprep.subr.bf16.mxu0 %v3835_v16  ;;  %v3867_v1 = vld [vmem:[%s5066_s1 + $0x198] sm:$0xff]   ;;  %v3868_v2 = vld [vmem:[%s5066_s1 + $0x160] sm:$0xff]   ;;  %v3872_v6 = vld [vmem:[%s5066_s1 + $0x168] sm:$0xff]  }
  0x12   :  { %3462 = vmatprep.subr.bf16.mxu1 %v3836_v17  ;;  %v595_v56 = vcombine.high %v591_v50, %v591_v50  ;;  %2362 = vmatprep.mubr.bf16.mxu1 %v594_v53  ;;  %v3869_v3 = vld [vmem:[%s5066_s1 + $0x1e0] sm:$0xff]   ;;  %v3873_v7 = vld [vmem:[%s5066_s1 + $0x1e8] sm:$0xff]   ;;  %v3876_v10 = vld [vmem:[%s5066_s1 + $0x170] sm:$0xff]  }
  0x13   :  { %v3870_v4 = vld [vmem:[%s5066_s1 + $0x120] sm:$0xff]   ;;  %v3874_v8 = vld [vmem:[%s5066_s1 + $0x128] sm:$0xff]   ;;  %v3877_v11 = vld [vmem:[%s5066_s1 + $0x1f0] sm:$0xff]  }
  0x14   :  { %3441 = vmatpush3.bf16.msra.mxu0 %v3837_v18  ;;  %v3871_v5 = vld [vmem:[%s5066_s1 + $0x1a0] sm:$0xff]   ;;  %v3875_v9 = vld [vmem:[%s5066_s1 + $0x1a8] sm:$0xff]   ;;  %v3878_v12 = vld [vmem:[%s5066_s1 + $0x130] sm:$0xff]   ;;  %v577_v18 = vrot.slane %v4267_v43, %v4263_v41 }
  0x15   :  { %3463 = vmatpush3.bf16.msra.mxu1 %v3838_v19  ;;  %3442 = vmatprep.subr.bf16.mxu0 %v3839_v20  ;;  %v3879_v13 = vld [vmem:[%s5066_s1 + $0x1b0] sm:$0xff]   ;;  %v3880_v14 = vld [vmem:[%s5066_s1 + $0x178] sm:$0xff]   ;;  %v3884_v19 = vld [vmem:[%s5066_s1 + $0x240] sm:$0xff]  }
  0x16   :  { %3464 = vmatprep.subr.bf16.mxu1 %v3840_v21  ;;  %v3881_v15 = vld [vmem:[%s5066_s1 + $0x1f8] sm:$0xff]   ;;  %v3885_v20 = vld [vmem:[%s5066_s1 + $0x2c0] sm:$0xff]   ;;  %v3892_v28 = vld [vmem:[%s5066_s1 + $0x250] sm:$0xff]  }
  0x17   :  { %v3882_v16 = vld [vmem:[%s5066_s1 + $0x138] sm:$0xff]   ;;  %v3886_v21 = vld [vmem:[%s5066_s1 + $0x200] sm:$0xff]   ;;  %v3904_v40 = vld [vmem:[%s5066_s1 + $0x268] sm:$0xff]  }
  0x18   :  { %3443 = vmatpush3.bf16.msra.mxu0 %v3841_v22  ;;  %v3883_v17 = vld [vmem:[%s5066_s1 + $0x1b8] sm:$0xff]   ;;  %v3887_v22 = vld [vmem:[%s5066_s1 + $0x280] sm:$0xff]   ;;  %v3905_v42 = vld [vmem:[%s5066_s1 + $0x2e8] sm:$0xff]  }
  0x19   :  { %3465 = vmatpush3.bf16.msra.mxu1 %v3842_v23  ;;  %3444 = vmatprep.subr.bf16.mxu0 %v3843_v24  ;;  %v593_v23 = vcombine.high %v577_v18, %v577_v18  ;;  %v3888_v24 = vld [vmem:[%s5066_s1 + $0x248] sm:$0xff]   ;;  %v3897_v33 = vld [vmem:[%s5066_s1 + $0x2d8] sm:$0xff]   ;;  %v3900_v36 = vld [vmem:[%s5066_s1 + $0x260] sm:$0xff]  }
  0x1a   :  { %3466 = vmatprep.subr.bf16.mxu1 %v3844_v25  ;;  %v3889_v25 = vld [vmem:[%s5066_s1 + $0x2c8] sm:$0xff]   ;;  %v3898_v34 = vld [vmem:[%s5066_s1 + $0x218] sm:$0xff]   ;;  %v3901_v37 = vld [vmem:[%s5066_s1 + $0x2e0] sm:$0xff]  }
  0x1b   :  { %v3903_v39 = vld [vmem:[%s5066_s1 + $0x2a0] sm:$0xff]   ;;  %v3906_v43 = vld [vmem:[%s5066_s1 + $0x228] sm:$0xff]  }
  0x1c   :  { %3445 = vmatpush3.bf16.msra.mxu0 %v3845_v26  ;;  %v3890_v26 = vld [vmem:[%s5066_s1 + $0x208] sm:$0xff]  }
  0x1d   :  { %3467 = vmatpush3.bf16.msra.mxu1 %v3846_v27  ;;  %3446 = vmatprep.subr.bf16.mxu0 %v3847_v29  ;;  %v3891_v27 = vld [vmem:[%s5066_s1 + $0x288] sm:$0xff]   ;;  %v3893_v29 = vld [vmem:[%s5066_s1 + $0x2d0] sm:$0xff]  }
  0x1e   :  { %3468 = vmatprep.subr.bf16.mxu1 %v3848_v30  ;;  %v3894_v30 = vld [vmem:[%s5066_s1 + $0x210] sm:$0xff]   ;;  %v3907_v44 = vld [vmem:[%s5066_s1 + $0x2a8] sm:$0xff]  }
  0x1f   :  { %v29_v46 = vld [vmem:[%s5065_s0 + $0x8] sm:$0xff] }
  0x20   :  { %3447 = vmatpush3.bf16.msra.mxu0 %v3849_v31  ;;  %v3895_v31 = vld [vmem:[%s5066_s1 + $0x290] sm:$0xff]   ;;  %v603_v48 = vrot.slane %v29_v46, %v4263_v41 }
  0x21   :  { %3469 = vmatpush3.bf16.msra.mxu1 %v3850_v32  ;;  %3476 = vmatprep.subr.bf16.mxu0 %v3852_v35  ;;  %v3896_v32 = vld [vmem:[%s5066_s1 + $0x258] sm:$0xff]  }
  0x22   :  { %3498 = vmatprep.subr.bf16.mxu1 %v3853_v38  ;;  %v3899_v35 = vld [vmem:[%s5066_s1 + $0x298] sm:$0xff]   ;;  %v3902_v38 = vld [vmem:[%s5066_s1 + $0x220] sm:$0xff]  }
  0x23   :  { %2323 = vmatmul.mubr.bf16.vlgmr.msra.gmra.mrb[0].mxu0 %v570_v45  ;;  %v3908_v45 = vld [vmem:[%s5066_s1 + $0x270] sm:$0xff]  }
  0x24   :  { %3477 = vmatpush3.bf16.msra.mxu0 %v3854_v47  ;;  %2363 = vmatmul.mubr.bf16.vlgmr.msra.gmra.mrb[0].mxu1 %v592_v51  ;;  %v3909_v47 = vld [vmem:[%s5066_s1 + $0x2f0] sm:$0xff]  }
  0x25   :  { %3478 = vmatprep.subr.bf16.mxu0 %v3856_v52  ;;  %3499 = vmatpush3.bf16.msra.mxu1 %v3855_v49  ;;  %v596_v49 = vcombine.high %v29_v46, %v29_v46  ;;  %v3911_v51 = vld [vmem:[%s5066_s1 + $0x2b0] sm:$0xff]   ;;  %v611_v52 = vcombine.high %v603_v48, %v603_v48 }
  0x26   :  { %2402 = vmatprep.mubr.bf16.mxu0 %v591_v50  ;;  %3500 = vmatprep.subr.bf16.mxu1 %v3857_v54  ;;  %v3910_v50 = vld [vmem:[%s5066_s1 + $0x230] sm:$0xff]   ;;  %v3912_v54 = vld [vmem:[%s5066_s1 + $0x278] sm:$0xff]  }
  0x27   :  { %2442 = vmatprep.mubr.bf16.mxu1 %v595_v56  ;;  %v4455_v53 = vrot.slane %v596_v49, %v4263_v41  ;;  %v633_v56 = vrot.slane %v611_v52, %v4263_v41  ;;  %v3959_v46 = vld [vmem:[%s5066_s1 + $0x410] sm:$0xff]   ;;  %v3962_v49 = vld [vmem:[%s5066_s1 + $0x4d8] sm:$0xff]   ;;  %v3965_v52 = vld [vmem:[%s5066_s1 + $0x460] sm:$0xff]  }
  0x28   :  { %3479 = vmatpush3.bf16.msra.mxu0 %v3858_v55  ;;  %v3913_v55 = vld [vmem:[%s5066_s1 + $0x2f8] sm:$0xff]  }
  0x29   :  { %3480 = vmatprep.subr.bf16.mxu0 %v3860_v58  ;;  %3501 = vmatpush3.bf16.msra.mxu1 %v3859_v57  ;;  %v612_v57 = vcombine.high %v4455_v53, %v4455_v53  ;;  %v3914_v58 = vld [vmem:[%s5066_s1 + $0x238] sm:$0xff]  }
  0x2a   :  { %3502 = vmatprep.subr.bf16.mxu1 %v3861_v59  ;;  %v3915_v59 = vld [vmem:[%s5066_s1 + $0x2b8] sm:$0xff]  }
  0x2c   :  { %3481 = vmatpush3.bf16.msra.mxu0 %v3862_v60  ;;  %v643_v60 = vcombine.high %v633_v56, %v633_v56 }
  0x2d   :  { %3482 = vmatprep.subr.bf16.mxu0 %v3864_v62  ;;  %3503 = vmatpush3.bf16.msra.mxu1 %v3863_v61  ;;  %v619_v61 = vrot.slane %v603_v48, %v4263_v41  ;;  %v3916_v62 = vld [vmem:[%s5066_s1 + $0x340] sm:$0xff]   ;;  %v3961_v48 = vld [vmem:[%s5066_s1 + $0x458] sm:$0xff]  }
  0x2e   :  { %3504 = vmatprep.subr.bf16.mxu1 %v3865_v63  ;;  %v3917_v63 = vld [vmem:[%s5066_s1 + $0x3c0] sm:$0xff]  }
  0x30   :  { %3483 = vmatpush3.bf16.msra.mxu0 %v3866_v0  ;;  %v640_v0 = vrot.slane %v612_v57, %v4263_v41  ;;  %v3970_v57 = vld [vmem:[%s5066_s1 + $0x4e8] sm:$0xff]  }
  0x31   :  { %3484 = vmatprep.subr.bf16.mxu0 %v3868_v2  ;;  %3505 = vmatpush3.bf16.msra.mxu1 %v3867_v1  ;;  %v3918_v1 = vld [vmem:[%s5066_s1 + $0x300] sm:$0xff]  }
  0x32   :  { %3506 = vmatprep.subr.bf16.mxu1 %v3869_v3  ;;  %v3919_v2 = vld [vmem:[%s5066_s1 + $0x380] sm:$0xff]   ;;  %v641_v3 = vcombine.high %v619_v61, %v619_v61 }
  0x34   :  { %3485 = vmatpush3.bf16.msra.mxu0 %v3870_v4  ;;  %v3920_v4 = vld [vmem:[%s5066_s1 + $0x348] sm:$0xff]  }
  0x35   :  { %3486 = vmatprep.subr.bf16.mxu0 %v3872_v6  ;;  %3507 = vmatpush3.bf16.msra.mxu1 %v3871_v5  ;;  %v3921_v5 = vld [vmem:[%s5066_s1 + $0x3c8] sm:$0xff]   ;;  %v644_v6 = vcombine.high %v640_v0, %v640_v0 }
  0x36   :  { %3508 = vmatprep.subr.bf16.mxu1 %v3873_v7  ;;  %v3922_v7 = vld [vmem:[%s5066_s1 + $0x308] sm:$0xff]  }
  0x38   :  { %3487 = vmatpush3.bf16.msra.mxu0 %v3874_v8  ;;  %v3923_v8 = vld [vmem:[%s5066_s1 + $0x388] sm:$0xff]  }
  0x39   :  { %3488 = vmatprep.subr.bf16.mxu0 %v3876_v10  ;;  %3509 = vmatpush3.bf16.msra.mxu1 %v3875_v9  ;;  %v3924_v9 = vld [vmem:[%s5066_s1 + $0x350] sm:$0xff]  }
  0x3a   :  { %3510 = vmatprep.subr.bf16.mxu1 %v3877_v11  ;;  %v3925_v10 = vld [vmem:[%s5066_s1 + $0x3d0] sm:$0xff]  }
  0x3b   :  { %v3926_v11 = vld [vmem:[%s5066_s1 + $0x310] sm:$0xff]  }
  0x3c   :  { %3489 = vmatpush3.bf16.msra.mxu0 %v3878_v12  ;;  %v3927_v12 = vld [vmem:[%s5066_s1 + $0x390] sm:$0xff]  }
  0x3d   :  { %3490 = vmatprep.subr.bf16.mxu0 %v3880_v14  ;;  %3511 = vmatpush3.bf16.msra.mxu1 %v3879_v13  ;;  %v3928_v13 = vld [vmem:[%s5066_s1 + $0x358] sm:$0xff]  }
  0x3e   :  { %3512 = vmatprep.subr.bf16.mxu1 %v3881_v15  ;;  %v3929_v14 = vld [vmem:[%s5066_s1 + $0x3d8] sm:$0xff]  }
  0x3f   :  { %v3930_v15 = vld [vmem:[%s5066_s1 + $0x318] sm:$0xff]  }
  0x40   :  { %3491 = vmatpush3.bf16.msra.mxu0 %v3882_v16  ;;  %v3931_v16 = vld [vmem:[%s5066_s1 + $0x398] sm:$0xff]  }
  0x41   :  { %3520 = vmatprep.subr.bf16.mxu0 %v3884_v19  ;;  %3513 = vmatpush3.bf16.msra.mxu1 %v3883_v17  ;;  %v3932_v17 = vld [vmem:[%s5066_s1 + $0x360] sm:$0xff]  }
  0x42   :  { %3542 = vmatprep.subr.bf16.mxu1 %v3885_v20  ;;  %v3934_v19 = vld [vmem:[%s5066_s1 + $0x320] sm:$0xff]  }
  0x43   :  { %2403 = vmatmul.mubr.bf16.vlgmr.msra.gmra.mrb[4].mxu0 %v577_v18  ;;  %v3933_v18 = vld [vmem:[%s5066_s1 + $0x3e0] sm:$0xff]  }
  0x44   :  { %3521 = vmatpush3.bf16.msra.mxu0 %v3886_v21  ;;  %2443 = vmatmul.mubr.bf16.vlgmr.msra.gmra.mrb[4].mxu1 %v593_v23  ;;  %v3935_v20 = vld [vmem:[%s5066_s1 + $0x3a0] sm:$0xff]   ;;  %v3936_v21 = vld [vmem:[%s5066_s1 + $0x368] sm:$0xff]  }
  0x45   :  { %3522 = vmatprep.subr.bf16.mxu0 %v3888_v24  ;;  %3543 = vmatpush3.bf16.msra.mxu1 %v3887_v22  ;;  %v3937_v22 = vld [vmem:[%s5066_s1 + $0x3e8] sm:$0xff]  }
  0x46   :  { %3544 = vmatprep.subr.bf16.mxu1 %v3889_v25  ;;  %2482 = vmatprep.mubr.bf16.mxu0 %v633_v56  ;;  %v3938_v23 = vld [vmem:[%s5066_s1 + $0x328] sm:$0xff]   ;;  %v3940_v25 = vld [vmem:[%s5066_s1 + $0x370] sm:$0xff]  }
  0x47   :  { %2522 = vmatprep.mubr.bf16.mxu1 %v643_v60  ;;  %v3939_v24 = vld [vmem:[%s5066_s1 + $0x3a8] sm:$0xff]   ;;  %v3973_v60 = vld [vmem:[%s5066_s1 + $0x470] sm:$0xff]  }
  0x48   :  { %3523 = vmatpush3.bf16.msra.mxu0 %v3890_v26  ;;  %v3941_v26 = vld [vmem:[%s5066_s1 + $0x3f0] sm:$0xff]   ;;  %v3969_v56 = vld [vmem:[%s5066_s1 + $0x468] sm:$0xff]  }
  0x49   :  { %3524 = vmatprep.subr.bf16.mxu0 %v3892_v28  ;;  %3545 = vmatpush3.bf16.msra.mxu1 %v3891_v27  ;;  %v3942_v27 = vld [vmem:[%s5066_s1 + $0x330] sm:$0xff]  }
  0x4a   :  { %3546 = vmatprep.subr.bf16.mxu1 %v3893_v29  ;;  %v3943_v28 = vld [vmem:[%s5066_s1 + $0x3b0] sm:$0xff]   ;;  %v3944_v29 = vld [vmem:[%s5066_s1 + $0x378] sm:$0xff]  }
  0x4c   :  { %3525 = vmatpush3.bf16.msra.mxu0 %v3894_v30  ;;  %v3945_v30 = vld [vmem:[%s5066_s1 + $0x3f8] sm:$0xff]  }
  0x4d   :  { %3526 = vmatprep.subr.bf16.mxu0 %v3896_v32  ;;  %3547 = vmatpush3.bf16.msra.mxu1 %v3895_v31  ;;  %v3946_v31 = vld [vmem:[%s5066_s1 + $0x338] sm:$0xff]  }
  0x4e   :  { %3548 = vmatprep.subr.bf16.mxu1 %v3897_v33  ;;  %v3947_v32 = vld [vmem:[%s5066_s1 + $0x3b8] sm:$0xff]   ;;  %v626_v33 = vrot.slane %v4455_v53, %v4263_v41  ;;  %v3966_v53 = vld [vmem:[%s5066_s1 + $0x4e0] sm:$0xff]  }
  0x50   :  { %3527 = vmatpush3.bf16.msra.mxu0 %v3898_v34  ;;  %v3949_v34 = vld [vmem:[%s5066_s1 + $0x440] sm:$0xff]  }
  0x51   :  { %3528 = vmatprep.subr.bf16.mxu0 %v3900_v36  ;;  %3549 = vmatpush3.bf16.msra.mxu1 %v3899_v35  ;;  %v3950_v35 = vld [vmem:[%s5066_s1 + $0x4c0] sm:$0xff]  }
  0x52   :  { %3550 = vmatprep.subr.bf16.mxu1 %v3901_v37  ;;  %v3951_v36 = vld [vmem:[%s5066_s1 + $0x400] sm:$0xff]  }
  0x53   :  { %v3952_v37 = vld [vmem:[%s5066_s1 + $0x480] sm:$0xff]  }
  0x54   :  { %3529 = vmatpush3.bf16.msra.mxu0 %v3902_v38  ;;  %v642_v38 = vcombine.high %v626_v33, %v626_v33 }
  0x55   :  { %3530 = vmatprep.subr.bf16.mxu0 %v3904_v40  ;;  %3551 = vmatpush3.bf16.msra.mxu1 %v3903_v39  ;;  %v3953_v39 = vld [vmem:[%s5066_s1 + $0x448] sm:$0xff]  }
  0x56   :  { %3552 = vmatprep.subr.bf16.mxu1 %v3905_v42  ;;  %v3954_v40 = vld [vmem:[%s5066_s1 + $0x4c8] sm:$0xff]  }
  0x57   :  { %v3955_v42 = vld [vmem:[%s5066_s1 + $0x408] sm:$0xff]  }
  0x58   :  { %3531 = vmatpush3.bf16.msra.mxu0 %v3906_v43  ;;  %v3956_v43 = vld [vmem:[%s5066_s1 + $0x488] sm:$0xff]  }
  0x59   :  { %3532 = vmatprep.subr.bf16.mxu0 %v3908_v45  ;;  %3553 = vmatpush3.bf16.msra.mxu1 %v3907_v44  ;;  %v3957_v44 = vld [vmem:[%s5066_s1 + $0x450] sm:$0xff]  }
  0x5a   :  { %3554 = vmatprep.subr.bf16.mxu1 %v3909_v47  ;;  %v3958_v45 = vld [vmem:[%s5066_s1 + $0x4d0] sm:$0xff]  }
  0x5b   :  { %v3960_v47 = vld [vmem:[%s5066_s1 + $0x490] sm:$0xff]  }
  0x5c   :  { %3533 = vmatpush3.bf16.msra.mxu0 %v3910_v50  ;;  %v3963_v50 = vld [vmem:[%s5066_s1 + $0x418] sm:$0xff]  }
  0x5d   :  { %3534 = vmatprep.subr.bf16.mxu0 %v3912_v54  ;;  %3555 = vmatpush3.bf16.msra.mxu1 %v3911_v51  ;;  %v3964_v51 = vld [vmem:[%s5066_s1 + $0x498] sm:$0xff]   ;;  %v3967_v54 = vld [vmem:[%s5066_s1 + $0x420] sm:$0xff]  }
  0x5e   :  { %3556 = vmatprep.subr.bf16.mxu1 %v3913_v55  ;;  %v3968_v55 = vld [vmem:[%s5066_s1 + $0x4a0] sm:$0xff]  }
  0x60   :  { %3535 = vmatpush3.bf16.msra.mxu0 %v3914_v58  ;;  %v3971_v58 = vld [vmem:[%s5066_s1 + $0x428] sm:$0xff]  }
  0x61   :  { %3564 = vmatprep.subr.bf16.mxu0 %v3916_v62  ;;  %3557 = vmatpush3.bf16.msra.mxu1 %v3915_v59  ;;  %v3972_v59 = vld [vmem:[%s5066_s1 + $0x4a8] sm:$0xff]   ;;  %v3974_v62 = vld [vmem:[%s5066_s1 + $0x4f0] sm:$0xff]  }
  0x62   :  { %3586 = vmatprep.subr.bf16.mxu1 %v3917_v63 }
  0x63   :  { %2483 = vmatmul.mubr.bf16.vlgmr.msra.gmra.mrb[8].mxu0 %v619_v61  ;;  %v30_v61 = vld [vmem:[%s5065_s0 + $0x10] sm:$0xff] }
  0x64   :  { %3565 = vmatpush3.bf16.msra.mxu0 %v3918_v1  ;;  %2562 = vmatprep.mubr.bf16.mxu0 %v640_v0  ;;  %v652_v63 = vrot.slane %v30_v61, %v4263_v41  ;;  %v645_v0 = vcombine.high %v30_v61, %v30_v61  ;;  %v3975_v1 = vld [vmem:[%s5066_s1 + $0x430] sm:$0xff]  }
  0x65   :  { %2523 = vmatmul.mubr.bf16.vlgmr.msra.gmra.mrb[8].mxu1 %v641_v3  ;;  %3566 = vmatprep.subr.bf16.mxu0 %v3920_v4  ;;  %v4024_v61 = vld [vmem:[%s5066_s1 + $0x610] sm:$0xff]  }
  0x66   :  { %3587 = vmatpush3.bf16.msra.mxu1 %v3919_v2  ;;  %2602 = vmatprep.mubr.bf16.mxu1 %v644_v6  ;;  %v3976_v2 = vld [vmem:[%s5066_s1 + $0x4b0] sm:$0xff]   ;;  %v660_v3 = vcombine.high %v652_v63, %v652_v63  ;;  %v4661_v4 = vrot.slane %v645_v0, %v4263_v41  ;;  %v3978_v6 = vld [vmem:[%s5066_s1 + $0x4f8] sm:$0xff]  }
  0x67   :  { %3588 = vmatprep.subr.bf16.mxu1 %v3921_v5  ;;  %v3977_v5 = vld [vmem:[%s5066_s1 + $0x478] sm:$0xff]  }
  0x68   :  { %3567 = vmatpush3.bf16.msra.mxu0 %v3922_v7  ;;  %v682_v7 = vrot.slane %v660_v3, %v4263_v41  ;;  %v4027_v0 = vld [vmem:[%s5066_s1 + $0x6d8] sm:$0xff]   ;;  %v4030_v3 = vld [vmem:[%s5066_s1 + $0x660] sm:$0xff]  }
  0x69   :  { %3568 = vmatprep.subr.bf16.mxu0 %v3924_v9  ;;  %v3979_v9 = vld [vmem:[%s5066_s1 + $0x438] sm:$0xff]  }
  0x6a   :  { %3589 = vmatpush3.bf16.msra.mxu1 %v3923_v8  ;;  %v661_v8 = vcombine.high %v4661_v4, %v4661_v4 }
  0x6b   :  { %3590 = vmatprep.subr.bf16.mxu1 %v3925_v10  ;;  %v3980_v10 = vld [vmem:[%s5066_s1 + $0x4b8] sm:$0xff]  }
  0x6c   :  { %3569 = vmatpush3.bf16.msra.mxu0 %v3926_v11  ;;  %v692_v11 = vcombine.high %v682_v7, %v682_v7 }
  0x6d   :  { %3570 = vmatprep.subr.bf16.mxu0 %v3928_v13  ;;  %v3981_v13 = vld [vmem:[%s5066_s1 + $0x540] sm:$0xff]  }
  0x6e   :  { %3591 = vmatpush3.bf16.msra.mxu1 %v3927_v12  ;;  %v668_v12 = vrot.slane %v652_v63, %v4263_v41  ;;  %v4026_v63 = vld [vmem:[%s5066_s1 + $0x658] sm:$0xff]  }
  0x6f   :  { %3592 = vmatprep.subr.bf16.mxu1 %v3929_v14  ;;  %v3982_v14 = vld [vmem:[%s5066_s1 + $0x5c0] sm:$0xff]  }
  0x70   :  { %3571 = vmatpush3.bf16.msra.mxu0 %v3930_v15  ;;  %v689_v15 = vrot.slane %v661_v8, %v4263_v41  ;;  %v4035_v8 = vld [vmem:[%s5066_s1 + $0x6e8] sm:$0xff]  }
  0x71   :  { %3572 = vmatprep.subr.bf16.mxu0 %v3932_v17  ;;  %v3984_v17 = vld [vmem:[%s5066_s1 + $0x580] sm:$0xff]  }
  0x72   :  { %3593 = vmatpush3.bf16.msra.mxu1 %v3931_v16  ;;  %v3983_v16 = vld [vmem:[%s5066_s1 + $0x500] sm:$0xff]  }
  0x73   :  { %3594 = vmatprep.subr.bf16.mxu1 %v3933_v18  ;;  %v690_v18 = vcombine.high %v668_v12, %v668_v12 }
  0x74   :  { %3573 = vmatpush3.bf16.msra.mxu0 %v3934_v19  ;;  %v3985_v19 = vld [vmem:[%s5066_s1 + $0x548] sm:$0xff]  }
  0x75   :  { %3574 = vmatprep.subr.bf16.mxu0 %v3936_v21  ;;  %v693_v21 = vcombine.high %v689_v15, %v689_v15 }
  0x76   :  { %3595 = vmatpush3.bf16.msra.mxu1 %v3935_v20  ;;  %v3986_v20 = vld [vmem:[%s5066_s1 + $0x5c8] sm:$0xff]  }
  0x77   :  { %3596 = vmatprep.subr.bf16.mxu1 %v3937_v22  ;;  %v3987_v22 = vld [vmem:[%s5066_s1 + $0x508] sm:$0xff]  }
  0x78   :  { %3575 = vmatpush3.bf16.msra.mxu0 %v3938_v23  ;;  %v3988_v23 = vld [vmem:[%s5066_s1 + $0x588] sm:$0xff]  }
  0x79   :  { %3576 = vmatprep.subr.bf16.mxu0 %v3940_v25  ;;  %v3990_v25 = vld [vmem:[%s5066_s1 + $0x5d0] sm:$0xff]  }
  0x7a   :  { %3597 = vmatpush3.bf16.msra.mxu1 %v3939_v24  ;;  %v3989_v24 = vld [vmem:[%s5066_s1 + $0x550] sm:$0xff]  }
  0x7b   :  { %3598 = vmatprep.subr.bf16.mxu1 %v3941_v26  ;;  %v3991_v26 = vld [vmem:[%s5066_s1 + $0x510] sm:$0xff]  }
  0x7c   :  { %3577 = vmatpush3.bf16.msra.mxu0 %v3942_v27  ;;  %v3992_v27 = vld [vmem:[%s5066_s1 + $0x590] sm:$0xff]  }
  0x7d   :  { %3578 = vmatprep.subr.bf16.mxu0 %v3944_v29  ;;  %v3994_v29 = vld [vmem:[%s5066_s1 + $0x5d8] sm:$0xff]  }
  0x7e   :  { %3599 = vmatpush3.bf16.msra.mxu1 %v3943_v28  ;;  %v3993_v28 = vld [vmem:[%s5066_s1 + $0x558] sm:$0xff]  }
  0x7f   :  { %3600 = vmatprep.subr.bf16.mxu1 %v3945_v30  ;;  %v3995_v30 = vld [vmem:[%s5066_s1 + $0x518] sm:$0xff]  }
  0x80   :  { %3579 = vmatpush3.bf16.msra.mxu0 %v3946_v31  ;;  %v3996_v31 = vld [vmem:[%s5066_s1 + $0x598] sm:$0xff]  }
  0x81   :  { %3608 = vmatprep.subr.bf16.mxu0 %v3949_v34  ;;  %v3999_v34 = vld [vmem:[%s5066_s1 + $0x520] sm:$0xff]  }
  0x82   :  { %3601 = vmatpush3.bf16.msra.mxu1 %v3947_v32  ;;  %v3997_v32 = vld [vmem:[%s5066_s1 + $0x560] sm:$0xff]  }
  0x83   :  { %2563 = vmatmul.mubr.bf16.vlgmr.msra.gmra.mrb[12].mxu0 %v626_v33  ;;  %3630 = vmatprep.subr.bf16.mxu1 %v3950_v35  ;;  %v3998_v33 = vld [vmem:[%s5066_s1 + $0x5e0] sm:$0xff]  }
  0x84   :  { %3609 = vmatpush3.bf16.msra.mxu0 %v3951_v36  ;;  %2642 = vmatprep.mubr.bf16.mxu0 %v682_v7  ;;  %v4000_v35 = vld [vmem:[%s5066_s1 + $0x5a0] sm:$0xff]   ;;  %v4001_v36 = vld [vmem:[%s5066_s1 + $0x568] sm:$0xff]  }
  0x85   :  { %2603 = vmatmul.mubr.bf16.vlgmr.msra.gmra.mrb[12].mxu1 %v642_v38  ;;  %3610 = vmatprep.subr.bf16.mxu0 %v3953_v39  ;;  %v4003_v38 = vld [vmem:[%s5066_s1 + $0x528] sm:$0xff]  }
  0x86   :  { %3631 = vmatpush3.bf16.msra.mxu1 %v3952_v37  ;;  %2682 = vmatprep.mubr.bf16.mxu1 %v692_v11  ;;  %v4002_v37 = vld [vmem:[%s5066_s1 + $0x5e8] sm:$0xff]   ;;  %v4038_v11 = vld [vmem:[%s5066_s1 + $0x670] sm:$0xff]  }
  0x87   :  { %3632 = vmatprep.subr.bf16.mxu1 %v3954_v40  ;;  %v4004_v39 = vld [vmem:[%s5066_s1 + $0x5a8] sm:$0xff]   ;;  %v4005_v40 = vld [vmem:[%s5066_s1 + $0x570] sm:$0xff]  }
  0x88   :  { %3611 = vmatpush3.bf16.msra.mxu0 %v3955_v42  ;;  %v4006_v42 = vld [vmem:[%s5066_s1 + $0x5f0] sm:$0xff]   ;;  %v4034_v7 = vld [vmem:[%s5066_s1 + $0x668] sm:$0xff]  }
  0x89   :  { %3612 = vmatprep.subr.bf16.mxu0 %v3957_v44  ;;  %v4008_v44 = vld [vmem:[%s5066_s1 + $0x5b0] sm:$0xff]  }
  0x8a   :  { %3633 = vmatpush3.bf16.msra.mxu1 %v3956_v43  ;;  %v4007_v43 = vld [vmem:[%s5066_s1 + $0x530] sm:$0xff]  }
  0x8b   :  { %3634 = vmatprep.subr.bf16.mxu1 %v3958_v45  ;;  %v4009_v45 = vld [vmem:[%s5066_s1 + $0x578] sm:$0xff]  }
  0x8c   :  { %3613 = vmatpush3.bf16.msra.mxu0 %v3959_v46  ;;  %v4010_v46 = vld [vmem:[%s5066_s1 + $0x5f8] sm:$0xff]  }
  0x8d   :  { %3614 = vmatprep.subr.bf16.mxu0 %v3961_v48  ;;  %v4012_v48 = vld [vmem:[%s5066_s1 + $0x5b8] sm:$0xff]  }
  0x8e   :  { %3635 = vmatpush3.bf16.msra.mxu1 %v3960_v47  ;;  %v4011_v47 = vld [vmem:[%s5066_s1 + $0x538] sm:$0xff]  }
  0x8f   :  { %3636 = vmatprep.subr.bf16.mxu1 %v3962_v49  ;;  %v675_v49 = vrot.slane %v4661_v4, %v4263_v41  ;;  %v4031_v4 = vld [vmem:[%s5066_s1 + $0x6e0] sm:$0xff]  }
  0x90   :  { %3615 = vmatpush3.bf16.msra.mxu0 %v3963_v50  ;;  %v4014_v50 = vld [vmem:[%s5066_s1 + $0x640] sm:$0xff]  }
  0x91   :  { %3616 = vmatprep.subr.bf16.mxu0 %v3965_v52  ;;  %v4016_v52 = vld [vmem:[%s5066_s1 + $0x600] sm:$0xff]  }
  0x92   :  { %3637 = vmatpush3.bf16.msra.mxu1 %v3964_v51  ;;  %v4015_v51 = vld [vmem:[%s5066_s1 + $0x6c0] sm:$0xff]  }
  0x93   :  { %3638 = vmatprep.subr.bf16.mxu1 %v3966_v53  ;;  %v4017_v53 = vld [vmem:[%s5066_s1 + $0x680] sm:$0xff]  }
  0x94   :  { %3617 = vmatpush3.bf16.msra.mxu0 %v3967_v54  ;;  %v691_v54 = vcombine.high %v675_v49, %v675_v49 }
  0x95   :  { %3618 = vmatprep.subr.bf16.mxu0 %v3969_v56  ;;  %v4019_v56 = vld [vmem:[%s5066_s1 + $0x6c8] sm:$0xff]  }
  0x96   :  { %3639 = vmatpush3.bf16.msra.mxu1 %v3968_v55  ;;  %v4018_v55 = vld [vmem:[%s5066_s1 + $0x648] sm:$0xff]  }
  0x97   :  { %3640 = vmatprep.subr.bf16.mxu1 %v3970_v57  ;;  %v4020_v57 = vld [vmem:[%s5066_s1 + $0x608] sm:$0xff]  }
  0x98   :  { %3619 = vmatpush3.bf16.msra.mxu0 %v3971_v58  ;;  %v4021_v58 = vld [vmem:[%s5066_s1 + $0x688] sm:$0xff]  }
  0x99   :  { %3620 = vmatprep.subr.bf16.mxu0 %v3973_v60  ;;  %v4023_v60 = vld [vmem:[%s5066_s1 + $0x6d0] sm:$0xff]  }
  0x9a   :  { %3641 = vmatpush3.bf16.msra.mxu1 %v3972_v59  ;;  %v4022_v59 = vld [vmem:[%s5066_s1 + $0x650] sm:$0xff]  }
  0x9b   :  { %3642 = vmatprep.subr.bf16.mxu1 %v3974_v62  ;;  %v4025_v62 = vld [vmem:[%s5066_s1 + $0x690] sm:$0xff]  }
  0x9c   :  { %3621 = vmatpush3.bf16.msra.mxu0 %v3975_v1  ;;  %v4028_v1 = vld [vmem:[%s5066_s1 + $0x618] sm:$0xff]  }
  0x9d   :  { %3622 = vmatprep.subr.bf16.mxu0 %v3977_v5  ;;  %v4032_v5 = vld [vmem:[%s5066_s1 + $0x620] sm:$0xff]  }
  0x9e   :  { %3643 = vmatpush3.bf16.msra.mxu1 %v3976_v2  ;;  %v4029_v2 = vld [vmem:[%s5066_s1 + $0x698] sm:$0xff]  }
  0x9f   :  { %3644 = vmatprep.subr.bf16.mxu1 %v3978_v6  ;;  %v4033_v6 = vld [vmem:[%s5066_s1 + $0x6a0] sm:$0xff]  }
  0xa0   :  { %3623 = vmatpush3.bf16.msra.mxu0 %v3979_v9  ;;  %v4036_v9 = vld [vmem:[%s5066_s1 + $0x628] sm:$0xff]  }
  0xa1   :  { %3652 = vmatprep.subr.bf16.mxu0 %v3981_v13  ;;  %v4039_v13 = vld [vmem:[%s5066_s1 + $0x6f0] sm:$0xff]  }
  0xa2   :  { %3645 = vmatpush3.bf16.msra.mxu1 %v3980_v10  ;;  %v4037_v10 = vld [vmem:[%s5066_s1 + $0x6a8] sm:$0xff]  }
  0xa3   :  { %2643 = vmatmul.mubr.bf16.vlgmr.msra.gmra.mrb[16].mxu0 %v668_v12  ;;  %3674 = vmatprep.subr.bf16.mxu1 %v3982_v14  ;;  %v31_v12 = vld [vmem:[%s5065_s0 + $0x18] sm:$0xff] }
  0xa4   :  { %3653 = vmatpush3.bf16.msra.mxu0 %v3983_v16  ;;  %2722 = vmatprep.mubr.bf16.mxu0 %v689_v15  ;;  %v701_v14 = vrot.slane %v31_v12, %v4263_v41  ;;  %v694_v15 = vcombine.high %v31_v12, %v31_v12  ;;  %v4040_v16 = vld [vmem:[%s5066_s1 + $0x630] sm:$0xff]  }
  0xa5   :  { %2683 = vmatmul.mubr.bf16.vlgmr.msra.gmra.mrb[16].mxu1 %v690_v18  ;;  %3654 = vmatprep.subr.bf16.mxu0 %v3985_v19 }
  0xa6   :  { %3675 = vmatpush3.bf16.msra.mxu1 %v3984_v17  ;;  %2762 = vmatprep.mubr.bf16.mxu1 %v693_v21  ;;  %v4042_v17 = vld [vmem:[%s5066_s1 + $0x678] sm:$0xff]   ;;  %v709_v18 = vcombine.high %v701_v14, %v701_v14  ;;  %v4867_v19 = vrot.slane %v694_v15, %v4263_v41 }
  0xa7   :  { %3676 = vmatprep.subr.bf16.mxu1 %v3986_v20  ;;  %v4041_v20 = vld [vmem:[%s5066_s1 + $0x6b0] sm:$0xff]   ;;  %v4043_v21 = vld [vmem:[%s5066_s1 + $0x6f8] sm:$0xff]  }
  0xa8   :  { %3655 = vmatpush3.bf16.msra.mxu0 %v3987_v22  ;;  %v731_v22 = vrot.slane %v709_v18, %v4263_v41 }
  0xa9   :  { %3656 = vmatprep.subr.bf16.mxu0 %v3989_v24  ;;  %v710_v24 = vcombine.high %v4867_v19, %v4867_v19 }
  0xaa   :  { %3677 = vmatpush3.bf16.msra.mxu1 %v3988_v23  ;;  %v4044_v23 = vld [vmem:[%s5066_s1 + $0x638] sm:$0xff]  }
  0xab   :  { %3678 = vmatprep.subr.bf16.mxu1 %v3990_v25  ;;  %v741_v25 = vcombine.high %v731_v22, %v731_v22 }
  0xac   :  { %3657 = vmatpush3.bf16.msra.mxu0 %v3991_v26  ;;  %v717_v26 = vrot.slane %v701_v14, %v4263_v41 }
  0xad   :  { %3658 = vmatprep.subr.bf16.mxu0 %v3993_v28  ;;  %v4045_v28 = vld [vmem:[%s5066_s1 + $0x6b8] sm:$0xff]  }
  0xae   :  { %3679 = vmatpush3.bf16.msra.mxu1 %v3992_v27  ;;  %v4046_v27 = vld [vmem:[%s5066_s1 + $0x740] sm:$0xff]  }
  0xaf   :  { %3680 = vmatprep.subr.bf16.mxu1 %v3994_v29  ;;  %v4047_v29 = vld [vmem:[%s5066_s1 + $0x700] sm:$0xff]  }
  0xb0   :  { %3659 = vmatpush3.bf16.msra.mxu0 %v3995_v30  ;;  %v738_v30 = vrot.slane %v710_v24, %v4263_v41 }
  0xb1   :  { %3660 = vmatprep.subr.bf16.mxu0 %v3997_v32  ;;  %v4049_v32 = vld [vmem:[%s5066_s1 + $0x748] sm:$0xff]  }
  0xb2   :  { %3681 = vmatpush3.bf16.msra.mxu1 %v3996_v31  ;;  %v739_v31 = vcombine.high %v717_v26, %v717_v26 }
  0xb3   :  { %3682 = vmatprep.subr.bf16.mxu1 %v3998_v33  ;;  %v4048_v33 = vld [vmem:[%s5066_s1 + $0x780] sm:$0xff]  }
  0xb4   :  { %3661 = vmatpush3.bf16.msra.mxu0 %v3999_v34  ;;  %v742_v34 = vcombine.high %v738_v30, %v738_v30 }
  0xb5   :  { %3662 = vmatprep.subr.bf16.mxu0 %v4001_v36  ;;  %v4050_v36 = vld [vmem:[%s5066_s1 + $0x708] sm:$0xff]  }
  0xb6   :  { %3683 = vmatpush3.bf16.msra.mxu1 %v4000_v35  ;;  %v4114_v35 = vmov 0  }
  0xb7   :  { %3684 = vmatprep.subr.bf16.mxu1 %v4002_v37  ;;  %v4052_v37 = vld [vmem:[%s5066_s1 + $0x750] sm:$0xff]  }
  0xb8   :  { %3663 = vmatpush3.bf16.msra.mxu0 %v4003_v38  ;;  %v4051_v38 = vld [vmem:[%s5066_s1 + $0x788] sm:$0xff]  }
  0xb9   :  { %3664 = vmatprep.subr.bf16.mxu0 %v4005_v40  ;;  %v4055_v40 = vld [vmem:[%s5066_s1 + $0x758] sm:$0xff]  }
  0xba   :  { %3685 = vmatpush3.bf16.msra.mxu1 %v4004_v39  ;;  %v4053_v39 = vld [vmem:[%s5066_s1 + $0x710] sm:$0xff]  }
  0xbb   :  { %3686 = vmatprep.subr.bf16.mxu1 %v4006_v42  ;;  %v4054_v42 = vld [vmem:[%s5066_s1 + $0x790] sm:$0xff]  }
  0xbc   :  { %3665 = vmatpush3.bf16.msra.mxu0 %v4007_v43  ;;  %v4056_v43 = vld [vmem:[%s5066_s1 + $0x718] sm:$0xff]  }
  0xbd   :  { %3666 = vmatprep.subr.bf16.mxu0 %v4009_v45  ;;  %v4057_v45 = vld [vmem:[%s5066_s1 + $0x798] sm:$0xff]  }
  0xbe   :  { %3687 = vmatpush3.bf16.msra.mxu1 %v4008_v44  ;;  %v4058_v44 = vld [vmem:[%s5066_s1 + $0x760] sm:$0xff]  }
  0xbf   :  { %3688 = vmatprep.subr.bf16.mxu1 %v4010_v46  ;;  %v4059_v46 = vld [vmem:[%s5066_s1 + $0x720] sm:$0xff]  }
  0xc0   :  { %3667 = vmatpush3.bf16.msra.mxu0 %v4011_v47  ;;  %v4060_v47 = vld [vmem:[%s5066_s1 + $0x7a0] sm:$0xff]  }
  0xc1   :  { %3696 = vmatprep.subr.bf16.mxu0 %v4014_v50  ;;  %v4064_v50 = vld [vmem:[%s5066_s1 + $0x770] sm:$0xff]  }
  0xc2   :  { %3689 = vmatpush3.bf16.msra.mxu1 %v4012_v48  ;;  %v4061_v48 = vld [vmem:[%s5066_s1 + $0x768] sm:$0xff]  }
  0xc3   :  { %2723 = vmatmul.mubr.bf16.vlgmr.msra.gmra.mrb[20].mxu0 %v675_v49  ;;  %3718 = vmatprep.subr.bf16.mxu1 %v4015_v51  ;;  %v4062_v49 = vld [vmem:[%s5066_s1 + $0x728] sm:$0xff]  }
  0xc4   :  { %3697 = vmatpush3.bf16.msra.mxu0 %v4016_v52  ;;  %2802 = vmatprep.mubr.bf16.mxu0 %v731_v22  ;;  %v4063_v51 = vld [vmem:[%s5066_s1 + $0x7a8] sm:$0xff]   ;;  %v3160_v52 = vld [vmem:[%s5067_s2] ss:$0 sm:$0xff] }
  0xc5   :  { %2763 = vmatmul.mubr.bf16.vlgmr.msra.gmra.mrb[20].mxu1 %v691_v54  ;;  %3698 = vmatprep.subr.bf16.mxu0 %v4018_v55  ;;  %v4065_v54 = vld [vmem:[%s5066_s1 + $0x730] sm:$0xff]  }
  0xc6   :  { %3719 = vmatpush3.bf16.msra.mxu1 %v4017_v53  ;;  %2842 = vmatprep.mubr.bf16.mxu1 %v741_v25 }
  0xc7   :  { %3720 = vmatprep.subr.bf16.mxu1 %v4019_v56  ;;  %v4067_v56 = vld [vmem:[%s5066_s1 + $0x778] sm:$0xff]  }
  0xc8   :  { %3699 = vmatpush3.bf16.msra.mxu0 %v4020_v57 }
  0xc9   :  { %3700 = vmatprep.subr.bf16.mxu0 %v4022_v59 }
  0xca   :  { %3721 = vmatpush3.bf16.msra.mxu1 %v4021_v58 }
  0xcb   :  { %3722 = vmatprep.subr.bf16.mxu1 %v4023_v60 }
  0xcc   :  { %3701 = vmatpush3.bf16.msra.mxu0 %v4024_v61 }
  0xcd   :  { %3702 = vmatprep.subr.bf16.mxu0 %v4026_v63 }
  0xce   :  { %3723 = vmatpush3.bf16.msra.mxu1 %v4025_v62 }
  0xcf   :  { %3724 = vmatprep.subr.bf16.mxu1 %v4027_v0 }
  0xd0   :  { %3703 = vmatpush3.bf16.msra.mxu0 %v4028_v1  ;;  %v4066_v1 = vld [vmem:[%s5066_s1 + $0x7b0] sm:$0xff]  }
  0xd1   :  { %3704 = vmatprep.subr.bf16.mxu0 %v4030_v3  ;;  %v4068_v3 = vld [vmem:[%s5066_s1 + $0x738] sm:$0xff]  }
  0xd2   :  { %3725 = vmatpush3.bf16.msra.mxu1 %v4029_v2 }
  0xd3   :  { %3726 = vmatprep.subr.bf16.mxu1 %v4031_v4 }
  0xd4   :  { %3705 = vmatpush3.bf16.msra.mxu0 %v4032_v5 }
  0xd5   :  { %3706 = vmatprep.subr.bf16.mxu0 %v4034_v7 }
  0xd6   :  { %3727 = vmatpush3.bf16.msra.mxu1 %v4033_v6 }
  0xd7   :  { %3728 = vmatprep.subr.bf16.mxu1 %v4035_v8 }
  0xd8   :  { %3707 = vmatpush3.bf16.msra.mxu0 %v4036_v9 }
  0xd9   :  { %3708 = vmatprep.subr.bf16.mxu0 %v4038_v11 }
  0xda   :  { %3729 = vmatpush3.bf16.msra.mxu1 %v4037_v10 }
  0xdb   :  { %3730 = vmatprep.subr.bf16.mxu1 %v4039_v13 }
  0xdc   :  { %3709 = vmatpush3.bf16.msra.mxu0 %v4040_v16 }
  0xdd   :  { %3710 = vmatprep.subr.bf16.mxu0 %v4042_v17 }
  0xde   :  { %3731 = vmatpush3.bf16.msra.mxu1 %v4041_v20 }
  0xdf   :  { %3732 = vmatprep.subr.bf16.mxu1 %v4043_v21 }
  0xe0   :  { %3711 = vmatpush3.bf16.msra.mxu0 %v4044_v23 }
  0xe1   :  { %3740 = vmatprep.subr.bf16.mxu0 %v4046_v27 }
  0xe2   :  { %3733 = vmatpush3.bf16.msra.mxu1 %v4045_v28 }
  0xe3   :  { %2803 = vmatmul.mubr.bf16.vlgmr.msra.gmra.mrb[24].mxu0 %v717_v26  ;;  %2890 = vmatprep.subr.bf16.mxu1 %v4114_v35 }
  0xe4   :  { %3741 = vmatpush3.bf16.msra.mxu0 %v4047_v29  ;;  %2882 = vmatprep.mubr.bf16.mxu0 %v738_v30 }
  0xe5   :  { %2843 = vmatmul.mubr.bf16.vlgmr.msra.gmra.mrb[24].mxu1 %v739_v31  ;;  %3742 = vmatprep.subr.bf16.mxu0 %v4049_v32 }
  0xe6   :  { %2891 = vmatpush1.bf16.msra.mxu1 %v4048_v33  ;;  %3413 = vmatprep.mubr.msk.bf16.mxu1 %vm2286_vm0, %v742_v34 }
  0xe7   :  { %2892 = vmatprep.subr.bf16.mxu1 %v4114_v35 }
  0xe8   :  { %3743 = vmatpush3.bf16.msra.mxu0 %v4050_v36 }
  0xe9   :  { %3744 = vmatprep.subr.bf16.mxu0 %v4052_v37 }
  0xea   :  { %2893 = vmatpush1.bf16.msra.mxu1 %v4051_v38 }
  0xeb   :  { %2894 = vmatprep.subr.bf16.mxu1 %v4114_v35 }
  0xec   :  { %3745 = vmatpush3.bf16.msra.mxu0 %v4053_v39 }
  0xed   :  { %3746 = vmatprep.subr.bf16.mxu0 %v4055_v40 }
  0xee   :  { %2895 = vmatpush1.bf16.msra.mxu1 %v4054_v42 }
  0xef   :  { %2896 = vmatprep.subr.bf16.mxu1 %v4114_v35 }
  0xf0   :  { %3747 = vmatpush3.bf16.msra.mxu0 %v4056_v43 }
  0xf1   :  { %3748 = vmatprep.subr.bf16.mxu0 %v4058_v44 }
  0xf2   :  { %2897 = vmatpush1.bf16.msra.mxu1 %v4057_v45 }
  0xf3   :  { %2898 = vmatprep.subr.bf16.mxu1 %v4114_v35 }
  0xf4   :  { %3749 = vmatpush3.bf16.msra.mxu0 %v4059_v46 }
  0xf5   :  { %3750 = vmatprep.subr.bf16.mxu0 %v4061_v48 }
  0xf6   :  { %2899 = vmatpush1.bf16.msra.mxu1 %v4060_v47  ;;  %v3448_v53 = vpop.f32.mrb[0].mxu0 }
  0xf7   :  { %v3449_v55 = vpop.f32.mrb[1].mxu0  ;;  %2900 = vmatprep.subr.bf16.mxu1 %v4114_v35  ;;  %v3470_v57 = vpop.f32.mrb[0].mxu1 }
  0xf8   :  { %v3450_v58 = vadd.f32 %v3449_v55, %v3448_v53  ;;  %3751 = vmatpush3.bf16.msra.mxu0 %v4062_v49  ;;  %v3451_v59 = vpop.f32.mrb[2].mxu0  ;;  %v3471_v60 = vpop.f32.mrb[1].mxu1 }
  0xf9   :  { %3752 = vmatprep.subr.bf16.mxu0 %v4064_v50  ;;  %v3452_v61 = vpop.f32.mrb[3].mxu0  ;;  %v3472_v63 = vadd.f32 %v3471_v60, %v3470_v57  ;;  %v3473_v0 = vpop.f32.mrb[2].mxu1 }
  0xfa   :  { %v2325_v62 = vadd.f32 %v3450_v58, %v3160_v52  ;;  %2901 = vmatpush1.bf16.msra.mxu1 %v4063_v51  ;;  %v3474_v2 = vpop.f32.mrb[3].mxu1 }
  0xfb   :  { %2902 = vmatprep.subr.bf16.mxu1 %v4114_v35 }
  0xfc   :  { %v2365_v4 = vadd.f32 %v3472_v63, %v2325_v62  ;;  %3753 = vmatpush3.bf16.msra.mxu0 %v4065_v54 }
  0xfd   :  { %3754 = vmatprep.subr.bf16.mxu0 %v4067_v56 }
  0xfe   :  { %12 = vsyncpa [#allocation3], 0  ;;  %2903 = vmatpush1.bf16.msra.mxu1 %v4066_v1  ;;  %v4069_v5 = vld [vmem:[%s5066_s1 + $0x7b8] sm:$0xff]   ;;  %v724_v6 = vrot.slane %v4867_v19, %v4263_v41  ;;  %v4071_v7 = vld [vmem:[%s5066_s1 + $0x7c0] sm:$0xff]   ;;  %v4115_v36 = vmov 0.0   ;;  %vm2994_vm1 = vcmask 1041408  }
  0xff   :  { %2904 = vmatprep.subr.bf16.mxu1 %v4114_v35  ;;  %v4072_v8 = vld [vmem:[%s5066_s1 + $0x7c8] sm:$0xff]   ;;  %v4073_v41 = vld [vmem:[%s5066_s1 + $0x7d0] sm:$0xff]   ;;  %v4074_v9 = vld [vmem:[%s5066_s1 + $0x7d8] sm:$0xff]   ;;  %vm4116_vm2 = vmmov 0   ;;  %vm2990_vm3 = vcmask 818176   ;;  %s4117_s9 = smov [#allocation2]  }
 0x100   :  { %3755 = vmatpush3.bf16.msra.mxu0 %v4068_v3  ;;  %v740_v10 = vcombine.high %v724_v6, %v724_v6  ;;  %v4076_v37 = vld [vmem:[%s5068_s3 + $0x8] sm:$0xff]   ;;  %v4077_v44 = vld [vmem:[%s5068_s3 + $0x10] sm:$0xff]   ;;  %v4078_v50 = vld [vmem:[%s5068_s3 + $0x18] sm:$0xff]   ;;  %vm3144_vm4 = vcmask 41984  }
 0x101   :  { %3778 = vmatprep.subr.bf16.mxu0 %v4115_v36  ;;  %v4079_v53 = vld [vmem:[%s5068_s3 + $0x20] sm:$0xff]   ;;  %v4080_v54 = vld [vmem:[%s5068_s3 + $0x28] sm:$0xff]   ;;  %v4081_v55 = vld [vmem:[%s5068_s3 + $0x30] ss:$0 sps:$4 sm:$0x33]  }
 0x102   :  { %2905 = vmatpush1.bf16.msra.mxu1 %v4069_v5  ;;  %v2996_v56 = vsel %vm2994_vm1, %v4081_v55, 0  ;;  %v4082_v57 = vld [vmem:[%s5070_s5] sm:$0xff]   ;;  %v4083_v58 = vld [vmem:[%s5070_s5 + $0x8] sm:$0xff]   ;;  %v4084_v59 = vld [vmem:[%s5070_s5 + $0x10] sm:$0xff]  }
 0x103   :  { %2883 = vmatmul.mubr.bf16.vlgmr.msra.gmra.mrb[28].mxu0 %v724_v6  ;;  %2906 = vmatprep.subr.bf16.mxu1 %v4114_v35  ;;  %v4085_v62 = vld [vmem:[%s5070_s5 + $0x18] sm:$0xff]  }
 0x104   :  { %3792 = vmatprep.mubr.msk.bf16.mxu0 %vm4116_vm2, %v4115_v36 }
 0x106   :  { %2907 = vmatpush1.bf16.msra.mxu1 %v4071_v7 }
 0x107   :  { %2908 = vmatprep.subr.bf16.mxu1 %v4114_v35 }
 0x10a   :  { %2909 = vmatpush1.bf16.msra.mxu1 %v4072_v8  ;;  %v4086_v8 = vld [vmem:[%s5070_s5 + $0x20] sm:$0xff]  }
 0x10b   :  { %2910 = vmatprep.subr.bf16.mxu1 %v4114_v35 }
 0x10e   :  { %2911 = vmatpush1.bf16.msra.mxu1 %v4073_v41 }
 0x10f   :  { %2912 = vmatprep.subr.bf16.mxu1 %v4114_v35  ;;  %v4075_v35 = vld [vmem:[%s5068_s3] sm:$0xff]  }
 0x110   :  { %3779 = vmatpush3.bf16.msra.mxu0 %v4075_v35 }
 0x111   :  { %3780 = vmatprep.subr.bf16.mxu0 %v4115_v36 }
 0x112   :  { %2913 = vmatpush1.bf16.msra.mxu1 %v4074_v9  ;;  %v4087_v9 = vld [vmem:[%s5070_s5 + $0x28] sm:$0xff]  }
 0x113   :  { %3796 = vmatprep.subr.bf16.mxu1 %v4115_v36 }
 0x114   :  { %3781 = vmatpush3.bf16.msra.mxu0 %v4076_v37 }
 0x115   :  { %2923 = vmatmul.mubr.bf16.vlgmr.msra.gmra.mrb[28].mxu1 %v740_v10  ;;  %3782 = vmatprep.subr.bf16.mxu0 %v4115_v36 }
 0x116   :  { %v3492_v11 = vpop.f32.mrb[4].mxu0  ;;  %3810 = vmatprep.mubr.msk.bf16.mxu1 %vm4116_vm2, %v4115_v36  ;;  %3797 = vmatpush3.bf16.msra.mxu1 %v4082_v57 }
 0x117   :  { %v3493_v12 = vpop.f32.mrb[5].mxu0  ;;  %v3514_v13 = vpop.f32.mrb[4].mxu1  ;;  %3798 = vmatprep.subr.bf16.mxu1 %v4115_v36 }
 0x118   :  { %v3494_v14 = vadd.f32 %v3493_v12, %v3492_v11  ;;  %v3495_v15 = vpop.f32.mrb[6].mxu0  ;;  %v3515_v16 = vpop.f32.mrb[5].mxu1  ;;  %3783 = vmatpush3.bf16.msra.mxu0 %v4077_v44 }
 0x119   :  { %v3496_v17 = vpop.f32.mrb[7].mxu0  ;;  %v3516_v19 = vadd.f32 %v3515_v16, %v3514_v13  ;;  %v3517_v20 = vpop.f32.mrb[6].mxu1  ;;  %3784 = vmatprep.subr.bf16.mxu0 %v4115_v36 }
 0x11a   :  { %v2405_v18 = vadd.f32 %v3494_v14, %v2365_v4  ;;  %v3518_v21 = vpop.f32.mrb[7].mxu1  ;;  %3799 = vmatpush3.bf16.msra.mxu1 %v4083_v58 }
 0x11b   :  { %3800 = vmatprep.subr.bf16.mxu1 %v4115_v36 }
 0x11c   :  { %v2445_v22 = vadd.f32 %v3516_v19, %v2405_v18  ;;  %3785 = vmatpush3.bf16.msra.mxu0 %v4078_v50 }
 0x11d   :  { %3786 = vmatprep.subr.bf16.mxu0 %v4115_v36 }
 0x11e   :  { %3801 = vmatpush3.bf16.msra.mxu1 %v4084_v59 }
 0x11f   :  { %3802 = vmatprep.subr.bf16.mxu1 %v4115_v36 }
 0x120   :  { %3787 = vmatpush3.bf16.msra.mxu0 %v4079_v53 }
 0x121   :  { %3788 = vmatprep.subr.bf16.mxu0 %v4115_v36 }
 0x122   :  { %3803 = vmatpush3.bf16.msra.mxu1 %v4085_v62 }
 0x123   :  { %3804 = vmatprep.subr.bf16.mxu1 %v4115_v36 }
 0x124   :  { %3789 = vmatpush3.bf16.msra.mxu0 %v4080_v54 }
 0x125   :  { %3790 = vmatprep.subr.bf16.mxu0 %v4115_v36 }
 0x126   :  { %3805 = vmatpush3.bf16.msra.mxu1 %v4086_v8 }
 0x127   :  { %3806 = vmatprep.subr.bf16.mxu1 %v4115_v36 }
 0x128   :  { %3791 = vmatpush3.bf16.msra.mxu0 %v2996_v56  ;;  %v3423_v56 = vld [vmem:[%s5071_s6] ss:$0 sm:$0xff] }
 0x12a   :  { %3807 = vmatpush3.bf16.msra.mxu1 %v4087_v9 }
 0x12b   :  { %3808 = vmatprep.subr.bf16.mxu1 %v4115_v36 }
 0x136   :  { %v3536_v23 = vpop.f32.mrb[8].mxu0 }
 0x137   :  { %v3537_v24 = vpop.f32.mrb[9].mxu0 }
 0x138   :  { %v3558_v25 = vpop.f32.mrb[8].mxu1  ;;  %v3538_v26 = vadd.f32 %v3537_v24, %v3536_v23  ;;  %v3539_v27 = vpop.f32.mrb[10].mxu0 }
 0x139   :  { %v3559_v28 = vpop.f32.mrb[9].mxu1  ;;  %v3540_v29 = vpop.f32.mrb[11].mxu0 }
 0x13a   :  { %v2485_v30 = vadd.f32 %v3538_v26, %v2445_v22  ;;  %v3560_v31 = vadd.f32 %v3559_v28, %v3558_v25  ;;  %v3561_v32 = vpop.f32.mrb[10].mxu1 }
 0x13b   :  { %v3562_v33 = vpop.f32.mrb[11].mxu1 }
 0x13c   :  { %v2525_v34 = vadd.f32 %v3560_v31, %v2485_v30 }
 0x156   :  { %v3580_v38 = vpop.f32.mrb[12].mxu0 }
 0x157   :  { %v3581_v39 = vpop.f32.mrb[13].mxu0 }
 0x158   :  { %v3602_v40 = vpop.f32.mrb[12].mxu1  ;;  %v3582_v42 = vadd.f32 %v3581_v39, %v3580_v38  ;;  %v3583_v43 = vpop.f32.mrb[14].mxu0 }
 0x159   :  { %v3603_v45 = vpop.f32.mrb[13].mxu1  ;;  %v3584_v46 = vpop.f32.mrb[15].mxu0 }
 0x15a   :  { %v2565_v47 = vadd.f32 %v3582_v42, %v2525_v34  ;;  %v3604_v48 = vadd.f32 %v3603_v45, %v3602_v40  ;;  %v3605_v49 = vpop.f32.mrb[14].mxu1 }
 0x15b   :  { %v3606_v51 = vpop.f32.mrb[15].mxu1  ;;  %v3414_v49 = vld [vmem:[%s5069_s4] ss:$0 sm:$0xff] }
 0x15c   :  { %v2605_v52 = vadd.f32 %v3604_v48, %v2565_v47  ;;  %v4088_v47 = vld [vmem:[%s5070_s5 + $0x30] ss:$0 sps:$4 sm:$0x33]   ;;  %s3152_s5 = sshll.u32 %s4117_s9, 4  ;;  %s3153_s5 = int_to_ptr.vmem [resolvable:$true] %s3152_s5 }
 0x15d   :  { %v3102_v48 = vsel %vm2994_vm1, %v4088_v47, 0  ;;  %s4089_s4 = scalar_lea.vmem %s3153_s5, 32  ;;  %p4094_p1 = scmp.lt.s32.totalorder %s3153_s5, %s3153_s5 }
 0x15e   :  { %3809 = vmatpush3.bf16.msra.mxu1 %v3102_v48  ;;  %p4090_p0 = scmp.ne.s32.totalorder %s3153_s5, %s4089_s4  ;;  %p4095_p2 = scmp.lt.s32.totalorder %s4089_s4, %s4089_s4 }
 0x160   :  { %p4096_p3 = por %p4095_p2, %p4094_p1 }
 0x162   :  { %p4097_p4 = pnand %p4096_p3, %p4090_p0 }
 0x176   :  { %v3624_v60 = vpop.f32.mrb[16].mxu0 }
 0x177   :  { %v3625_v61 = vpop.f32.mrb[17].mxu0 }
 0x178   :  { %v3646_v63 = vpop.f32.mrb[16].mxu1  ;;  %v3626_v0 = vadd.f32 %v3625_v61, %v3624_v60  ;;  %v3627_v1 = vpop.f32.mrb[18].mxu0 }
 0x179   :  { %v3647_v2 = vpop.f32.mrb[17].mxu1  ;;  %v3628_v3 = vpop.f32.mrb[19].mxu0 }
 0x17a   :  { %v2645_v4 = vadd.f32 %v3626_v0, %v2605_v52  ;;  %v3648_v5 = vadd.f32 %v3647_v2, %v3646_v63  ;;  %v3649_v6 = vpop.f32.mrb[18].mxu1 }
 0x17b   :  { %v3650_v7 = vpop.f32.mrb[19].mxu1 }
 0x17c   :  { %v2685_v41 = vadd.f32 %v3648_v5, %v2645_v4 }
 0x196   :  { %v3668_v10 = vpop.f32.mrb[20].mxu0 }
 0x197   :  { %v3669_v11 = vpop.f32.mrb[21].mxu0 }
 0x198   :  { %v3690_v12 = vpop.f32.mrb[20].mxu1  ;;  %v3670_v13 = vadd.f32 %v3669_v11, %v3668_v10  ;;  %v3671_v14 = vpop.f32.mrb[22].mxu0 }
 0x199   :  { %v3691_v15 = vpop.f32.mrb[21].mxu1  ;;  %v3672_v16 = vpop.f32.mrb[23].mxu0 }
 0x19a   :  { %v2725_v17 = vadd.f32 %v3670_v13, %v2685_v41  ;;  %v3692_v18 = vadd.f32 %v3691_v15, %v3690_v12  ;;  %v3693_v19 = vpop.f32.mrb[22].mxu1 }
 0x19b   :  { %v3694_v20 = vpop.f32.mrb[23].mxu1 }
 0x19c   :  { %v2765_v21 = vadd.f32 %v3692_v18, %v2725_v17 }
 0x1b6   :  { %v3712_v22 = vpop.f32.mrb[24].mxu0 }
 0x1b7   :  { %v3713_v23 = vpop.f32.mrb[25].mxu0 }
 0x1b8   :  { %v3734_v24 = vpop.f32.mrb[24].mxu1  ;;  %v3714_v25 = vadd.f32 %v3713_v23, %v3712_v22  ;;  %v3715_v26 = vpop.f32.mrb[26].mxu0 }
 0x1b9   :  { %v3735_v27 = vpop.f32.mrb[25].mxu1  ;;  %v3716_v28 = vpop.f32.mrb[27].mxu0 }
 0x1ba   :  { %v2805_v29 = vadd.f32 %v3714_v25, %v2765_v21  ;;  %v3736_v30 = vadd.f32 %v3735_v27, %v3734_v24  ;;  %v3737_v31 = vpop.f32.mrb[26].mxu1 }
 0x1bb   :  { %v3738_v32 = vpop.f32.mrb[27].mxu1 }
 0x1bc   :  { %v2845_v33 = vadd.f32 %v3736_v30, %v2805_v29 }
 0x1d6   :  { %v3756_v34 = vpop.f32.mrb[28].mxu0 }
 0x1d7   :  { %v3757_v35 = vpop.f32.mrb[29].mxu0 }
 0x1d8   :  { %v3758_v36 = vadd.f32 %v3757_v35, %v3756_v34  ;;  %v3759_v37 = vpop.f32.mrb[30].mxu0 }
 0x1d9   :  { %v3760_v38 = vpop.f32.mrb[31].mxu0 }
 0x1da   :  { %v2885_v39 = vadd.f32 %v3758_v36, %v2845_v33 }
 0x1e8   :  { %v2924_v40 = vpop.f32.mrb[28].mxu1 }
 0x1e9   :  { %v2925_v42 = vadd.f32 %v2924_v40, %v2885_v39  ;;  %v2926_v43 = vpop.f32.mrb[29].mxu1 }
 0x1ea   :  { %v2927_v44 = vpop.f32.mrb[30].mxu1 }
 0x1eb   :  { %v2930_v45 = vpack.c.bf16 %v2925_v42, %v2925_v42  ;;  %v2928_v46 = vpop.f32.mrb[31].mxu1 }
 0x1ed   :  { %3793 = vmatmul.mubr.msk.bf16.vlgmr.msra.gmra.mrb[32].mxu0 %vm2990_vm3, %v2930_v45 }
 0x2c0   :  { %v3032_v50 = vpop.f32.mrb[32].mxu0 }
 0x2c1   :  { %v3033_v51 = vadd.f32 %v3414_v49, %v3032_v50  ;;  %v3794_v52 = vpop.f32.mrb[33].mxu0 }
 0x2c2   :  { %v3035_v53 = vpop.f32.mrb[34].mxu0 }
 0x2c3   :  { %v3038_v54 = vpack.c.bf16 %v3033_v51, %v3033_v51  ;;  %v3795_v55 = vpop.f32.mrb[35].mxu0 }
 0x2c5   :  { %3811 = vmatmul.mubr.msk.bf16.vlgmr.msra.gmra.mrb[32].mxu1 %vm2990_vm3, %v3038_v54 }
 0x398   :  { %v3138_v57 = vpop.f32.mrb[32].mxu1 }
 0x399   :  { %v3139_v58 = vadd.f32 %v3423_v56, %v3138_v57  ;;  %v3812_v59 = vpop.f32.mrb[33].mxu1 }
 0x39a   :  { %v3141_v60 = vpop.f32.mrb[34].mxu1 }
 0x39b   :  { %v3813_v61 = vpop.f32.mrb[35].mxu1  ;;  %3145 = vst.msk [vmem:[#allocation2] sm:$0x3] %vm3144_vm4, %v3139_v58 }
 0x39c   :  { %4100 = shalt.err (!%p4097_p4)
}
 0x39d   :  { %s4101_s6 = scalar_lea.hbm %s5072_s7, 32 }
 0x39e   :  { %p4102_p5 = scmp.ne.s32.totalorder %s5072_s7, %s4101_s6  ;;  %p4105_p6 = scmp.lt.u32.totalorder %s4101_s6, %s5072_s7 }
 0x3a0   :  { %p4107_p7 = pnand %p4105_p6, %p4102_p5 }
 0x3a2   :  { %4110 = shalt.err (!%p4107_p7)
}
 0x3a3   :  { %3155 = dma.vmem_to_hbm [thread:$0]  %s3153_s5, 32, %s5072_s7, [#allocation3]  }
 0x3a4   :  { %4111 = dma.done.wait [#allocation3], 32  }
 0x3a5   :  { %4112 = vsyncadd [#allocation3], 4294967264 }
 0x3a6   :  { %3159 = vsyncpa [#allocation3], 1 }

</bundles_post_ra>
